<compile_context>
chip_gen: v6e
topology: v6e:2x2x1
jax: 0.10.0
libtpu: 0.0.40
codegen_flags: <defaults>
</compile_context>

<pallas_src>
import functools
import math

import jax
import jax.numpy as jnp
from jax.experimental import pallas as pl
from jax.experimental.pallas import tpu as pltpu


_WEIGHT_ORDER = ('qkvw', 'qkvb', 'owh', 'ob',
                 'n1w', 'n1b', 'n2w', 'n2b',
                 'l1w', 'l1b', 'l2w', 'l2b',
                 'projw', 'projb')


def _layer_norm(x, w, b, eps=1e-5):
    mean = jnp.mean(x, axis=-1, keepdims=True)
    var = jnp.mean((x - mean) ** 2, axis=-1, keepdims=True)
    return (x - mean) * jax.lax.rsqrt(var + eps) * w + b


def transformer_pooling_kernel(
        x_ref, mask_ref,
        qkvw_ref, qkvb_ref, owh_ref, ob_ref,
        n1w_ref, n1b_ref, n2w_ref, n2b_ref,
        l1w_ref, l1b_ref, l2w_ref, l2b_ref,
        projw_ref, projb_ref,
        o_ref,
        *, num_layers, num_heads):
    f32 = jnp.float32
    bf16 = jnp.bfloat16

    TB, S, D = x_ref.shape
    H = num_heads
    hd = D // H

    x = x_ref[...].astype(f32)                                   # (TB, S, D)
    mask = mask_ref[...].astype(f32)                             # (TB, S); 1 = token, 0 = pad

    # src_key_padding_mask bias: computed/broadcast ONCE (hoisted out of all loops).
    key_bias = jnp.where(mask == 0.0, -1e30, 0.0)[:, None, :]    # (TB, 1, S)

    for l in range(num_layers):
        # ---- fused, lane-dense QKV projection on 2-D (TB*S, D) activations ----
        x2d = x.reshape(TB * S, D).astype(bf16)
        qkv = jnp.dot(x2d, qkvw_ref[l],
                      preferred_element_type=f32) + qkvb_ref[l]  # (TB*S, 3D)
        qkv = qkv.reshape(TB, S, 3 * D)

        # ---- multi-head self-attention (per-head score loop; dropout = identity) ----
        attn2d = None
        for h in range(H):
            q_h = qkv[:, :, h * hd:(h + 1) * hd].astype(bf16)            # (TB, S, hd), pre-scaled
            k_h = qkv[:, :, D + h * hd:D + (h + 1) * hd].astype(bf16)
            v_h = qkv[:, :, 2 * D + h * hd:2 * D + (h + 1) * hd].astype(bf16)

            s = jnp.einsum('bqd,bkd->bqk', q_h, k_h,
                           preferred_element_type=f32)                    # (TB, S, S)
            s = s + key_bias

            # deferred-normalization softmax: exp + exact divide on the hd-wide context
            m = jnp.max(s, axis=-1, keepdims=True)
            p = jnp.exp(s - m)                                            # f32 (reuses s slot)
            denom = jnp.sum(p, axis=-1, keepdims=True)                    # (TB, S, 1) f32
            ctx = jnp.einsum('bqk,bkd->bqd', p.astype(bf16), v_h,
                             preferred_element_type=f32)                  # (TB, S, hd)
            ctx = ctx / denom                                             # exact, hd-wide

            # fold this head straight into the output projection (no concatenate)
            contrib = jnp.dot(ctx.reshape(TB * S, hd).astype(bf16), owh_ref[l, h],
                              preferred_element_type=f32)                 # (TB*S, D)
            attn2d = contrib if attn2d is None else attn2d + contrib

        attn = attn2d.reshape(TB, S, D) + ob_ref[l]
        x = _layer_norm(x + attn, n1w_ref[l], n1b_ref[l])

        # ---- feed forward on 2-D activations: linear1 -> relu -> linear2 ----
        xb2 = x.reshape(TB * S, D).astype(bf16)
        h1 = jnp.maximum(
            jnp.dot(xb2, l1w_ref[l], preferred_element_type=f32) + l1b_ref[l], 0.0)
        ff = jnp.dot(h1.astype(bf16), l2w_ref[l],
                     preferred_element_type=f32) + l2b_ref[l]
        x = _layer_norm(x + ff.reshape(TB, S, D), n2w_ref[l], n2b_ref[l])

    # cls_representation = transformer_output[0] (first sequence position)
    cls = x[:, 0, :]                                             # (TB, D)
    out = jnp.dot(cls.astype(bf16), projw_ref[...],
                  preferred_element_type=f32) + projb_ref[0]     # (TB, P) lane-dense
    o_ref[...] = out.astype(o_ref.dtype)


def _pack_params(params, *, num_heads, d_out_pad, compute_dtype=jnp.bfloat16):
    """Host-side weight prep: pre-transpose, fuse QKV, fold softmax scale, pad proj."""
    f32 = jnp.float32
    in_w = params['in_w']                                        # (L, 3D, D)
    in_b = params['in_b']                                        # (L, 3D)
    L, _, D = in_w.shape
    H = num_heads
    hd = D // H
    scale = 1.0 / math.sqrt(hd)

    # fused (D, 3D) projection, columns ordered [Q | K | V]; softmax scale folded into Q
    qw = jnp.transpose(in_w[:, :D, :], (0, 2, 1)) * scale        # (L, D, D)
    kvw = jnp.transpose(in_w[:, D:, :], (0, 2, 1))               # (L, D, 2D)
    qkvw = jnp.concatenate([qw, kvw], axis=-1)                   # (L, D, 3D)
    qkvb = jnp.concatenate([in_b[:, :D] * scale, in_b[:, D:]], axis=-1)   # (L, 3D)

    # per-head rows of the (transposed) output projection: ctx_h @ owh[l,h] accumulates
    owh = jnp.transpose(params['out_w'], (0, 2, 1)).reshape(L, H, hd, D)  # (L, H, hd, D)

    l1w = jnp.transpose(params['l1_w'], (0, 2, 1))               # (L, D, dff)
    l2w = jnp.transpose(params['l2_w'], (0, 2, 1))               # (L, dff, D)

    proj_w = params['proj_w']                                    # (d_out, D)
    proj_b = params['proj_b']                                    # (1, d_out)
    d_out = proj_w.shape[0]
    projw = jnp.pad(proj_w.T, ((0, 0), (0, d_out_pad - d_out)))  # (D, P)
    projb = jnp.pad(proj_b, ((0, 0), (0, d_out_pad - d_out)))    # (1, P)

    return dict(
        qkvw=qkvw.astype(compute_dtype), qkvb=qkvb.astype(f32),
        owh=owh.astype(compute_dtype), ob=params['out_b'].astype(f32),
        n1w=params['n1_w'].astype(f32), n1b=params['n1_b'].astype(f32),
        n2w=params['n2_w'].astype(f32), n2b=params['n2_b'].astype(f32),
        l1w=l1w.astype(compute_dtype), l1b=params['l1_b'].astype(f32),
        l2w=l2w.astype(compute_dtype), l2b=params['l2_b'].astype(f32),
        projw=projw.astype(compute_dtype), projb=projb.astype(f32),
    )


def _const_index_map(i, *, ndim):
    return (0,) * ndim


def _candidate_tiles(B):
    """Batch tiles that are either the full batch or a multiple of 8 dividing B."""
    cands = {B}
    t = 8
    while t < B:
        if B % t == 0:
            cands.add(t)
        t += 8
    return sorted(cands, reverse=True)


def _tile_vmem_bytes(TB, S, D, dff, P, weight_bytes):
    """Rough per-grid-step VMEM footprint (f32 activations, double-buffered I/O + weights)."""
    f32 = 4
    x_tile = TB * S * D * f32
    io = 2 * (x_tile + TB * S * f32 + TB * P * f32)   # double-buffered x / mask / out tiles
    wts = 2 * weight_bytes                            # BlockSpec double-buffers weights too
    act = 7 * x_tile + TB * S * dff * f32             # x, qkv(3D), attn/ctx/ffn temporaries
    scores = 2 * TB * S * S * f32                     # per-head s / p in flight
    return io + wts + act + scores


def _vmem_budget_bytes():
    try:
        cap = int(pltpu.get_tpu_info().vmem_capacity_bytes)
    except Exception:
        cap = 128 * 1024 * 1024
    return max(cap - 12 * 1024 * 1024, 32 * 1024 * 1024)   # leave compiler headroom


def transformer_pooling(token_features, attention_mask, params, *,
                        num_layers, num_heads, batch_tile=None):
    B, S, D = token_features.shape
    d_out = params['proj_w'].shape[0]
    P = ((d_out + 127) // 128) * 128                  # lane-dense (padded) projection width

    packed = _pack_params(params, num_heads=num_heads, d_out_pad=P)
    weight_args = [packed[k] for k in _WEIGHT_ORDER]
    weight_bytes = sum(int(w.size) * w.dtype.itemsize for w in weight_args)

    budget = _vmem_budget_bytes()
    if batch_tile is not None:
        TB = batch_tile
    else:
        cands = _candidate_tiles(B)
        TB = cands[-1]
        for t in cands:                                # largest tile that fits the budget
            if _tile_vmem_bytes(t, S, D, D, P, weight_bytes) <= budget:
                TB = t
                break
    assert B % TB == 0 and (TB == B or TB % 8 == 0), \
        "batch tile must divide B and be 8-aligned (or the full batch)"
    grid = (B // TB,)

    est = _tile_vmem_bytes(TB, S, D, D, P, weight_bytes)
    vmem_limit = int(min(max(2 * est, 32 * 1024 * 1024), budget))

    in_specs = [
        pl.BlockSpec((TB, S, D), lambda i: (i, 0, 0)),            # x: batch-tiled
        pl.BlockSpec((TB, S), lambda i: (i, 0)),                  # mask: batch-tiled
    ] + [
        pl.BlockSpec(w.shape, functools.partial(_const_index_map, ndim=w.ndim))
        for w in weight_args                                      # weights: VMEM-resident
    ]
    out_specs = pl.BlockSpec((TB, P), lambda i: (i, 0))

    out_padded = pl.pallas_call(
        functools.partial(transformer_pooling_kernel,
                          num_layers=num_layers, num_heads=num_heads),
        grid=grid,
        in_specs=in_specs,
        out_specs=out_specs,
        out_shape=jax.ShapeDtypeStruct((B, P), token_features.dtype),
        compiler_params=pltpu.CompilerParams(
            dimension_semantics=("parallel",),
            vmem_limit_bytes=vmem_limit),
    )(token_features, attention_mask, *weight_args)

    return out_padded[:, :d_out]


def init_params(key, input_dim, output_dim, num_layers):
    D = input_dim
    dff = input_dim  # dim_feedforward = input_dim in the module
    keys = jax.random.split(key, 10)

    def u(k, shape, fan_in):
        bound = 1.0 / math.sqrt(fan_in)
        return jax.random.uniform(k, shape, jnp.float32, -bound, bound)

    params = dict(
        in_w=u(keys[0], (num_layers, 3 * D, D), D),
        in_b=u(keys[1], (num_layers, 3 * D), D),
        out_w=u(keys[2], (num_layers, D, D), D),
        out_b=u(keys[3], (num_layers, D), D),
        n1_w=jnp.ones((num_layers, D), jnp.float32),
        n1_b=jnp.zeros((num_layers, D), jnp.float32),
        n2_w=jnp.ones((num_layers, D), jnp.float32),
        n2_b=jnp.zeros((num_layers, D), jnp.float32),
        l1_w=u(keys[4], (num_layers, dff, D), D),
        l1_b=u(keys[5], (num_layers, dff), D),
        l2_w=u(keys[6], (num_layers, D, dff), dff),
        l2_b=u(keys[7], (num_layers, D), dff),
    )
    if input_dim != output_dim:
        params['proj_w'] = u(keys[8], (output_dim, D), D)
        params['proj_b'] = u(keys[9], (1, output_dim), D)
    else:
        # proj is None in the module -> identity (mathematically equivalent)
        params['proj_w'] = jnp.eye(D, dtype=jnp.float32)
        params['proj_b'] = jnp.zeros((1, D), jnp.float32)
    return params


def reference_forward(token_features, attention_mask, params, *, num_layers, num_heads):
    """Pure-JAX f32 reference mirroring nn.TransformerEncoder (post-norm, relu, eval mode)."""
    x = token_features.astype(jnp.float32)
    B, S, D = x.shape
    hd = D // num_heads
    key_bias = jnp.where(attention_mask == 0.0, -1e30, 0.0)
    for l in range(num_layers):
        qkv = x @ params['in_w'][l].T + params['in_b'][l]
        q, k, v = qkv[..., :D], qkv[..., D:2 * D], qkv[..., 2 * D:]
        q = q.reshape(B, S, num_heads, hd)
        k = k.reshape(B, S, num_heads, hd)
        v = v.reshape(B, S, num_heads, hd)
        s = jnp.einsum('bqhd,bkhd->bhqk', q, k) / math.sqrt(hd)
        s = s + key_bias[:, None, None, :]
        p = jax.nn.softmax(s, axis=-1)
        ctx = jnp.einsum('bhqk,bkhd->bqhd', p, v).reshape(B, S, D)
        attn_out = ctx @ params['out_w'][l].T + params['out_b'][l]
        x = _layer_norm(x + attn_out, params['n1_w'][l], params['n1_b'][l])
        h1 = jax.nn.relu(x @ params['l1_w'][l].T + params['l1_b'][l])
        ff = h1 @ params['l2_w'][l].T + params['l2_b'][l]
        x = _layer_norm(x + ff, params['n2_w'][l], params['n2_b'][l])
    cls = x[:, 0, :]
    return cls @ params['proj_w'].T + params['proj_b'][0]


if __name__ == "__main__":
    B, S = 4, 8
    input_dim, output_dim = 32, 16
    num_layers, num_heads = 2, 4

    root = jax.random.PRNGKey(0)
    k_x, k_p = jax.random.split(root)

    token_features = jax.random.normal(k_x, (B, S, input_dim), jnp.float32)
    attention_mask = jnp.ones((B, S), jnp.float32)
    attention_mask = attention_mask.at[1, 5:].set(0.0).at[3, 3:].set(0.0)  # pad some tails

    params = init_params(k_p, input_dim, output_dim, num_layers)

    out = transformer_pooling(token_features, attention_mask, params,
                              num_layers=num_layers, num_heads=num_heads)
    out = jax.block_until_ready(out)

    ref = reference_forward(token_features, attention_mask, params,
                            num_layers=num_layers, num_heads=num_heads)
    assert out.shape == (B, output_dim)
    max_diff = float(jnp.max(jnp.abs(out - ref)))
    # bf16 MXU operands with f32 accumulation -> small deviation vs the pure-f32 reference.
    assert jnp.allclose(out, ref, rtol=5e-2, atol=5e-2), \
        f"mismatch vs JAX reference (max abs diff {max_diff})"

    print("KERNEL_OK")
</pallas_src>

<mosaic_0001>
module attributes {stable_mosaic.version = 11 : i64} {
  func.func @transformer_pooling_kernel(%arg0: i32, %arg1: memref<4x8x32xf32, #tpu.memory_space<vmem>>, %arg2: memref<4x8xf32, #tpu.memory_space<vmem>>, %arg3: memref<2x32x96xbf16, #tpu.memory_space<vmem>>, %arg4: memref<2x96xf32, #tpu.memory_space<vmem>>, %arg5: memref<2x4x8x32xbf16, #tpu.memory_space<vmem>>, %arg6: memref<2x32xf32, #tpu.memory_space<vmem>>, %arg7: memref<2x32xf32, #tpu.memory_space<vmem>>, %arg8: memref<2x32xf32, #tpu.memory_space<vmem>>, %arg9: memref<2x32xf32, #tpu.memory_space<vmem>>, %arg10: memref<2x32xf32, #tpu.memory_space<vmem>>, %arg11: memref<2x32x32xbf16, #tpu.memory_space<vmem>>, %arg12: memref<2x32xf32, #tpu.memory_space<vmem>>, %arg13: memref<2x32x32xbf16, #tpu.memory_space<vmem>>, %arg14: memref<2x32xf32, #tpu.memory_space<vmem>>, %arg15: memref<32x128xbf16, #tpu.memory_space<vmem>>, %arg16: memref<1x128xf32, #tpu.memory_space<vmem>>, %arg17: memref<4x128xf32, #tpu.memory_space<vmem>>) attributes {dimension_semantics = [#tpu.dimension_semantics<parallel>], iteration_bounds = array<i64: 1>, scalar_prefetch = 0 : i64, scratch_operands = 0 : i64, tpu.core_type = #tpu.core_type<tc>, window_params = [{transform_indices = @transform_0, window_bounds = array<i64: 4, 8, 32>}, {transform_indices = @transform_1, window_bounds = array<i64: 4, 8>}, {pipeline_mode = #tpu.pipeline_mode<synchronous>, transform_indices = @transform_2, window_bounds = array<i64: 2, 32, 96>}, {pipeline_mode = #tpu.pipeline_mode<synchronous>, transform_indices = @transform_3, window_bounds = array<i64: 2, 96>}, {pipeline_mode = #tpu.pipeline_mode<synchronous>, transform_indices = @transform_4, window_bounds = array<i64: 2, 4, 8, 32>}, {pipeline_mode = #tpu.pipeline_mode<synchronous>, transform_indices = @transform_5, window_bounds = array<i64: 2, 32>}, {pipeline_mode = #tpu.pipeline_mode<synchronous>, transform_indices = @transform_6, window_bounds = array<i64: 2, 32>}, {pipeline_mode = #tpu.pipeline_mode<synchronous>, transform_indices = @transform_7, window_bounds = array<i64: 2, 32>}, {pipeline_mode = #tpu.pipeline_mode<synchronous>, transform_indices = @transform_8, window_bounds = array<i64: 2, 32>}, {pipeline_mode = #tpu.pipeline_mode<synchronous>, transform_indices = @transform_9, window_bounds = array<i64: 2, 32>}, {pipeline_mode = #tpu.pipeline_mode<synchronous>, transform_indices = @transform_10, window_bounds = array<i64: 2, 32, 32>}, {pipeline_mode = #tpu.pipeline_mode<synchronous>, transform_indices = @transform_11, window_bounds = array<i64: 2, 32>}, {pipeline_mode = #tpu.pipeline_mode<synchronous>, transform_indices = @transform_12, window_bounds = array<i64: 2, 32, 32>}, {pipeline_mode = #tpu.pipeline_mode<synchronous>, transform_indices = @transform_13, window_bounds = array<i64: 2, 32>}, {pipeline_mode = #tpu.pipeline_mode<synchronous>, transform_indices = @transform_14, window_bounds = array<i64: 32, 128>}, {pipeline_mode = #tpu.pipeline_mode<synchronous>, transform_indices = @transform_15, window_bounds = array<i64: 1, 128>}, {transform_indices = @transform_16, window_bounds = array<i64: 4, 128>}]} {
    %c0 = arith.constant 0 : index
    %c0_0 = arith.constant 0 : index
    %c0_1 = arith.constant 0 : index
    %0 = vector.load %arg1[%c0, %c0_0, %c0_1] : memref<4x8x32xf32, #tpu.memory_space<vmem>>, vector<4x8x32xf32>
    %c0_2 = arith.constant 0 : index
    %c0_3 = arith.constant 0 : index
    %1 = vector.load %arg2[%c0_2, %c0_3] : memref<4x8xf32, #tpu.memory_space<vmem>>, vector<4x8xf32>
    %cst = arith.constant 0.000000e+00 : f32
    %2 = vector.broadcast %cst : f32 to vector<4x8xf32>
    %3 = arith.cmpf oeq, %1, %2 : vector<4x8xf32>
    %cst_4 = arith.constant -1.000000e+30 : f32
    %cst_5 = arith.constant 0.000000e+00 : f32
    %4 = vector.broadcast %cst_4 : f32 to vector<4x8xf32>
    %5 = vector.broadcast %cst_5 : f32 to vector<4x8xf32>
    %6 = arith.select %3, %4, %5 : vector<4x8xi1>, vector<4x8xf32>
    %7 = vector.shape_cast %6 : vector<4x8xf32> to vector<4x1x8xf32>
    %8 = vector.shape_cast %0 : vector<4x8x32xf32> to vector<32x32xf32>
    %9 = arith.truncf %8 : vector<32x32xf32> to vector<32x32xbf16>
    %c0_6 = arith.constant 0 : index
    %c0_7 = arith.constant 0 : index
    %c0_8 = arith.constant 0 : index
    %10 = vector.load %arg3[%c0_6, %c0_7, %c0_8] : memref<2x32x96xbf16, #tpu.memory_space<vmem>>, vector<1x32x96xbf16>
    %11 = vector.shape_cast %10 : vector<1x32x96xbf16> to vector<32x96xbf16>
    %cst_9 = arith.constant dense<0.000000e+00> : vector<32x96xf32>
    %12 = tpu.matmul %9, %11, %cst_9 {dimension_numbers = #tpu.dot_dimension_numbers<[1], [0], [0], [1], [0, 0, 1, 1], [], []>} : vector<32x32xbf16>, vector<32x96xbf16>, vector<32x96xf32> -> vector<32x96xf32>
    %c0_10 = arith.constant 0 : index
    %c0_11 = arith.constant 0 : index
    %13 = vector.load %arg4[%c0_10, %c0_11] : memref<2x96xf32, #tpu.memory_space<vmem>>, vector<1x96xf32>
    %14 = vector.shape_cast %13 : vector<1x96xf32> to vector<96xf32>
    %15 = vector.shape_cast %14 : vector<96xf32> to vector<1x96xf32>
    %16 = vector.broadcast %15 : vector<1x96xf32> to vector<32x96xf32>
    %17 = arith.addf %12, %16 : vector<32x96xf32>
    %18 = vector.shape_cast %17 : vector<32x96xf32> to vector<4x8x96xf32>
    %19 = vector.extract_strided_slice %18 {offsets = [0, 0, 0], sizes = [4, 8, 8], strides = [1, 1, 1]} : vector<4x8x96xf32> to vector<4x8x8xf32>
    %20 = arith.truncf %19 : vector<4x8x8xf32> to vector<4x8x8xbf16>
    %21 = vector.extract_strided_slice %18 {offsets = [0, 0, 32], sizes = [4, 8, 8], strides = [1, 1, 1]} : vector<4x8x96xf32> to vector<4x8x8xf32>
    %22 = arith.truncf %21 : vector<4x8x8xf32> to vector<4x8x8xbf16>
    %23 = vector.extract_strided_slice %18 {offsets = [0, 0, 64], sizes = [4, 8, 8], strides = [1, 1, 1]} : vector<4x8x96xf32> to vector<4x8x8xf32>
    %24 = arith.truncf %23 : vector<4x8x8xf32> to vector<4x8x8xbf16>
    "tpu.trace_start"() <{level = 10 : i32, message = "bqd,bkd->bqk"}> : () -> ()
    %cst_12 = arith.constant dense<0.000000e+00> : vector<4x8x8xf32>
    %25 = tpu.matmul %20, %22, %cst_12 {dimension_numbers = #tpu.dot_dimension_numbers<[2], [2], [1], [1], [0, 0, 0, 1, 1, 1], [0], [0]>} : vector<4x8x8xbf16>, vector<4x8x8xbf16>, vector<4x8x8xf32> -> vector<4x8x8xf32>
    "tpu.trace_stop"() : () -> ()
    %26 = vector.broadcast %7 : vector<4x1x8xf32> to vector<4x8x8xf32>
    %27 = arith.addf %25, %26 : vector<4x8x8xf32>
    %cst_13 = arith.constant dense<0xFF800000> : vector<4x8xf32>
    %28 = vector.multi_reduction <maximumf>, %27, %cst_13 [2] : vector<4x8x8xf32> to vector<4x8xf32>
    %29 = vector.shape_cast %28 : vector<4x8xf32> to vector<4x8x1xf32>
    %30 = vector.broadcast %29 : vector<4x8x1xf32> to vector<4x8x8xf32>
    %31 = arith.subf %27, %30 : vector<4x8x8xf32>
    %32 = math.exp %31 : vector<4x8x8xf32>
    %cst_14 = arith.constant dense<0.000000e+00> : vector<4x8xf32>
    %33 = vector.multi_reduction <add>, %32, %cst_14 [2] : vector<4x8x8xf32> to vector<4x8xf32>
    %34 = vector.shape_cast %33 : vector<4x8xf32> to vector<4x8x1xf32>
    %35 = arith.truncf %32 : vector<4x8x8xf32> to vector<4x8x8xbf16>
    "tpu.trace_start"() <{level = 10 : i32, message = "bqk,bkd->bqd"}> : () -> ()
    %cst_15 = arith.constant dense<0.000000e+00> : vector<4x8x8xf32>
    %36 = tpu.matmul %35, %24, %cst_15 {dimension_numbers = #tpu.dot_dimension_numbers<[2], [1], [1], [2], [0, 0, 0, 1, 1, 2], [0], [0]>} : vector<4x8x8xbf16>, vector<4x8x8xbf16>, vector<4x8x8xf32> -> vector<4x8x8xf32>
    "tpu.trace_stop"() : () -> ()
    %37 = vector.broadcast %34 : vector<4x8x1xf32> to vector<4x8x8xf32>
    %38 = arith.divf %36, %37 : vector<4x8x8xf32>
    %39 = vector.shape_cast %38 : vector<4x8x8xf32> to vector<32x8xf32>
    %40 = arith.truncf %39 : vector<32x8xf32> to vector<32x8xbf16>
    %c0_16 = arith.constant 0 : index
    %c0_17 = arith.constant 0 : index
    %c0_18 = arith.constant 0 : index
    %c0_19 = arith.constant 0 : index
    %41 = vector.load %arg5[%c0_16, %c0_17, %c0_18, %c0_19] : memref<2x4x8x32xbf16, #tpu.memory_space<vmem>>, vector<1x1x8x32xbf16>
    %42 = vector.shape_cast %41 : vector<1x1x8x32xbf16> to vector<8x32xbf16>
    %cst_20 = arith.constant dense<0.000000e+00> : vector<32x32xf32>
    %43 = tpu.matmul %40, %42, %cst_20 {dimension_numbers = #tpu.dot_dimension_numbers<[1], [0], [0], [1], [0, 0, 1, 1], [], []>} : vector<32x8xbf16>, vector<8x32xbf16>, vector<32x32xf32> -> vector<32x32xf32>
    %44 = vector.extract_strided_slice %18 {offsets = [0, 0, 8], sizes = [4, 8, 8], strides = [1, 1, 1]} : vector<4x8x96xf32> to vector<4x8x8xf32>
    %45 = arith.truncf %44 : vector<4x8x8xf32> to vector<4x8x8xbf16>
    %46 = vector.extract_strided_slice %18 {offsets = [0, 0, 40], sizes = [4, 8, 8], strides = [1, 1, 1]} : vector<4x8x96xf32> to vector<4x8x8xf32>
    %47 = arith.truncf %46 : vector<4x8x8xf32> to vector<4x8x8xbf16>
    %48 = vector.extract_strided_slice %18 {offsets = [0, 0, 72], sizes = [4, 8, 8], strides = [1, 1, 1]} : vector<4x8x96xf32> to vector<4x8x8xf32>
    %49 = arith.truncf %48 : vector<4x8x8xf32> to vector<4x8x8xbf16>
    "tpu.trace_start"() <{level = 10 : i32, message = "bqd,bkd->bqk"}> : () -> ()
    %cst_21 = arith.constant dense<0.000000e+00> : vector<4x8x8xf32>
    %50 = tpu.matmul %45, %47, %cst_21 {dimension_numbers = #tpu.dot_dimension_numbers<[2], [2], [1], [1], [0, 0, 0, 1, 1, 1], [0], [0]>} : vector<4x8x8xbf16>, vector<4x8x8xbf16>, vector<4x8x8xf32> -> vector<4x8x8xf32>
    "tpu.trace_stop"() : () -> ()
    %51 = vector.broadcast %7 : vector<4x1x8xf32> to vector<4x8x8xf32>
    %52 = arith.addf %50, %51 : vector<4x8x8xf32>
    %cst_22 = arith.constant dense<0xFF800000> : vector<4x8xf32>
    %53 = vector.multi_reduction <maximumf>, %52, %cst_22 [2] : vector<4x8x8xf32> to vector<4x8xf32>
    %54 = vector.shape_cast %53 : vector<4x8xf32> to vector<4x8x1xf32>
    %55 = vector.broadcast %54 : vector<4x8x1xf32> to vector<4x8x8xf32>
    %56 = arith.subf %52, %55 : vector<4x8x8xf32>
    %57 = math.exp %56 : vector<4x8x8xf32>
    %cst_23 = arith.constant dense<0.000000e+00> : vector<4x8xf32>
    %58 = vector.multi_reduction <add>, %57, %cst_23 [2] : vector<4x8x8xf32> to vector<4x8xf32>
    %59 = vector.shape_cast %58 : vector<4x8xf32> to vector<4x8x1xf32>
    %60 = arith.truncf %57 : vector<4x8x8xf32> to vector<4x8x8xbf16>
    "tpu.trace_start"() <{level = 10 : i32, message = "bqk,bkd->bqd"}> : () -> ()
    %cst_24 = arith.constant dense<0.000000e+00> : vector<4x8x8xf32>
    %61 = tpu.matmul %60, %49, %cst_24 {dimension_numbers = #tpu.dot_dimension_numbers<[2], [1], [1], [2], [0, 0, 0, 1, 1, 2], [0], [0]>} : vector<4x8x8xbf16>, vector<4x8x8xbf16>, vector<4x8x8xf32> -> vector<4x8x8xf32>
    "tpu.trace_stop"() : () -> ()
    %62 = vector.broadcast %59 : vector<4x8x1xf32> to vector<4x8x8xf32>
    %63 = arith.divf %61, %62 : vector<4x8x8xf32>
    %64 = vector.shape_cast %63 : vector<4x8x8xf32> to vector<32x8xf32>
    %65 = arith.truncf %64 : vector<32x8xf32> to vector<32x8xbf16>
    %c0_25 = arith.constant 0 : index
    %c1 = arith.constant 1 : index
    %c0_26 = arith.constant 0 : index
    %c0_27 = arith.constant 0 : index
    %66 = vector.load %arg5[%c0_25, %c1, %c0_26, %c0_27] : memref<2x4x8x32xbf16, #tpu.memory_space<vmem>>, vector<1x1x8x32xbf16>
    %67 = vector.shape_cast %66 : vector<1x1x8x32xbf16> to vector<8x32xbf16>
    %cst_28 = arith.constant dense<0.000000e+00> : vector<32x32xf32>
    %68 = tpu.matmul %65, %67, %cst_28 {dimension_numbers = #tpu.dot_dimension_numbers<[1], [0], [0], [1], [0, 0, 1, 1], [], []>} : vector<32x8xbf16>, vector<8x32xbf16>, vector<32x32xf32> -> vector<32x32xf32>
    %69 = arith.addf %43, %68 : vector<32x32xf32>
    %70 = vector.extract_strided_slice %18 {offsets = [0, 0, 16], sizes = [4, 8, 8], strides = [1, 1, 1]} : vector<4x8x96xf32> to vector<4x8x8xf32>
    %71 = arith.truncf %70 : vector<4x8x8xf32> to vector<4x8x8xbf16>
    %72 = vector.extract_strided_slice %18 {offsets = [0, 0, 48], sizes = [4, 8, 8], strides = [1, 1, 1]} : vector<4x8x96xf32> to vector<4x8x8xf32>
    %73 = arith.truncf %72 : vector<4x8x8xf32> to vector<4x8x8xbf16>
    %74 = vector.extract_strided_slice %18 {offsets = [0, 0, 80], sizes = [4, 8, 8], strides = [1, 1, 1]} : vector<4x8x96xf32> to vector<4x8x8xf32>
    %75 = arith.truncf %74 : vector<4x8x8xf32> to vector<4x8x8xbf16>
    "tpu.trace_start"() <{level = 10 : i32, message = "bqd,bkd->bqk"}> : () -> ()
    %cst_29 = arith.constant dense<0.000000e+00> : vector<4x8x8xf32>
    %76 = tpu.matmul %71, %73, %cst_29 {dimension_numbers = #tpu.dot_dimension_numbers<[2], [2], [1], [1], [0, 0, 0, 1, 1, 1], [0], [0]>} : vector<4x8x8xbf16>, vector<4x8x8xbf16>, vector<4x8x8xf32> -> vector<4x8x8xf32>
    "tpu.trace_stop"() : () -> ()
    %77 = vector.broadcast %7 : vector<4x1x8xf32> to vector<4x8x8xf32>
    %78 = arith.addf %76, %77 : vector<4x8x8xf32>
    %cst_30 = arith.constant dense<0xFF800000> : vector<4x8xf32>
    %79 = vector.multi_reduction <maximumf>, %78, %cst_30 [2] : vector<4x8x8xf32> to vector<4x8xf32>
    %80 = vector.shape_cast %79 : vector<4x8xf32> to vector<4x8x1xf32>
    %81 = vector.broadcast %80 : vector<4x8x1xf32> to vector<4x8x8xf32>
    %82 = arith.subf %78, %81 : vector<4x8x8xf32>
    %83 = math.exp %82 : vector<4x8x8xf32>
    %cst_31 = arith.constant dense<0.000000e+00> : vector<4x8xf32>
    %84 = vector.multi_reduction <add>, %83, %cst_31 [2] : vector<4x8x8xf32> to vector<4x8xf32>
    %85 = vector.shape_cast %84 : vector<4x8xf32> to vector<4x8x1xf32>
    %86 = arith.truncf %83 : vector<4x8x8xf32> to vector<4x8x8xbf16>
    "tpu.trace_start"() <{level = 10 : i32, message = "bqk,bkd->bqd"}> : () -> ()
    %cst_32 = arith.constant dense<0.000000e+00> : vector<4x8x8xf32>
    %87 = tpu.matmul %86, %75, %cst_32 {dimension_numbers = #tpu.dot_dimension_numbers<[2], [1], [1], [2], [0, 0, 0, 1, 1, 2], [0], [0]>} : vector<4x8x8xbf16>, vector<4x8x8xbf16>, vector<4x8x8xf32> -> vector<4x8x8xf32>
    "tpu.trace_stop"() : () -> ()
    %88 = vector.broadcast %85 : vector<4x8x1xf32> to vector<4x8x8xf32>
    %89 = arith.divf %87, %88 : vector<4x8x8xf32>
    %90 = vector.shape_cast %89 : vector<4x8x8xf32> to vector<32x8xf32>
    %91 = arith.truncf %90 : vector<32x8xf32> to vector<32x8xbf16>
    %c0_33 = arith.constant 0 : index
    %c2 = arith.constant 2 : index
    %c0_34 = arith.constant 0 : index
    %c0_35 = arith.constant 0 : index
    %92 = vector.load %arg5[%c0_33, %c2, %c0_34, %c0_35] : memref<2x4x8x32xbf16, #tpu.memory_space<vmem>>, vector<1x1x8x32xbf16>
    %93 = vector.shape_cast %92 : vector<1x1x8x32xbf16> to vector<8x32xbf16>
    %cst_36 = arith.constant dense<0.000000e+00> : vector<32x32xf32>
    %94 = tpu.matmul %91, %93, %cst_36 {dimension_numbers = #tpu.dot_dimension_numbers<[1], [0], [0], [1], [0, 0, 1, 1], [], []>} : vector<32x8xbf16>, vector<8x32xbf16>, vector<32x32xf32> -> vector<32x32xf32>
    %95 = arith.addf %69, %94 : vector<32x32xf32>
    %96 = vector.extract_strided_slice %18 {offsets = [0, 0, 24], sizes = [4, 8, 8], strides = [1, 1, 1]} : vector<4x8x96xf32> to vector<4x8x8xf32>
    %97 = arith.truncf %96 : vector<4x8x8xf32> to vector<4x8x8xbf16>
    %98 = vector.extract_strided_slice %18 {offsets = [0, 0, 56], sizes = [4, 8, 8], strides = [1, 1, 1]} : vector<4x8x96xf32> to vector<4x8x8xf32>
    %99 = arith.truncf %98 : vector<4x8x8xf32> to vector<4x8x8xbf16>
    %100 = vector.extract_strided_slice %18 {offsets = [0, 0, 88], sizes = [4, 8, 8], strides = [1, 1, 1]} : vector<4x8x96xf32> to vector<4x8x8xf32>
    %101 = arith.truncf %100 : vector<4x8x8xf32> to vector<4x8x8xbf16>
    "tpu.trace_start"() <{level = 10 : i32, message = "bqd,bkd->bqk"}> : () -> ()
    %cst_37 = arith.constant dense<0.000000e+00> : vector<4x8x8xf32>
    %102 = tpu.matmul %97, %99, %cst_37 {dimension_numbers = #tpu.dot_dimension_numbers<[2], [2], [1], [1], [0, 0, 0, 1, 1, 1], [0], [0]>} : vector<4x8x8xbf16>, vector<4x8x8xbf16>, vector<4x8x8xf32> -> vector<4x8x8xf32>
    "tpu.trace_stop"() : () -> ()
    %103 = vector.broadcast %7 : vector<4x1x8xf32> to vector<4x8x8xf32>
    %104 = arith.addf %102, %103 : vector<4x8x8xf32>
    %cst_38 = arith.constant dense<0xFF800000> : vector<4x8xf32>
    %105 = vector.multi_reduction <maximumf>, %104, %cst_38 [2] : vector<4x8x8xf32> to vector<4x8xf32>
    %106 = vector.shape_cast %105 : vector<4x8xf32> to vector<4x8x1xf32>
    %107 = vector.broadcast %106 : vector<4x8x1xf32> to vector<4x8x8xf32>
    %108 = arith.subf %104, %107 : vector<4x8x8xf32>
    %109 = math.exp %108 : vector<4x8x8xf32>
    %cst_39 = arith.constant dense<0.000000e+00> : vector<4x8xf32>
    %110 = vector.multi_reduction <add>, %109, %cst_39 [2] : vector<4x8x8xf32> to vector<4x8xf32>
    %111 = vector.shape_cast %110 : vector<4x8xf32> to vector<4x8x1xf32>
    %112 = arith.truncf %109 : vector<4x8x8xf32> to vector<4x8x8xbf16>
    "tpu.trace_start"() <{level = 10 : i32, message = "bqk,bkd->bqd"}> : () -> ()
    %cst_40 = arith.constant dense<0.000000e+00> : vector<4x8x8xf32>
    %113 = tpu.matmul %112, %101, %cst_40 {dimension_numbers = #tpu.dot_dimension_numbers<[2], [1], [1], [2], [0, 0, 0, 1, 1, 2], [0], [0]>} : vector<4x8x8xbf16>, vector<4x8x8xbf16>, vector<4x8x8xf32> -> vector<4x8x8xf32>
    "tpu.trace_stop"() : () -> ()
    %114 = vector.broadcast %111 : vector<4x8x1xf32> to vector<4x8x8xf32>
    %115 = arith.divf %113, %114 : vector<4x8x8xf32>
    %116 = vector.shape_cast %115 : vector<4x8x8xf32> to vector<32x8xf32>
    %117 = arith.truncf %116 : vector<32x8xf32> to vector<32x8xbf16>
    %c0_41 = arith.constant 0 : index
    %c3 = arith.constant 3 : index
    %c0_42 = arith.constant 0 : index
    %c0_43 = arith.constant 0 : index
    %118 = vector.load %arg5[%c0_41, %c3, %c0_42, %c0_43] : memref<2x4x8x32xbf16, #tpu.memory_space<vmem>>, vector<1x1x8x32xbf16>
    %119 = vector.shape_cast %118 : vector<1x1x8x32xbf16> to vector<8x32xbf16>
    %cst_44 = arith.constant dense<0.000000e+00> : vector<32x32xf32>
    %120 = tpu.matmul %117, %119, %cst_44 {dimension_numbers = #tpu.dot_dimension_numbers<[1], [0], [0], [1], [0, 0, 1, 1], [], []>} : vector<32x8xbf16>, vector<8x32xbf16>, vector<32x32xf32> -> vector<32x32xf32>
    %121 = arith.addf %95, %120 : vector<32x32xf32>
    %122 = vector.shape_cast %121 : vector<32x32xf32> to vector<4x8x32xf32>
    %c0_45 = arith.constant 0 : index
    %c0_46 = arith.constant 0 : index
    %123 = vector.load %arg6[%c0_45, %c0_46] : memref<2x32xf32, #tpu.memory_space<vmem>>, vector<1x32xf32>
    %124 = vector.shape_cast %123 : vector<1x32xf32> to vector<32xf32>
    %125 = vector.shape_cast %124 : vector<32xf32> to vector<1x1x32xf32>
    %126 = vector.broadcast %125 : vector<1x1x32xf32> to vector<4x8x32xf32>
    %127 = arith.addf %122, %126 : vector<4x8x32xf32>
    %128 = arith.addf %0, %127 : vector<4x8x32xf32>
    %c0_47 = arith.constant 0 : index
    %c0_48 = arith.constant 0 : index
    %129 = vector.load %arg7[%c0_47, %c0_48] : memref<2x32xf32, #tpu.memory_space<vmem>>, vector<1x32xf32>
    %130 = vector.shape_cast %129 : vector<1x32xf32> to vector<32xf32>
    %c0_49 = arith.constant 0 : index
    %c0_50 = arith.constant 0 : index
    %131 = vector.load %arg8[%c0_49, %c0_50] : memref<2x32xf32, #tpu.memory_space<vmem>>, vector<1x32xf32>
    %132 = vector.shape_cast %131 : vector<1x32xf32> to vector<32xf32>
    %cst_51 = arith.constant dense<0.000000e+00> : vector<4x8xf32>
    %133 = vector.multi_reduction <add>, %128, %cst_51 [2] : vector<4x8x32xf32> to vector<4x8xf32>
    %134 = vector.shape_cast %133 : vector<4x8xf32> to vector<4x8x1xf32>
    %cst_52 = arith.constant 3.200000e+01 : f32
    %135 = vector.broadcast %cst_52 : f32 to vector<4x8x1xf32>
    %136 = arith.divf %134, %135 : vector<4x8x1xf32>
    %137 = vector.broadcast %136 : vector<4x8x1xf32> to vector<4x8x32xf32>
    %138 = arith.subf %128, %137 : vector<4x8x32xf32>
    %139 = arith.mulf %138, %138 : vector<4x8x32xf32>
    %cst_53 = arith.constant dense<0.000000e+00> : vector<4x8xf32>
    %140 = vector.multi_reduction <add>, %139, %cst_53 [2] : vector<4x8x32xf32> to vector<4x8xf32>
    %141 = vector.shape_cast %140 : vector<4x8xf32> to vector<4x8x1xf32>
    %cst_54 = arith.constant 3.200000e+01 : f32
    %142 = vector.broadcast %cst_54 : f32 to vector<4x8x1xf32>
    %143 = arith.divf %141, %142 : vector<4x8x1xf32>
    %144 = vector.broadcast %136 : vector<4x8x1xf32> to vector<4x8x32xf32>
    %145 = arith.subf %128, %144 : vector<4x8x32xf32>
    %cst_55 = arith.constant 9.99999974E-6 : f32
    %146 = vector.broadcast %cst_55 : f32 to vector<4x8x1xf32>
    %147 = arith.addf %143, %146 : vector<4x8x1xf32>
    %148 = math.rsqrt %147 : vector<4x8x1xf32>
    %149 = vector.broadcast %148 : vector<4x8x1xf32> to vector<4x8x32xf32>
    %150 = arith.mulf %145, %149 : vector<4x8x32xf32>
    %151 = vector.shape_cast %130 : vector<32xf32> to vector<1x1x32xf32>
    %152 = vector.broadcast %151 : vector<1x1x32xf32> to vector<4x8x32xf32>
    %153 = arith.mulf %150, %152 : vector<4x8x32xf32>
    %154 = vector.shape_cast %132 : vector<32xf32> to vector<1x1x32xf32>
    %155 = vector.broadcast %154 : vector<1x1x32xf32> to vector<4x8x32xf32>
    %156 = arith.addf %153, %155 : vector<4x8x32xf32>
    %157 = vector.shape_cast %156 : vector<4x8x32xf32> to vector<32x32xf32>
    %158 = arith.truncf %157 : vector<32x32xf32> to vector<32x32xbf16>
    %c0_56 = arith.constant 0 : index
    %c0_57 = arith.constant 0 : index
    %c0_58 = arith.constant 0 : index
    %159 = vector.load %arg11[%c0_56, %c0_57, %c0_58] : memref<2x32x32xbf16, #tpu.memory_space<vmem>>, vector<1x32x32xbf16>
    %160 = vector.shape_cast %159 : vector<1x32x32xbf16> to vector<32x32xbf16>
    %cst_59 = arith.constant dense<0.000000e+00> : vector<32x32xf32>
    %161 = tpu.matmul %158, %160, %cst_59 {dimension_numbers = #tpu.dot_dimension_numbers<[1], [0], [0], [1], [0, 0, 1, 1], [], []>} : vector<32x32xbf16>, vector<32x32xbf16>, vector<32x32xf32> -> vector<32x32xf32>
    %c0_60 = arith.constant 0 : index
    %c0_61 = arith.constant 0 : index
    %162 = vector.load %arg12[%c0_60, %c0_61] : memref<2x32xf32, #tpu.memory_space<vmem>>, vector<1x32xf32>
    %163 = vector.shape_cast %162 : vector<1x32xf32> to vector<32xf32>
    %164 = vector.shape_cast %163 : vector<32xf32> to vector<1x32xf32>
    %165 = vector.broadcast %164 : vector<1x32xf32> to vector<32x32xf32>
    %166 = arith.addf %161, %165 : vector<32x32xf32>
    %cst_62 = arith.constant 0.000000e+00 : f32
    %167 = vector.broadcast %cst_62 : f32 to vector<32x32xf32>
    %168 = arith.maximumf %166, %167 : vector<32x32xf32>
    %169 = arith.truncf %168 : vector<32x32xf32> to vector<32x32xbf16>
    %c0_63 = arith.constant 0 : index
    %c0_64 = arith.constant 0 : index
    %c0_65 = arith.constant 0 : index
    %170 = vector.load %arg13[%c0_63, %c0_64, %c0_65] : memref<2x32x32xbf16, #tpu.memory_space<vmem>>, vector<1x32x32xbf16>
    %171 = vector.shape_cast %170 : vector<1x32x32xbf16> to vector<32x32xbf16>
    %cst_66 = arith.constant dense<0.000000e+00> : vector<32x32xf32>
    %172 = tpu.matmul %169, %171, %cst_66 {dimension_numbers = #tpu.dot_dimension_numbers<[1], [0], [0], [1], [0, 0, 1, 1], [], []>} : vector<32x32xbf16>, vector<32x32xbf16>, vector<32x32xf32> -> vector<32x32xf32>
    %c0_67 = arith.constant 0 : index
    %c0_68 = arith.constant 0 : index
    %173 = vector.load %arg14[%c0_67, %c0_68] : memref<2x32xf32, #tpu.memory_space<vmem>>, vector<1x32xf32>
    %174 = vector.shape_cast %173 : vector<1x32xf32> to vector<32xf32>
    %175 = vector.shape_cast %174 : vector<32xf32> to vector<1x32xf32>
    %176 = vector.broadcast %175 : vector<1x32xf32> to vector<32x32xf32>
    %177 = arith.addf %172, %176 : vector<32x32xf32>
    %178 = vector.shape_cast %177 : vector<32x32xf32> to vector<4x8x32xf32>
    %179 = arith.addf %156, %178 : vector<4x8x32xf32>
    %c0_69 = arith.constant 0 : index
    %c0_70 = arith.constant 0 : index
    %180 = vector.load %arg9[%c0_69, %c0_70] : memref<2x32xf32, #tpu.memory_space<vmem>>, vector<1x32xf32>
    %181 = vector.shape_cast %180 : vector<1x32xf32> to vector<32xf32>
    %c0_71 = arith.constant 0 : index
    %c0_72 = arith.constant 0 : index
    %182 = vector.load %arg10[%c0_71, %c0_72] : memref<2x32xf32, #tpu.memory_space<vmem>>, vector<1x32xf32>
    %183 = vector.shape_cast %182 : vector<1x32xf32> to vector<32xf32>
    %cst_73 = arith.constant dense<0.000000e+00> : vector<4x8xf32>
    %184 = vector.multi_reduction <add>, %179, %cst_73 [2] : vector<4x8x32xf32> to vector<4x8xf32>
    %185 = vector.shape_cast %184 : vector<4x8xf32> to vector<4x8x1xf32>
    %cst_74 = arith.constant 3.200000e+01 : f32
    %186 = vector.broadcast %cst_74 : f32 to vector<4x8x1xf32>
    %187 = arith.divf %185, %186 : vector<4x8x1xf32>
    %188 = vector.broadcast %187 : vector<4x8x1xf32> to vector<4x8x32xf32>
    %189 = arith.subf %179, %188 : vector<4x8x32xf32>
    %190 = arith.mulf %189, %189 : vector<4x8x32xf32>
    %cst_75 = arith.constant dense<0.000000e+00> : vector<4x8xf32>
    %191 = vector.multi_reduction <add>, %190, %cst_75 [2] : vector<4x8x32xf32> to vector<4x8xf32>
    %192 = vector.shape_cast %191 : vector<4x8xf32> to vector<4x8x1xf32>
    %cst_76 = arith.constant 3.200000e+01 : f32
    %193 = vector.broadcast %cst_76 : f32 to vector<4x8x1xf32>
    %194 = arith.divf %192, %193 : vector<4x8x1xf32>
    %195 = vector.broadcast %187 : vector<4x8x1xf32> to vector<4x8x32xf32>
    %196 = arith.subf %179, %195 : vector<4x8x32xf32>
    %cst_77 = arith.constant 9.99999974E-6 : f32
    %197 = vector.broadcast %cst_77 : f32 to vector<4x8x1xf32>
    %198 = arith.addf %194, %197 : vector<4x8x1xf32>
    %199 = math.rsqrt %198 : vector<4x8x1xf32>
    %200 = vector.broadcast %199 : vector<4x8x1xf32> to vector<4x8x32xf32>
    %201 = arith.mulf %196, %200 : vector<4x8x32xf32>
    %202 = vector.shape_cast %181 : vector<32xf32> to vector<1x1x32xf32>
    %203 = vector.broadcast %202 : vector<1x1x32xf32> to vector<4x8x32xf32>
    %204 = arith.mulf %201, %203 : vector<4x8x32xf32>
    %205 = vector.shape_cast %183 : vector<32xf32> to vector<1x1x32xf32>
    %206 = vector.broadcast %205 : vector<1x1x32xf32> to vector<4x8x32xf32>
    %207 = arith.addf %204, %206 : vector<4x8x32xf32>
    %208 = vector.shape_cast %207 : vector<4x8x32xf32> to vector<32x32xf32>
    %209 = arith.truncf %208 : vector<32x32xf32> to vector<32x32xbf16>
    %c1_78 = arith.constant 1 : index
    %c0_79 = arith.constant 0 : index
    %c0_80 = arith.constant 0 : index
    %210 = vector.load %arg3[%c1_78, %c0_79, %c0_80] : memref<2x32x96xbf16, #tpu.memory_space<vmem>>, vector<1x32x96xbf16>
    %211 = vector.shape_cast %210 : vector<1x32x96xbf16> to vector<32x96xbf16>
    %cst_81 = arith.constant dense<0.000000e+00> : vector<32x96xf32>
    %212 = tpu.matmul %209, %211, %cst_81 {dimension_numbers = #tpu.dot_dimension_numbers<[1], [0], [0], [1], [0, 0, 1, 1], [], []>} : vector<32x32xbf16>, vector<32x96xbf16>, vector<32x96xf32> -> vector<32x96xf32>
    %c1_82 = arith.constant 1 : index
    %c0_83 = arith.constant 0 : index
    %213 = vector.load %arg4[%c1_82, %c0_83] : memref<2x96xf32, #tpu.memory_space<vmem>>, vector<1x96xf32>
    %214 = vector.shape_cast %213 : vector<1x96xf32> to vector<96xf32>
    %215 = vector.shape_cast %214 : vector<96xf32> to vector<1x96xf32>
    %216 = vector.broadcast %215 : vector<1x96xf32> to vector<32x96xf32>
    %217 = arith.addf %212, %216 : vector<32x96xf32>
    %218 = vector.shape_cast %217 : vector<32x96xf32> to vector<4x8x96xf32>
    %219 = vector.extract_strided_slice %218 {offsets = [0, 0, 0], sizes = [4, 8, 8], strides = [1, 1, 1]} : vector<4x8x96xf32> to vector<4x8x8xf32>
    %220 = arith.truncf %219 : vector<4x8x8xf32> to vector<4x8x8xbf16>
    %221 = vector.extract_strided_slice %218 {offsets = [0, 0, 32], sizes = [4, 8, 8], strides = [1, 1, 1]} : vector<4x8x96xf32> to vector<4x8x8xf32>
    %222 = arith.truncf %221 : vector<4x8x8xf32> to vector<4x8x8xbf16>
    %223 = vector.extract_strided_slice %218 {offsets = [0, 0, 64], sizes = [4, 8, 8], strides = [1, 1, 1]} : vector<4x8x96xf32> to vector<4x8x8xf32>
    %224 = arith.truncf %223 : vector<4x8x8xf32> to vector<4x8x8xbf16>
    "tpu.trace_start"() <{level = 10 : i32, message = "bqd,bkd->bqk"}> : () -> ()
    %cst_84 = arith.constant dense<0.000000e+00> : vector<4x8x8xf32>
    %225 = tpu.matmul %220, %222, %cst_84 {dimension_numbers = #tpu.dot_dimension_numbers<[2], [2], [1], [1], [0, 0, 0, 1, 1, 1], [0], [0]>} : vector<4x8x8xbf16>, vector<4x8x8xbf16>, vector<4x8x8xf32> -> vector<4x8x8xf32>
    "tpu.trace_stop"() : () -> ()
    %226 = vector.broadcast %7 : vector<4x1x8xf32> to vector<4x8x8xf32>
    %227 = arith.addf %225, %226 : vector<4x8x8xf32>
    %cst_85 = arith.constant dense<0xFF800000> : vector<4x8xf32>
    %228 = vector.multi_reduction <maximumf>, %227, %cst_85 [2] : vector<4x8x8xf32> to vector<4x8xf32>
    %229 = vector.shape_cast %228 : vector<4x8xf32> to vector<4x8x1xf32>
    %230 = vector.broadcast %229 : vector<4x8x1xf32> to vector<4x8x8xf32>
    %231 = arith.subf %227, %230 : vector<4x8x8xf32>
    %232 = math.exp %231 : vector<4x8x8xf32>
    %cst_86 = arith.constant dense<0.000000e+00> : vector<4x8xf32>
    %233 = vector.multi_reduction <add>, %232, %cst_86 [2] : vector<4x8x8xf32> to vector<4x8xf32>
    %234 = vector.shape_cast %233 : vector<4x8xf32> to vector<4x8x1xf32>
    %235 = arith.truncf %232 : vector<4x8x8xf32> to vector<4x8x8xbf16>
    "tpu.trace_start"() <{level = 10 : i32, message = "bqk,bkd->bqd"}> : () -> ()
    %cst_87 = arith.constant dense<0.000000e+00> : vector<4x8x8xf32>
    %236 = tpu.matmul %235, %224, %cst_87 {dimension_numbers = #tpu.dot_dimension_numbers<[2], [1], [1], [2], [0, 0, 0, 1, 1, 2], [0], [0]>} : vector<4x8x8xbf16>, vector<4x8x8xbf16>, vector<4x8x8xf32> -> vector<4x8x8xf32>
    "tpu.trace_stop"() : () -> ()
    %237 = vector.broadcast %234 : vector<4x8x1xf32> to vector<4x8x8xf32>
    %238 = arith.divf %236, %237 : vector<4x8x8xf32>
    %239 = vector.shape_cast %238 : vector<4x8x8xf32> to vector<32x8xf32>
    %240 = arith.truncf %239 : vector<32x8xf32> to vector<32x8xbf16>
    %c1_88 = arith.constant 1 : index
    %c0_89 = arith.constant 0 : index
    %c0_90 = arith.constant 0 : index
    %c0_91 = arith.constant 0 : index
    %241 = vector.load %arg5[%c1_88, %c0_89, %c0_90, %c0_91] : memref<2x4x8x32xbf16, #tpu.memory_space<vmem>>, vector<1x1x8x32xbf16>
    %242 = vector.shape_cast %241 : vector<1x1x8x32xbf16> to vector<8x32xbf16>
    %cst_92 = arith.constant dense<0.000000e+00> : vector<32x32xf32>
    %243 = tpu.matmul %240, %242, %cst_92 {dimension_numbers = #tpu.dot_dimension_numbers<[1], [0], [0], [1], [0, 0, 1, 1], [], []>} : vector<32x8xbf16>, vector<8x32xbf16>, vector<32x32xf32> -> vector<32x32xf32>
    %244 = vector.extract_strided_slice %218 {offsets = [0, 0, 8], sizes = [4, 8, 8], strides = [1, 1, 1]} : vector<4x8x96xf32> to vector<4x8x8xf32>
    %245 = arith.truncf %244 : vector<4x8x8xf32> to vector<4x8x8xbf16>
    %246 = vector.extract_strided_slice %218 {offsets = [0, 0, 40], sizes = [4, 8, 8], strides = [1, 1, 1]} : vector<4x8x96xf32> to vector<4x8x8xf32>
    %247 = arith.truncf %246 : vector<4x8x8xf32> to vector<4x8x8xbf16>
    %248 = vector.extract_strided_slice %218 {offsets = [0, 0, 72], sizes = [4, 8, 8], strides = [1, 1, 1]} : vector<4x8x96xf32> to vector<4x8x8xf32>
    %249 = arith.truncf %248 : vector<4x8x8xf32> to vector<4x8x8xbf16>
    "tpu.trace_start"() <{level = 10 : i32, message = "bqd,bkd->bqk"}> : () -> ()
    %cst_93 = arith.constant dense<0.000000e+00> : vector<4x8x8xf32>
    %250 = tpu.matmul %245, %247, %cst_93 {dimension_numbers = #tpu.dot_dimension_numbers<[2], [2], [1], [1], [0, 0, 0, 1, 1, 1], [0], [0]>} : vector<4x8x8xbf16>, vector<4x8x8xbf16>, vector<4x8x8xf32> -> vector<4x8x8xf32>
    "tpu.trace_stop"() : () -> ()
    %251 = vector.broadcast %7 : vector<4x1x8xf32> to vector<4x8x8xf32>
    %252 = arith.addf %250, %251 : vector<4x8x8xf32>
    %cst_94 = arith.constant dense<0xFF800000> : vector<4x8xf32>
    %253 = vector.multi_reduction <maximumf>, %252, %cst_94 [2] : vector<4x8x8xf32> to vector<4x8xf32>
    %254 = vector.shape_cast %253 : vector<4x8xf32> to vector<4x8x1xf32>
    %255 = vector.broadcast %254 : vector<4x8x1xf32> to vector<4x8x8xf32>
    %256 = arith.subf %252, %255 : vector<4x8x8xf32>
    %257 = math.exp %256 : vector<4x8x8xf32>
    %cst_95 = arith.constant dense<0.000000e+00> : vector<4x8xf32>
    %258 = vector.multi_reduction <add>, %257, %cst_95 [2] : vector<4x8x8xf32> to vector<4x8xf32>
    %259 = vector.shape_cast %258 : vector<4x8xf32> to vector<4x8x1xf32>
    %260 = arith.truncf %257 : vector<4x8x8xf32> to vector<4x8x8xbf16>
    "tpu.trace_start"() <{level = 10 : i32, message = "bqk,bkd->bqd"}> : () -> ()
    %cst_96 = arith.constant dense<0.000000e+00> : vector<4x8x8xf32>
    %261 = tpu.matmul %260, %249, %cst_96 {dimension_numbers = #tpu.dot_dimension_numbers<[2], [1], [1], [2], [0, 0, 0, 1, 1, 2], [0], [0]>} : vector<4x8x8xbf16>, vector<4x8x8xbf16>, vector<4x8x8xf32> -> vector<4x8x8xf32>
    "tpu.trace_stop"() : () -> ()
    %262 = vector.broadcast %259 : vector<4x8x1xf32> to vector<4x8x8xf32>
    %263 = arith.divf %261, %262 : vector<4x8x8xf32>
    %264 = vector.shape_cast %263 : vector<4x8x8xf32> to vector<32x8xf32>
    %265 = arith.truncf %264 : vector<32x8xf32> to vector<32x8xbf16>
    %c1_97 = arith.constant 1 : index
    %c1_98 = arith.constant 1 : index
    %c0_99 = arith.constant 0 : index
    %c0_100 = arith.constant 0 : index
    %266 = vector.load %arg5[%c1_97, %c1_98, %c0_99, %c0_100] : memref<2x4x8x32xbf16, #tpu.memory_space<vmem>>, vector<1x1x8x32xbf16>
    %267 = vector.shape_cast %266 : vector<1x1x8x32xbf16> to vector<8x32xbf16>
    %cst_101 = arith.constant dense<0.000000e+00> : vector<32x32xf32>
    %268 = tpu.matmul %265, %267, %cst_101 {dimension_numbers = #tpu.dot_dimension_numbers<[1], [0], [0], [1], [0, 0, 1, 1], [], []>} : vector<32x8xbf16>, vector<8x32xbf16>, vector<32x32xf32> -> vector<32x32xf32>
    %269 = arith.addf %243, %268 : vector<32x32xf32>
    %270 = vector.extract_strided_slice %218 {offsets = [0, 0, 16], sizes = [4, 8, 8], strides = [1, 1, 1]} : vector<4x8x96xf32> to vector<4x8x8xf32>
    %271 = arith.truncf %270 : vector<4x8x8xf32> to vector<4x8x8xbf16>
    %272 = vector.extract_strided_slice %218 {offsets = [0, 0, 48], sizes = [4, 8, 8], strides = [1, 1, 1]} : vector<4x8x96xf32> to vector<4x8x8xf32>
    %273 = arith.truncf %272 : vector<4x8x8xf32> to vector<4x8x8xbf16>
    %274 = vector.extract_strided_slice %218 {offsets = [0, 0, 80], sizes = [4, 8, 8], strides = [1, 1, 1]} : vector<4x8x96xf32> to vector<4x8x8xf32>
    %275 = arith.truncf %274 : vector<4x8x8xf32> to vector<4x8x8xbf16>
    "tpu.trace_start"() <{level = 10 : i32, message = "bqd,bkd->bqk"}> : () -> ()
    %cst_102 = arith.constant dense<0.000000e+00> : vector<4x8x8xf32>
    %276 = tpu.matmul %271, %273, %cst_102 {dimension_numbers = #tpu.dot_dimension_numbers<[2], [2], [1], [1], [0, 0, 0, 1, 1, 1], [0], [0]>} : vector<4x8x8xbf16>, vector<4x8x8xbf16>, vector<4x8x8xf32> -> vector<4x8x8xf32>
    "tpu.trace_stop"() : () -> ()
    %277 = vector.broadcast %7 : vector<4x1x8xf32> to vector<4x8x8xf32>
    %278 = arith.addf %276, %277 : vector<4x8x8xf32>
    %cst_103 = arith.constant dense<0xFF800000> : vector<4x8xf32>
    %279 = vector.multi_reduction <maximumf>, %278, %cst_103 [2] : vector<4x8x8xf32> to vector<4x8xf32>
    %280 = vector.shape_cast %279 : vector<4x8xf32> to vector<4x8x1xf32>
    %281 = vector.broadcast %280 : vector<4x8x1xf32> to vector<4x8x8xf32>
    %282 = arith.subf %278, %281 : vector<4x8x8xf32>
    %283 = math.exp %282 : vector<4x8x8xf32>
    %cst_104 = arith.constant dense<0.000000e+00> : vector<4x8xf32>
    %284 = vector.multi_reduction <add>, %283, %cst_104 [2] : vector<4x8x8xf32> to vector<4x8xf32>
    %285 = vector.shape_cast %284 : vector<4x8xf32> to vector<4x8x1xf32>
    %286 = arith.truncf %283 : vector<4x8x8xf32> to vector<4x8x8xbf16>
    "tpu.trace_start"() <{level = 10 : i32, message = "bqk,bkd->bqd"}> : () -> ()
    %cst_105 = arith.constant dense<0.000000e+00> : vector<4x8x8xf32>
    %287 = tpu.matmul %286, %275, %cst_105 {dimension_numbers = #tpu.dot_dimension_numbers<[2], [1], [1], [2], [0, 0, 0, 1, 1, 2], [0], [0]>} : vector<4x8x8xbf16>, vector<4x8x8xbf16>, vector<4x8x8xf32> -> vector<4x8x8xf32>
    "tpu.trace_stop"() : () -> ()
    %288 = vector.broadcast %285 : vector<4x8x1xf32> to vector<4x8x8xf32>
    %289 = arith.divf %287, %288 : vector<4x8x8xf32>
    %290 = vector.shape_cast %289 : vector<4x8x8xf32> to vector<32x8xf32>
    %291 = arith.truncf %290 : vector<32x8xf32> to vector<32x8xbf16>
    %c1_106 = arith.constant 1 : index
    %c2_107 = arith.constant 2 : index
    %c0_108 = arith.constant 0 : index
    %c0_109 = arith.constant 0 : index
    %292 = vector.load %arg5[%c1_106, %c2_107, %c0_108, %c0_109] : memref<2x4x8x32xbf16, #tpu.memory_space<vmem>>, vector<1x1x8x32xbf16>
    %293 = vector.shape_cast %292 : vector<1x1x8x32xbf16> to vector<8x32xbf16>
    %cst_110 = arith.constant dense<0.000000e+00> : vector<32x32xf32>
    %294 = tpu.matmul %291, %293, %cst_110 {dimension_numbers = #tpu.dot_dimension_numbers<[1], [0], [0], [1], [0, 0, 1, 1], [], []>} : vector<32x8xbf16>, vector<8x32xbf16>, vector<32x32xf32> -> vector<32x32xf32>
    %295 = arith.addf %269, %294 : vector<32x32xf32>
    %296 = vector.extract_strided_slice %218 {offsets = [0, 0, 24], sizes = [4, 8, 8], strides = [1, 1, 1]} : vector<4x8x96xf32> to vector<4x8x8xf32>
    %297 = arith.truncf %296 : vector<4x8x8xf32> to vector<4x8x8xbf16>
    %298 = vector.extract_strided_slice %218 {offsets = [0, 0, 56], sizes = [4, 8, 8], strides = [1, 1, 1]} : vector<4x8x96xf32> to vector<4x8x8xf32>
    %299 = arith.truncf %298 : vector<4x8x8xf32> to vector<4x8x8xbf16>
    %300 = vector.extract_strided_slice %218 {offsets = [0, 0, 88], sizes = [4, 8, 8], strides = [1, 1, 1]} : vector<4x8x96xf32> to vector<4x8x8xf32>
    %301 = arith.truncf %300 : vector<4x8x8xf32> to vector<4x8x8xbf16>
    "tpu.trace_start"() <{level = 10 : i32, message = "bqd,bkd->bqk"}> : () -> ()
    %cst_111 = arith.constant dense<0.000000e+00> : vector<4x8x8xf32>
    %302 = tpu.matmul %297, %299, %cst_111 {dimension_numbers = #tpu.dot_dimension_numbers<[2], [2], [1], [1], [0, 0, 0, 1, 1, 1], [0], [0]>} : vector<4x8x8xbf16>, vector<4x8x8xbf16>, vector<4x8x8xf32> -> vector<4x8x8xf32>
    "tpu.trace_stop"() : () -> ()
    %303 = vector.broadcast %7 : vector<4x1x8xf32> to vector<4x8x8xf32>
    %304 = arith.addf %302, %303 : vector<4x8x8xf32>
    %cst_112 = arith.constant dense<0xFF800000> : vector<4x8xf32>
    %305 = vector.multi_reduction <maximumf>, %304, %cst_112 [2] : vector<4x8x8xf32> to vector<4x8xf32>
    %306 = vector.shape_cast %305 : vector<4x8xf32> to vector<4x8x1xf32>
    %307 = vector.broadcast %306 : vector<4x8x1xf32> to vector<4x8x8xf32>
    %308 = arith.subf %304, %307 : vector<4x8x8xf32>
    %309 = math.exp %308 : vector<4x8x8xf32>
    %cst_113 = arith.constant dense<0.000000e+00> : vector<4x8xf32>
    %310 = vector.multi_reduction <add>, %309, %cst_113 [2] : vector<4x8x8xf32> to vector<4x8xf32>
    %311 = vector.shape_cast %310 : vector<4x8xf32> to vector<4x8x1xf32>
    %312 = arith.truncf %309 : vector<4x8x8xf32> to vector<4x8x8xbf16>
    "tpu.trace_start"() <{level = 10 : i32, message = "bqk,bkd->bqd"}> : () -> ()
    %cst_114 = arith.constant dense<0.000000e+00> : vector<4x8x8xf32>
    %313 = tpu.matmul %312, %301, %cst_114 {dimension_numbers = #tpu.dot_dimension_numbers<[2], [1], [1], [2], [0, 0, 0, 1, 1, 2], [0], [0]>} : vector<4x8x8xbf16>, vector<4x8x8xbf16>, vector<4x8x8xf32> -> vector<4x8x8xf32>
    "tpu.trace_stop"() : () -> ()
    %314 = vector.broadcast %311 : vector<4x8x1xf32> to vector<4x8x8xf32>
    %315 = arith.divf %313, %314 : vector<4x8x8xf32>
    %316 = vector.shape_cast %315 : vector<4x8x8xf32> to vector<32x8xf32>
    %317 = arith.truncf %316 : vector<32x8xf32> to vector<32x8xbf16>
    %c1_115 = arith.constant 1 : index
    %c3_116 = arith.constant 3 : index
    %c0_117 = arith.constant 0 : index
    %c0_118 = arith.constant 0 : index
    %318 = vector.load %arg5[%c1_115, %c3_116, %c0_117, %c0_118] : memref<2x4x8x32xbf16, #tpu.memory_space<vmem>>, vector<1x1x8x32xbf16>
    %319 = vector.shape_cast %318 : vector<1x1x8x32xbf16> to vector<8x32xbf16>
    %cst_119 = arith.constant dense<0.000000e+00> : vector<32x32xf32>
    %320 = tpu.matmul %317, %319, %cst_119 {dimension_numbers = #tpu.dot_dimension_numbers<[1], [0], [0], [1], [0, 0, 1, 1], [], []>} : vector<32x8xbf16>, vector<8x32xbf16>, vector<32x32xf32> -> vector<32x32xf32>
    %321 = arith.addf %295, %320 : vector<32x32xf32>
    %322 = vector.shape_cast %321 : vector<32x32xf32> to vector<4x8x32xf32>
    %c1_120 = arith.constant 1 : index
    %c0_121 = arith.constant 0 : index
    %323 = vector.load %arg6[%c1_120, %c0_121] : memref<2x32xf32, #tpu.memory_space<vmem>>, vector<1x32xf32>
    %324 = vector.shape_cast %323 : vector<1x32xf32> to vector<32xf32>
    %325 = vector.shape_cast %324 : vector<32xf32> to vector<1x1x32xf32>
    %326 = vector.broadcast %325 : vector<1x1x32xf32> to vector<4x8x32xf32>
    %327 = arith.addf %322, %326 : vector<4x8x32xf32>
    %328 = arith.addf %207, %327 : vector<4x8x32xf32>
    %c1_122 = arith.constant 1 : index
    %c0_123 = arith.constant 0 : index
    %329 = vector.load %arg7[%c1_122, %c0_123] : memref<2x32xf32, #tpu.memory_space<vmem>>, vector<1x32xf32>
    %330 = vector.shape_cast %329 : vector<1x32xf32> to vector<32xf32>
    %c1_124 = arith.constant 1 : index
    %c0_125 = arith.constant 0 : index
    %331 = vector.load %arg8[%c1_124, %c0_125] : memref<2x32xf32, #tpu.memory_space<vmem>>, vector<1x32xf32>
    %332 = vector.shape_cast %331 : vector<1x32xf32> to vector<32xf32>
    %cst_126 = arith.constant dense<0.000000e+00> : vector<4x8xf32>
    %333 = vector.multi_reduction <add>, %328, %cst_126 [2] : vector<4x8x32xf32> to vector<4x8xf32>
    %334 = vector.shape_cast %333 : vector<4x8xf32> to vector<4x8x1xf32>
    %cst_127 = arith.constant 3.200000e+01 : f32
    %335 = vector.broadcast %cst_127 : f32 to vector<4x8x1xf32>
    %336 = arith.divf %334, %335 : vector<4x8x1xf32>
    %337 = vector.broadcast %336 : vector<4x8x1xf32> to vector<4x8x32xf32>
    %338 = arith.subf %328, %337 : vector<4x8x32xf32>
    %339 = arith.mulf %338, %338 : vector<4x8x32xf32>
    %cst_128 = arith.constant dense<0.000000e+00> : vector<4x8xf32>
    %340 = vector.multi_reduction <add>, %339, %cst_128 [2] : vector<4x8x32xf32> to vector<4x8xf32>
    %341 = vector.shape_cast %340 : vector<4x8xf32> to vector<4x8x1xf32>
    %cst_129 = arith.constant 3.200000e+01 : f32
    %342 = vector.broadcast %cst_129 : f32 to vector<4x8x1xf32>
    %343 = arith.divf %341, %342 : vector<4x8x1xf32>
    %344 = vector.broadcast %336 : vector<4x8x1xf32> to vector<4x8x32xf32>
    %345 = arith.subf %328, %344 : vector<4x8x32xf32>
    %cst_130 = arith.constant 9.99999974E-6 : f32
    %346 = vector.broadcast %cst_130 : f32 to vector<4x8x1xf32>
    %347 = arith.addf %343, %346 : vector<4x8x1xf32>
    %348 = math.rsqrt %347 : vector<4x8x1xf32>
    %349 = vector.broadcast %348 : vector<4x8x1xf32> to vector<4x8x32xf32>
    %350 = arith.mulf %345, %349 : vector<4x8x32xf32>
    %351 = vector.shape_cast %330 : vector<32xf32> to vector<1x1x32xf32>
    %352 = vector.broadcast %351 : vector<1x1x32xf32> to vector<4x8x32xf32>
    %353 = arith.mulf %350, %352 : vector<4x8x32xf32>
    %354 = vector.shape_cast %332 : vector<32xf32> to vector<1x1x32xf32>
    %355 = vector.broadcast %354 : vector<1x1x32xf32> to vector<4x8x32xf32>
    %356 = arith.addf %353, %355 : vector<4x8x32xf32>
    %357 = vector.shape_cast %356 : vector<4x8x32xf32> to vector<32x32xf32>
    %358 = arith.truncf %357 : vector<32x32xf32> to vector<32x32xbf16>
    %c1_131 = arith.constant 1 : index
    %c0_132 = arith.constant 0 : index
    %c0_133 = arith.constant 0 : index
    %359 = vector.load %arg11[%c1_131, %c0_132, %c0_133] : memref<2x32x32xbf16, #tpu.memory_space<vmem>>, vector<1x32x32xbf16>
    %360 = vector.shape_cast %359 : vector<1x32x32xbf16> to vector<32x32xbf16>
    %cst_134 = arith.constant dense<0.000000e+00> : vector<32x32xf32>
    %361 = tpu.matmul %358, %360, %cst_134 {dimension_numbers = #tpu.dot_dimension_numbers<[1], [0], [0], [1], [0, 0, 1, 1], [], []>} : vector<32x32xbf16>, vector<32x32xbf16>, vector<32x32xf32> -> vector<32x32xf32>
    %c1_135 = arith.constant 1 : index
    %c0_136 = arith.constant 0 : index
    %362 = vector.load %arg12[%c1_135, %c0_136] : memref<2x32xf32, #tpu.memory_space<vmem>>, vector<1x32xf32>
    %363 = vector.shape_cast %362 : vector<1x32xf32> to vector<32xf32>
    %364 = vector.shape_cast %363 : vector<32xf32> to vector<1x32xf32>
    %365 = vector.broadcast %364 : vector<1x32xf32> to vector<32x32xf32>
    %366 = arith.addf %361, %365 : vector<32x32xf32>
    %cst_137 = arith.constant 0.000000e+00 : f32
    %367 = vector.broadcast %cst_137 : f32 to vector<32x32xf32>
    %368 = arith.maximumf %366, %367 : vector<32x32xf32>
    %369 = arith.truncf %368 : vector<32x32xf32> to vector<32x32xbf16>
    %c1_138 = arith.constant 1 : index
    %c0_139 = arith.constant 0 : index
    %c0_140 = arith.constant 0 : index
    %370 = vector.load %arg13[%c1_138, %c0_139, %c0_140] : memref<2x32x32xbf16, #tpu.memory_space<vmem>>, vector<1x32x32xbf16>
    %371 = vector.shape_cast %370 : vector<1x32x32xbf16> to vector<32x32xbf16>
    %cst_141 = arith.constant dense<0.000000e+00> : vector<32x32xf32>
    %372 = tpu.matmul %369, %371, %cst_141 {dimension_numbers = #tpu.dot_dimension_numbers<[1], [0], [0], [1], [0, 0, 1, 1], [], []>} : vector<32x32xbf16>, vector<32x32xbf16>, vector<32x32xf32> -> vector<32x32xf32>
    %c1_142 = arith.constant 1 : index
    %c0_143 = arith.constant 0 : index
    %373 = vector.load %arg14[%c1_142, %c0_143] : memref<2x32xf32, #tpu.memory_space<vmem>>, vector<1x32xf32>
    %374 = vector.shape_cast %373 : vector<1x32xf32> to vector<32xf32>
    %375 = vector.shape_cast %374 : vector<32xf32> to vector<1x32xf32>
    %376 = vector.broadcast %375 : vector<1x32xf32> to vector<32x32xf32>
    %377 = arith.addf %372, %376 : vector<32x32xf32>
    %378 = vector.shape_cast %377 : vector<32x32xf32> to vector<4x8x32xf32>
    %379 = arith.addf %356, %378 : vector<4x8x32xf32>
    %c1_144 = arith.constant 1 : index
    %c0_145 = arith.constant 0 : index
    %380 = vector.load %arg9[%c1_144, %c0_145] : memref<2x32xf32, #tpu.memory_space<vmem>>, vector<1x32xf32>
    %381 = vector.shape_cast %380 : vector<1x32xf32> to vector<32xf32>
    %c1_146 = arith.constant 1 : index
    %c0_147 = arith.constant 0 : index
    %382 = vector.load %arg10[%c1_146, %c0_147] : memref<2x32xf32, #tpu.memory_space<vmem>>, vector<1x32xf32>
    %383 = vector.shape_cast %382 : vector<1x32xf32> to vector<32xf32>
    %cst_148 = arith.constant dense<0.000000e+00> : vector<4x8xf32>
    %384 = vector.multi_reduction <add>, %379, %cst_148 [2] : vector<4x8x32xf32> to vector<4x8xf32>
    %385 = vector.shape_cast %384 : vector<4x8xf32> to vector<4x8x1xf32>
    %cst_149 = arith.constant 3.200000e+01 : f32
    %386 = vector.broadcast %cst_149 : f32 to vector<4x8x1xf32>
    %387 = arith.divf %385, %386 : vector<4x8x1xf32>
    %388 = vector.broadcast %387 : vector<4x8x1xf32> to vector<4x8x32xf32>
    %389 = arith.subf %379, %388 : vector<4x8x32xf32>
    %390 = arith.mulf %389, %389 : vector<4x8x32xf32>
    %cst_150 = arith.constant dense<0.000000e+00> : vector<4x8xf32>
    %391 = vector.multi_reduction <add>, %390, %cst_150 [2] : vector<4x8x32xf32> to vector<4x8xf32>
    %392 = vector.shape_cast %391 : vector<4x8xf32> to vector<4x8x1xf32>
    %cst_151 = arith.constant 3.200000e+01 : f32
    %393 = vector.broadcast %cst_151 : f32 to vector<4x8x1xf32>
    %394 = arith.divf %392, %393 : vector<4x8x1xf32>
    %395 = vector.broadcast %387 : vector<4x8x1xf32> to vector<4x8x32xf32>
    %396 = arith.subf %379, %395 : vector<4x8x32xf32>
    %cst_152 = arith.constant 9.99999974E-6 : f32
    %397 = vector.broadcast %cst_152 : f32 to vector<4x8x1xf32>
    %398 = arith.addf %394, %397 : vector<4x8x1xf32>
    %399 = math.rsqrt %398 : vector<4x8x1xf32>
    %400 = vector.broadcast %399 : vector<4x8x1xf32> to vector<4x8x32xf32>
    %401 = arith.mulf %396, %400 : vector<4x8x32xf32>
    %402 = vector.shape_cast %381 : vector<32xf32> to vector<1x1x32xf32>
    %403 = vector.broadcast %402 : vector<1x1x32xf32> to vector<4x8x32xf32>
    %404 = arith.mulf %401, %403 : vector<4x8x32xf32>
    %405 = vector.shape_cast %383 : vector<32xf32> to vector<1x1x32xf32>
    %406 = vector.broadcast %405 : vector<1x1x32xf32> to vector<4x8x32xf32>
    %407 = arith.addf %404, %406 : vector<4x8x32xf32>
    %408 = vector.extract_strided_slice %407 {offsets = [0, 0, 0], sizes = [4, 1, 32], strides = [1, 1, 1]} : vector<4x8x32xf32> to vector<4x1x32xf32>
    %409 = vector.shape_cast %408 : vector<4x1x32xf32> to vector<4x32xf32>
    %410 = arith.truncf %409 : vector<4x32xf32> to vector<4x32xbf16>
    %c0_153 = arith.constant 0 : index
    %c0_154 = arith.constant 0 : index
    %411 = vector.load %arg15[%c0_153, %c0_154] : memref<32x128xbf16, #tpu.memory_space<vmem>>, vector<32x128xbf16>
    %cst_155 = arith.constant dense<0.000000e+00> : vector<4x128xf32>
    %412 = tpu.matmul %410, %411, %cst_155 {dimension_numbers = #tpu.dot_dimension_numbers<[1], [0], [0], [1], [0, 0, 1, 1], [], []>} : vector<4x32xbf16>, vector<32x128xbf16>, vector<4x128xf32> -> vector<4x128xf32>
    %c0_156 = arith.constant 0 : index
    %c0_157 = arith.constant 0 : index
    %413 = vector.load %arg16[%c0_156, %c0_157] : memref<1x128xf32, #tpu.memory_space<vmem>>, vector<1x128xf32>
    %414 = vector.shape_cast %413 : vector<1x128xf32> to vector<128xf32>
    %415 = vector.shape_cast %414 : vector<128xf32> to vector<1x128xf32>
    %416 = vector.broadcast %415 : vector<1x128xf32> to vector<4x128xf32>
    %417 = arith.addf %412, %416 : vector<4x128xf32>
    %c0_158 = arith.constant 0 : index
    %c0_159 = arith.constant 0 : index
    %418 = vector.load %arg17[%c0_158, %c0_159] : memref<4x128xf32, #tpu.memory_space<vmem>>, vector<4x128xf32>
    tpu.vector_store %arg17[%c0_158, %c0_159], %417 {strides = array<i32>} : memref<4x128xf32, #tpu.memory_space<vmem>>, vector<4x128xf32>,
    return
  }
  func.func @transform_0(%arg0: i32) -> (i32, i32, i32) {
    %c0_i32 = arith.constant 0 : i32
    %c0_i32_0 = arith.constant 0 : i32
    %c0_i32_1 = arith.constant 0 : i32
    return %arg0, %c0_i32, %c0_i32_0 : i32, i32, i32
  }
  func.func @transform_1(%arg0: i32) -> (i32, i32) {
    %c0_i32 = arith.constant 0 : i32
    %c0_i32_0 = arith.constant 0 : i32
    return %arg0, %c0_i32 : i32, i32
  }
  func.func @transform_2(%arg0: i32) -> (i32, i32, i32) {
    %c0_i32 = arith.constant 0 : i32
    %c0_i32_0 = arith.constant 0 : i32
    %c0_i32_1 = arith.constant 0 : i32
    %c0_i32_2 = arith.constant 0 : i32
    return %c0_i32, %c0_i32_0, %c0_i32_1 : i32, i32, i32
  }
  func.func @transform_3(%arg0: i32) -> (i32, i32) {
    %c0_i32 = arith.constant 0 : i32
    %c0_i32_0 = arith.constant 0 : i32
    %c0_i32_1 = arith.constant 0 : i32
    return %c0_i32, %c0_i32_0 : i32, i32
  }
  func.func @transform_4(%arg0: i32) -> (i32, i32, i32, i32) {
    %c0_i32 = arith.constant 0 : i32
    %c0_i32_0 = arith.constant 0 : i32
    %c0_i32_1 = arith.constant 0 : i32
    %c0_i32_2 = arith.constant 0 : i32
    %c0_i32_3 = arith.constant 0 : i32
    return %c0_i32, %c0_i32_0, %c0_i32_1, %c0_i32_2 : i32, i32, i32, i32
  }
  func.func @transform_5(%arg0: i32) -> (i32, i32) {
    %c0_i32 = arith.constant 0 : i32
    %c0_i32_0 = arith.constant 0 : i32
    %c0_i32_1 = arith.constant 0 : i32
    return %c0_i32, %c0_i32_0 : i32, i32
  }
  func.func @transform_6(%arg0: i32) -> (i32, i32) {
    %c0_i32 = arith.constant 0 : i32
    %c0_i32_0 = arith.constant 0 : i32
    %c0_i32_1 = arith.constant 0 : i32
    return %c0_i32, %c0_i32_0 : i32, i32
  }
  func.func @transform_7(%arg0: i32) -> (i32, i32) {
    %c0_i32 = arith.constant 0 : i32
    %c0_i32_0 = arith.constant 0 : i32
    %c0_i32_1 = arith.constant 0 : i32
    return %c0_i32, %c0_i32_0 : i32, i32
  }
  func.func @transform_8(%arg0: i32) -> (i32, i32) {
    %c0_i32 = arith.constant 0 : i32
    %c0_i32_0 = arith.constant 0 : i32
    %c0_i32_1 = arith.constant 0 : i32
    return %c0_i32, %c0_i32_0 : i32, i32
  }
  func.func @transform_9(%arg0: i32) -> (i32, i32) {
    %c0_i32 = arith.constant 0 : i32
    %c0_i32_0 = arith.constant 0 : i32
    %c0_i32_1 = arith.constant 0 : i32
    return %c0_i32, %c0_i32_0 : i32, i32
  }
  func.func @transform_10(%arg0: i32) -> (i32, i32, i32) {
    %c0_i32 = arith.constant 0 : i32
    %c0_i32_0 = arith.constant 0 : i32
    %c0_i32_1 = arith.constant 0 : i32
    %c0_i32_2 = arith.constant 0 : i32
    return %c0_i32, %c0_i32_0, %c0_i32_1 : i32, i32, i32
  }
  func.func @transform_11(%arg0: i32) -> (i32, i32) {
    %c0_i32 = arith.constant 0 : i32
    %c0_i32_0 = arith.constant 0 : i32
    %c0_i32_1 = arith.constant 0 : i32
    return %c0_i32, %c0_i32_0 : i32, i32
  }
  func.func @transform_12(%arg0: i32) -> (i32, i32, i32) {
    %c0_i32 = arith.constant 0 : i32
    %c0_i32_0 = arith.constant 0 : i32
    %c0_i32_1 = arith.constant 0 : i32
    %c0_i32_2 = arith.constant 0 : i32
    return %c0_i32, %c0_i32_0, %c0_i32_1 : i32, i32, i32
  }
  func.func @transform_13(%arg0: i32) -> (i32, i32) {
    %c0_i32 = arith.constant 0 : i32
    %c0_i32_0 = arith.constant 0 : i32
    %c0_i32_1 = arith.constant 0 : i32
    return %c0_i32, %c0_i32_0 : i32, i32
  }
  func.func @transform_14(%arg0: i32) -> (i32, i32) {
    %c0_i32 = arith.constant 0 : i32
    %c0_i32_0 = arith.constant 0 : i32
    %c0_i32_1 = arith.constant 0 : i32
    return %c0_i32, %c0_i32_0 : i32, i32
  }
  func.func @transform_15(%arg0: i32) -> (i32, i32) {
    %c0_i32 = arith.constant 0 : i32
    %c0_i32_0 = arith.constant 0 : i32
    %c0_i32_1 = arith.constant 0 : i32
    return %c0_i32, %c0_i32_0 : i32, i32
  }
  func.func @transform_16(%arg0: i32) -> (i32, i32) {
    %c0_i32 = arith.constant 0 : i32
    %c0_i32_0 = arith.constant 0 : i32
    return %arg0, %c0_i32 : i32, i32
  }
}

</mosaic_0001>

<bundles_post_ra>
// kernel: tpu_custom_call.1
= control target key start
LH: loop header
LB: loop body
LE: loop exit
PB: predicated region body
PF: predicated region fallthrough
CT: control target
= control target key end

     0   :  { %s7455_s0 = inlined_call_operand.hbm [shape: f32[4,8,32], index: 0, kind: input, shape index: {}]   ;;  %s7456_s1 = inlined_call_operand.hbm [shape: f32[4,8], index: 1, kind: input, shape index: {}]   ;;  %s7457_s2 = inlined_call_operand.hbm [shape: bf16[2,32,96], index: 2, kind: input, shape index: {}]   ;;  %s7458_s3 = inlined_call_operand.vmem [shape: f32[2,96], index: 3, kind: input, shape index: {}]   ;;  %s7459_s4 = inlined_call_operand.hbm [shape: bf16[2,4,8,32], index: 4, kind: input, shape index: {}]   ;;  %s7460_s5 = inlined_call_operand.vmem [shape: f32[2,32], index: 5, kind: input, shape index: {}]   ;;  %s7461_s6 = inlined_call_operand.vmem [shape: f32[2,32], index: 6, kind: input, shape index: {}]   ;;  %s7462_s7 = inlined_call_operand.vmem [shape: f32[2,32], index: 7, kind: input, shape index: {}]   ;;  %s7463_s8 = inlined_call_operand.hbm [shape: f32[2,32], index: 8, kind: input, shape index: {}]   ;;  %s7464_s9 = inlined_call_operand.hbm [shape: f32[2,32], index: 9, kind: input, shape index: {}]   ;;  %s7465_s10 = inlined_call_operand.hbm [shape: bf16[2,32,32], index: 10, kind: input, shape index: {}]   ;;  %s7466_s11 = inlined_call_operand.hbm [shape: f32[2,32], index: 11, kind: input, shape index: {}]   ;;  %s7467_s12 = inlined_call_operand.hbm [shape: bf16[2,32,32], index: 12, kind: input, shape index: {}]   ;;  %s7468_s13 = inlined_call_operand.hbm [shape: f32[2,32], index: 13, kind: input, shape index: {}]   ;;  %s7469_s14 = inlined_call_operand.vmem [shape: bf16[32,128], index: 14, kind: input, shape index: {}]   ;;  %s7470_s15 = inlined_call_operand.vmem [shape: f32[1,128], index: 15, kind: input, shape index: {}]   ;;  %s7471_s16 = inlined_call_operand.hbm [shape: f32[4,128], index: 16, kind: output, shape index: {}]  }
   0x1   :  { %7472 = sst [smem:[#allocation27_spill]] %s7455_s0 }
   0x2   :  { %21 = vsyncpa [#allocation3], 0 }
   0x3   :  { %22 = vsyncpa [#allocation6], 0 }
   0x4   :  { %23 = vsyncpa [#allocation9], 0 }
   0x5   :  { %24 = vsyncpa [#allocation12], 0 }
   0x6   :  { %25 = vsyncpa [#allocation15], 0 }
   0x7   :  { %26 = vsyncpa [#allocation18], 0 }
   0x8   :  { %27 = vsyncpa [#allocation4], 0  ;;  %s6409_s21 = smov [#allocation5]  }
   0x9   :  { %s46_s22 = sshll.u32 %s6409_s21, 4  ;;  %s47_s22 = int_to_ptr.vmem [resolvable:$true] %s46_s22 }
   0xa   :  { %s6183_s23 = scalar_lea.vmem %s47_s22, 64  ;;  %p6188_p1 = scmp.lt.s32.totalorder %s47_s22, %s47_s22 }
   0xb   :  { %p6184_p0 = scmp.ne.s32.totalorder %s47_s22, %s6183_s23  ;;  %p6189_p2 = scmp.lt.s32.totalorder %s6183_s23, %s6183_s23 }
   0xd   :  { %p6190_p3 = por %p6189_p2, %p6188_p1 }
   0xf   :  { %p6191_p4 = pnand %p6190_p3, %p6184_p0 }
  0x11   :  { %6194 = shalt.err (!%p6191_p4)
}
  0x12   :  { %49 = dma.hbm_to_vmem [thread:$0]  %s7456_s1, 64, %s47_s22, [#allocation6]  }
  0x13   :  { %s6410_s26 = smov [#allocation8]   ;;  %s6411_s28 = smov [#allocation11]  }
  0x14   :  { %s69_s27 = sshll.u32 %s6410_s26, 4  ;;  %s98_s29 = sshll.u32 %s6411_s28, 4  ;;  %s70_s27 = int_to_ptr.vmem [resolvable:$true] %s69_s27  ;;  %s99_s29 = int_to_ptr.vmem [resolvable:$true] %s98_s29 }
  0x15   :  { %s6203_s30 = scalar_lea.vmem %s70_s27, 512  ;;  %p6208_p6 = scmp.lt.s32.totalorder %s70_s27, %s70_s27 }
  0x16   :  { %p6204_p5 = scmp.ne.s32.totalorder %s70_s27, %s6203_s30  ;;  %p6209_p7 = scmp.lt.s32.totalorder %s6203_s30, %s6203_s30 }
  0x18   :  { %p6210_p8 = por %p6209_p7, %p6208_p6 }
  0x1a   :  { %p6211_p9 = pnand %p6210_p8, %p6204_p5 }
  0x1c   :  { %6214 = shalt.err (!%p6211_p9)
}
  0x1d   :  { %s6412_s0 = smov 64   ;;  %s6413_s17 = smov 4  }
  0x1e   :  { %75 = dma.hbm_to_vmem [thread:$0]  %s7459_s4, 512, %s70_s27, [#allocation9], %s6412_s0, %s6412_s0, %s6413_s17  }
  0x1f   :  { %s6223_s1 = scalar_lea.vmem %s99_s29, 32  ;;  %p6228_p11 = scmp.lt.s32.totalorder %s99_s29, %s99_s29 }
  0x20   :  { %p6224_p10 = scmp.ne.s32.totalorder %s99_s29, %s6223_s1  ;;  %p6229_p12 = scmp.lt.s32.totalorder %s6223_s1, %s6223_s1 }
  0x22   :  { %p6230_p13 = por %p6229_p12, %p6228_p11 }
  0x24   :  { %p6231_p0 = pnand %p6230_p13, %p6224_p10 }
  0x26   :  { %6234 = shalt.err (!%p6231_p0)
}
  0x27   :  { %101 = dma.hbm_to_vmem [thread:$0]  %s7464_s9, 32, %s99_s29, [#allocation12]  }
  0x28   :  { %s6414_s22 = smov [#allocation14]   ;;  %s6415_s24 = smov [#allocation2]  }
  0x29   :  { %s120_s23 = sshll.u32 %s6414_s22, 4  ;;  %s33_s25 = sshll.u32 %s6415_s24, 4  ;;  %s121_s23 = int_to_ptr.vmem [resolvable:$true] %s120_s23  ;;  %s34_s25 = int_to_ptr.vmem [resolvable:$true] %s33_s25 }
  0x2a   :  { %s6243_s26 = scalar_lea.vmem %s121_s23, 32  ;;  %p6248_p2 = scmp.lt.s32.totalorder %s121_s23, %s121_s23 }
  0x2b   :  { %p6244_p1 = scmp.ne.s32.totalorder %s121_s23, %s6243_s26  ;;  %p6249_p3 = scmp.lt.s32.totalorder %s6243_s26, %s6243_s26 }
  0x2d   :  { %p6250_p4 = por %p6249_p3, %p6248_p2 }
  0x2f   :  { %p6251_p5 = pnand %p6250_p4, %p6244_p1 }
  0x31   :  { %6254 = shalt.err (!%p6251_p5)
}
  0x32   :  { %123 = dma.hbm_to_vmem [thread:$0]  %s7466_s11, 32, %s121_s23, [#allocation15]  }
  0x33   :  { %s6263_s28 = scalar_lea.vmem %s34_s25, 512  ;;  %p6268_p7 = scmp.lt.s32.totalorder %s34_s25, %s34_s25 }
  0x34   :  { %p6264_p6 = scmp.ne.s32.totalorder %s34_s25, %s6263_s28  ;;  %p6269_p8 = scmp.lt.s32.totalorder %s6263_s28, %s6263_s28 }
  0x36   :  { %p6270_p9 = por %p6269_p8, %p6268_p7 }
  0x38   :  { %p6271_p10 = pnand %p6270_p9, %p6264_p6 }
  0x3a   :  { %6274 = shalt.err (!%p6271_p10)
}
  0x3b   :  { %s6416_s9 = smov 128   ;;  %s6417_s29 = smov 8  }
  0x3c   :  { %s7473_s19 = sld [smem:[#allocation27_spill]]  ;;  %s6418_s1 = smov [#allocation7]  }
  0x3d   :  { %s55_s20 = sshll.u32 %s6418_s1, 4  ;;  %s6419_s21 = smov [#allocation10]   ;;  %s56_s20 = int_to_ptr.vmem [resolvable:$true] %s55_s20 }
  0x3e   :  { %s88_s22 = sshll.u32 %s6419_s21, 4  ;;  %s6283_s11 = scalar_lea.vmem %s56_s20, 512  ;;  %s89_s22 = int_to_ptr.vmem [resolvable:$true] %s88_s22 }
  0x3f   :  { %p6284_p11 = scmp.ne.s32.totalorder %s56_s20, %s6283_s11  ;;  %p6288_p12 = scmp.lt.s32.totalorder %s56_s20, %s56_s20 }
  0x40   :  { %p6289_p13 = scmp.lt.s32.totalorder %s6283_s11, %s6283_s11 }
  0x42   :  { %39 = dma.hbm_to_vmem [thread:$0]  %s7473_s19, 512, %s34_s25, [#allocation3], %s6416_s9, %s6416_s9, %s6417_s29  }
  0x43   :  { %p6290_p0 = por %p6289_p13, %p6288_p12 }
  0x45   :  { %p6291_p1 = pnand %p6290_p0, %p6284_p11 }
  0x47   :  { %6294 = shalt.err (!%p6291_p1)
}
  0x48   :  { %61 = dma.hbm_to_vmem [thread:$0]  %s7457_s2, 512, %s56_s20, [#allocation6], %s6412_s0, %s6412_s0, %s6413_s17  }
  0x49   :  { %s6303_s25 = scalar_lea.vmem %s89_s22, 32  ;;  %p6308_p3 = scmp.lt.s32.totalorder %s89_s22, %s89_s22 }
  0x4a   :  { %p6304_p2 = scmp.ne.s32.totalorder %s89_s22, %s6303_s25  ;;  %p6309_p4 = scmp.lt.s32.totalorder %s6303_s25, %s6303_s25 }
  0x4c   :  { %p6310_p5 = por %p6309_p4, %p6308_p3 }
  0x4e   :  { %p6311_p6 = pnand %p6310_p5, %p6304_p2 }
  0x50   :  { %6314 = shalt.err (!%p6311_p6)
}
  0x51   :  { %91 = dma.hbm_to_vmem [thread:$0]  %s7463_s8, 32, %s89_s22, [#allocation9]  }
  0x52   :  { %s6420_s27 = smov [#allocation13]   ;;  %s6421_s9 = smov [#allocation16]  }
  0x53   :  { %s107_s28 = sshll.u32 %s6420_s27, 4  ;;  %s129_s29 = sshll.u32 %s6421_s9, 4  ;;  %s108_s28 = int_to_ptr.vmem [resolvable:$true] %s107_s28  ;;  %s130_s29 = int_to_ptr.vmem [resolvable:$true] %s129_s29 }
  0x54   :  { %s6323_s30 = scalar_lea.vmem %s108_s28, 512  ;;  %p6328_p8 = scmp.lt.s32.totalorder %s108_s28, %s108_s28 }
  0x55   :  { %p6324_p7 = scmp.ne.s32.totalorder %s108_s28, %s6323_s30  ;;  %p6329_p9 = scmp.lt.s32.totalorder %s6323_s30, %s6323_s30 }
  0x57   :  { %p6330_p10 = por %p6329_p9, %p6328_p8 }
  0x59   :  { %p6331_p11 = pnand %p6330_p10, %p6324_p7 }
  0x5b   :  { %6334 = shalt.err (!%p6331_p11)
}
  0x5c   :  { %113 = dma.hbm_to_vmem [thread:$0]  %s7465_s10, 512, %s108_s28, [#allocation12], %s6412_s0, %s6412_s0, %s6413_s17  }
  0x5d   :  { %s6343_s8 = scalar_lea.vmem %s130_s29, 512  ;;  %p6348_p13 = scmp.lt.s32.totalorder %s130_s29, %s130_s29 }
  0x5e   :  { %p6344_p12 = scmp.ne.s32.totalorder %s130_s29, %s6343_s8  ;;  %p6349_p0 = scmp.lt.s32.totalorder %s6343_s8, %s6343_s8 }
  0x60   :  { %p6350_p1 = por %p6349_p0, %p6348_p13 }
  0x62   :  { %p6351_p2 = pnand %p6350_p1, %p6344_p12 }
  0x64   :  { %6354 = shalt.err (!%p6351_p2)
}
  0x65   :  { %135 = dma.hbm_to_vmem [thread:$0]  %s7467_s12, 512, %s130_s29, [#allocation15], %s6412_s0, %s6412_s0, %s6413_s17  }
  0x66   :  { %s6422_s20 = smov [#allocation17]  }
  0x67   :  { %s142_s21 = sshll.u32 %s6422_s20, 4  ;;  %s143_s21 = int_to_ptr.vmem [resolvable:$true] %s142_s21 }
  0x68   :  { %s6363_s22 = scalar_lea.vmem %s143_s21, 32  ;;  %p6368_p4 = scmp.lt.s32.totalorder %s143_s21, %s143_s21 }
  0x69   :  { %p6364_p3 = scmp.ne.s32.totalorder %s143_s21, %s6363_s22  ;;  %p6369_p5 = scmp.lt.s32.totalorder %s6363_s22, %s6363_s22 }
  0x6b   :  { %p6370_p6 = por %p6369_p5, %p6368_p4 }
  0x6d   :  { %p6371_p7 = pnand %p6370_p6, %p6364_p3 }
  0x6f   :  { %6374 = shalt.err (!%p6371_p7)
}
  0x70   :  { %145 = dma.hbm_to_vmem [thread:$0]  %s7468_s13, 32, %s143_s21, [#allocation18]  }
  0x71   :  { %6395 = dma.done.wait [#allocation3], 512  }
  0x72   :  { %6396 = vsyncadd [#allocation3], 4294966784 }
  0x73   :  { %6397 = dma.done.wait [#allocation6], 576  }
  0x74   :  { %6398 = vsyncadd [#allocation6], 4294966720 }
  0x75   :  { %6399 = dma.done.wait [#allocation9], 544  }
  0x76   :  { %6400 = vsyncadd [#allocation9], 4294966752 }
  0x77   :  { %6401 = dma.done.wait [#allocation12], 544  }
  0x78   :  { %6402 = vsyncadd [#allocation12], 4294966752 }
  0x79   :  { %6403 = dma.done.wait [#allocation15], 544  }
  0x7a   :  { %6404 = vsyncadd [#allocation15], 4294966752 }
  0x7b   :  { %6405 = dma.done.wait [#allocation18], 32  }
  0x7c   :  { %6406 = vsyncadd [#allocation18], 4294967264  ;;  %v5997_v0 = vld [vmem:[#allocation7 + $0x8] sm:$0xff]   ;;  %v5998_v1 = vld [vmem:[#allocation7] sm:$0xff]   ;;  %vm236_vm0 = vcmask 261120   ;;  %v6423_v8 = vmov 0.0   ;;  %v192_v34 = vlaneseq }
  0x7d   :  { %5473 = vmatprep.subr.bf16.mxu0 %v5997_v0  ;;  %v181_v2 = vld [vmem:[#allocation2] sm:$0xff]  ;;  %v182_v3 = vld [vmem:[#allocation2 + $0x8] sm:$0xff]  ;;  %v183_v4 = vld [vmem:[#allocation2 + $0x10] sm:$0xff]  ;;  %5481 = vmatprep.subr.bf16.mxu1 %v6423_v8  ;;  %vm6424_vm1 = vmmov 0   ;;  %s6425_s17 = smov 96   ;;  %vm319_vm2 = vcmask 64512  }
  0x7e   :  { %5474 = vmatpush3.bf16.msra.mxu0 %v5997_v0  ;;  %v213_v5 = vpack.c.bf16 %v182_v3, %v181_v2  ;;  %v184_v6 = vld [vmem:[#allocation2 + $0x18] sm:$0xff]  ;;  %v5170_v9 = vld [vmem:[%s7458_s3] ss:$0 sm:$0xff]  ;;  %5483 = vmatprep.mubr.msk.bf16.mxu1 %vm6424_vm1, %v6423_v8  ;;  %vm558_vm3 = vcmask 1043456   ;;  %v6426_v32 = vmov 1966171168  }
  0x7f   :  { %5475 = vmatprep.subr.bf16.mxu0 %v5998_v1  ;;  %v214_v7 = vpack.c.bf16 %v184_v6, %v183_v4  ;;  %v190_v33 = vunpack.c.l.s4 %v6426_v32  ;;  %v185_v35 = vld [vmem:[#allocation5] sm:$0xf]  ;;  %v193_v37 = vshrl.u32 %v192_v34, 7  ;;  %s6427_s23 = smov 88   ;;  %s6428_s24 = smov 120   ;;  %vm5085_vm5 = vcmask 1041409  }
  0x80   :  { %5477 = vmatprep.mubr.msk.bf16.mxu0 %vm236_vm0, %v213_v5  ;;  %vm186_vm4 = vcmp.eq.f32.partialorder %v185_v35, 0.0  ;;  %s6429_s25 = smov 56   ;;  %s6430_s26 = smov 80   ;;  %vm5088_vm6 = vcmask 1042434   ;;  %vm5091_vm7 = vcmask 1043459  }
  0x81   :  { %v191_v36 = vunpack.c.0.s8 %v190_v33  ;;  %v187_v39 = vsel %vm186_vm4, -1e+30, %v6423_v8  ;;  %v298_v42 = vsub.s32 0, %v193_v37  ;;  %s6431_s4 = smov 112   ;;  %s6432_s27 = smov 48  }
  0x82   :  { %5476 = vmatpush3.bf16.msra.mxu0 %v5998_v1  ;;  %s6433_s28 = smov 72   ;;  %s6434_s9 = smov 104  }
  0x83   :  { %5487 = vmatprep.subr.bf16.mxu0 %v6423_v8  ;;  %v194_v38 = vsub.s32 %v191_v36, %v193_v37  ;;  %s6435_s29 = smov 40  }
  0x85   :  { %5478 = vmatmul.mubr.msk.bf16.vlgmr.msra.gmra.mxu0 %vm236_vm0, %v214_v7  ;;  %v195_v40 = vrot.slane %v187_v39, %v194_v38 }
  0x86   :  { %5489 = vmatprep.mubr.msk.bf16.mxu0 %vm6424_vm1, %v6423_v8 }
  0x87   :  { %v203_v41 = vrot.slane %v195_v40, %v194_v38  ;;  %v196_v43 = vcombine.high %v195_v40, %v195_v40 }
  0x89   :  { %v6620_v44 = vrot.slane %v203_v41, %v298_v42  ;;  %v210_v45 = vrot.slane %v196_v43, %v194_v38  ;;  %v211_v49 = vcombine.high %v203_v41, %v203_v41 }
  0x8b   :  { %v6623_v48 = vrot.slane %v210_v45, %v298_v42  ;;  %v6627_v55 = vrot.slane %v211_v49, %v298_v42  ;;  %v212_v56 = vcombine.high %v210_v45, %v210_v45 }
  0x8d   :  { %v6631_v63 = vrot.slane %v212_v56, %v298_v42 }
 0x145   :  { %v5479_v10 = vpop.f32.mrf.mxu0 }
 0x146   :  { %v286_v11 = vadd.f32 %v5479_v10, %v5170_v9 }
 0x147   :  { %v277_v12 = vpop.f32.mrf.mxu0 }
 0x148   :  { %v6575_v13 = vpack.c.bf16 %v286_v11, %v286_v11  ;;  %v278_v14 = vadd.f32 %v5170_v9, %v277_v12 }
 0x149   :  { %v5480_v15 = vpop.f32.mrf.mxu0 }
 0x14a   :  { %v6577_v16 = vpack.c.bf16 %v278_v14, %v278_v14  ;;  %v289_v17 = vadd.f32 %v5480_v15, %v5170_v9  ;;  %416 = vrot.lane.b32.xlu1 %v6575_v13, %s6425_s17 }
 0x14b   :  { %v280_v18 = vpop.f32.mrf.mxu0 }
 0x14c   :  { %v6581_v19 = vpack.c.bf16 %v289_v17, %v289_v17  ;;  %v281_v20 = vadd.f32 %v5170_v9, %v280_v18  ;;  %317 = vrot.lane.b32.xlu0 %v6577_v16, %s6425_s17 }
 0x14e   :  { %v6585_v21 = vpack.c.bf16 %v281_v20, %v281_v20  ;;  %465 = vrot.lane.b32.xlu1 %v6581_v19, %s6425_s17 }
 0x150   :  { %367 = vrot.lane.b32.xlu0 %v6585_v21, %s6425_s17 }
 0x152   :  { %553 = vrot.lane.b32.xlu1 %v6577_v16, %s6412_s0 }
 0x1bc   :  { %v417_v24 = vpop.permute.xlu1 %416 }
 0x1bd   :  { %v422_v28 = vsel %vm319_vm2, %v417_v24, 0 }
 0x1be   :  { %v318_v22 = vpop.permute.xlu0 %317 }
 0x1bf   :  { %v324_v23 = vsel %vm319_vm2, %v318_v22, 0 }
 0x1c0   :  { %5482 = vmatpush3.bf16.xpose.msra.mxu1 %v324_v23  ;;  %v466_v27 = vpop.permute.xlu1 %465 }
 0x1c1   :  { %5493 = vmatprep.subr.bf16.mxu1 %v6423_v8  ;;  %v471_v29 = vsel %vm319_vm2, %v466_v27, 0 }
 0x1c2   :  { %v368_v25 = vpop.permute.xlu0 %367 }
 0x1c3   :  { %v373_v26 = vsel %vm319_vm2, %v368_v25, 0 }
 0x1c4   :  { %5488 = vmatpush3.bf16.xpose.msra.mxu0 %v373_v26  ;;  %v554_v30 = vpop.permute.xlu1 %553 }
 0x1c5   :  { %5499 = vmatprep.subr.bf16.mxu0 %v6423_v8  ;;  %v560_v31 = vsel %vm558_vm3, %v554_v30, 0 }
 0x1c7   :  { %5484 = vmatmul.mubr.msk.bf16.vlgmr.msra.gmra.mxu1 %vm319_vm2, %v6577_v16 }
 0x1c8   :  { %5494 = vmatpush3.bf16.xpose.msra.mxu1 %v422_v28  ;;  %5495 = vmatprep.mubr.msk.bf16.mxu1 %vm6424_vm1, %v6423_v8 }
 0x1c9   :  { %5505 = vmatprep.subr.bf16.mxu1 %v6423_v8 }
 0x1cb   :  { %5490 = vmatmul.mubr.msk.bf16.vlgmr.msra.gmra.mxu0 %vm319_vm2, %v6585_v21 }
 0x1cc   :  { %5500 = vmatpush3.bf16.xpose.msra.mxu0 %v471_v29  ;;  %5501 = vmatprep.mubr.msk.bf16.mxu0 %vm6424_vm1, %v6423_v8 }
 0x1cd   :  { %5511 = vmatprep.subr.bf16.mxu0 %v6423_v8 }
 0x1cf   :  { %5496 = vmatmul.mubr.msk.bf16.vlgmr.msra.gmra.mxu1 %vm319_vm2, %v6575_v13 }
 0x1d0   :  { %5506 = vmatpush3.bf16.msra.mxu1 %v560_v31  ;;  %5507 = vmatprep.mubr.msk.bf16.mxu1 %vm6424_vm1, %v6423_v8 }
 0x1d1   :  { %5517 = vmatprep.subr.bf16.mxu1 %v6423_v8 }
 0x1d3   :  { %5502 = vmatmul.mubr.msk.bf16.vlgmr.msra.gmra.mxu0 %vm319_vm2, %v6581_v19 }
 0x1d4   :  { %5513 = vmatprep.mubr.msk.bf16.mxu0 %vm6424_vm1, %v6423_v8 }
 0x287   :  { %v360_v46 = vpop.f32.mrf.mxu1 }
 0x288   :  { %v361_v47 = vadd.f32 %v360_v46, %v6620_v44 }
 0x289   :  { %v5485_v50 = vpop.f32.mrf.mxu1 }
 0x28a   :  { %v513_v51 = vsel %vm319_vm2, %v361_v47, -inf }
 0x28b   :  { %514 = vmax.xlane.f32.xlu0 %v513_v51  ;;  %v363_v52 = vpop.f32.mrf.mxu1  ;;  %v409_v53 = vpop.f32.mrf.mxu0 }
 0x28c   :  { %v410_v54 = vadd.f32 %v409_v53, %v6623_v48 }
 0x28d   :  { %v5486_v57 = vpop.f32.mrf.mxu1  ;;  %v5491_v58 = vpop.f32.mrf.mxu0 }
 0x28e   :  { %v516_v59 = vsel %vm319_vm2, %v410_v54, -inf }
 0x28f   :  { %v458_v60 = vpop.f32.mrf.mxu1  ;;  %517 = vmax.xlane.f32.xlu1 %v516_v59  ;;  %v412_v61 = vpop.f32.mrf.mxu0 }
 0x290   :  { %v459_v62 = vadd.f32 %v458_v60, %v6627_v55 }
 0x291   :  { %v5492_v0 = vpop.f32.mrf.mxu0  ;;  %v5497_v1 = vpop.f32.mrf.mxu1 }
 0x292   :  { %v519_v2 = vsel %vm319_vm2, %v459_v62, -inf }
 0x293   :  { %520 = vmax.xlane.f32.xlu0 %v519_v2  ;;  %v461_v3 = vpop.f32.mrf.mxu1  ;;  %v507_v4 = vpop.f32.mrf.mxu0 }
 0x294   :  { %v508_v5 = vadd.f32 %v507_v4, %v6631_v63 }
 0x295   :  { %v5498_v6 = vpop.f32.mrf.mxu1  ;;  %v5503_v7 = vpop.f32.mrf.mxu0 }
 0x296   :  { %v522_v9 = vsel %vm319_vm2, %v508_v5, -inf }
 0x297   :  { %523 = vmax.xlane.f32.xlu0 %v522_v9  ;;  %v510_v10 = vpop.f32.mrf.mxu0 }
 0x299   :  { %v5504_v11 = vpop.f32.mrf.mxu0 }
 0x2a0   :  { %650 = vrot.lane.b32.xlu1 %v6575_v13, %s6412_s0 }
 0x2a4   :  { %698 = vrot.lane.b32.xlu1 %v6581_v19, %s6412_s0 }
 0x2a8   :  { %809 = vrot.lane.b32.xlu1 %v6585_v21, %s6427_s23 }
 0x2ac   :  { %807 = vrot.lane.b32.xlu1 %v6585_v21, %s6428_s24 }
 0x2ad   :  { %602 = vrot.lane.b32.xlu0 %v6585_v21, %s6412_s0 }
 0x2b0   :  { %909 = vrot.lane.b32.xlu1 %v6581_v19, %s6427_s23 }
 0x2b1   :  { %759 = vrot.lane.b32.xlu0 %v6577_v16, %s6427_s23 }
 0x2b4   :  { %907 = vrot.lane.b32.xlu1 %v6581_v19, %s6428_s24 }
 0x2b5   :  { %757 = vrot.lane.b32.xlu0 %v6577_v16, %s6428_s24 }
 0x2b8   :  { %997 = vrot.lane.b32.xlu1 %v6577_v16, %s6429_s25 }
 0x2b9   :  { %859 = vrot.lane.b32.xlu0 %v6575_v13, %s6427_s23 }
 0x2bd   :  { %857 = vrot.lane.b32.xlu0 %v6575_v13, %s6428_s24 }
 0x314   :  { %v515_v12 = vpop.xlane.xlu0 %514 }
 0x315   :  { %v525_v14 = vsub.f32 %v361_v47, %v515_v12 }
 0x317   :  { %v529_v15 = vmul.f32 1.442695, %v525_v14 }
 0x318   :  { %v518_v17 = vpop.xlane.xlu1 %517 }
 0x319   :  { %6011 = vpow2.f32 %v529_v15  ;;  %v526_v18 = vsub.f32 %v410_v54, %v518_v17 }
 0x31b   :  { %v531_v20 = vmul.f32 1.442695, %v526_v18 }
 0x31c   :  { %v651_v22 = vpop.permute.xlu1 %650  ;;  %v521_v23 = vpop.xlane.xlu0 %520 }
 0x31d   :  { %6013 = vpow2.f32 %v531_v20  ;;  %v527_v24 = vsub.f32 %v459_v62, %v521_v23  ;;  %v656_v35 = vsel %vm558_vm3, %v651_v22, 0 }
 0x31f   :  { %v533_v25 = vmul.f32 1.442695, %v527_v24 }
 0x320   :  { %v699_v26 = vpop.permute.xlu1 %698  ;;  %v524_v27 = vpop.xlane.xlu0 %523 }
 0x321   :  { %6015 = vpow2.f32 %v533_v25  ;;  %v528_v28 = vsub.f32 %v508_v5, %v524_v27  ;;  %v704_v40 = vsel %vm558_vm3, %v699_v26, 0 }
 0x323   :  { %v535_v29 = vmul.f32 1.442695, %v528_v28 }
 0x324   :  { %v603_v30 = vpop.permute.xlu0 %602  ;;  %v810_v33 = vpop.permute.xlu1 %809 }
 0x325   :  { %6017 = vpow2.f32 %v535_v29  ;;  %v608_v31 = vsel %vm558_vm3, %v603_v30, 0  ;;  %v815_v50 = vsel %vm319_vm2, %v810_v33, 0 }
 0x326   :  { %v6661_v32 = vpop.eup %6011  ;;  %5512 = vmatpush3.bf16.msra.mxu0 %v608_v31 }
 0x327   :  { %v549_v34 = vpack.c.bf16 %v6661_v32, %v6661_v32  ;;  %5523 = vmatprep.subr.bf16.mxu0 %v6423_v8 }
 0x328   :  { %v760_v37 = vpop.permute.xlu0 %759  ;;  %v808_v39 = vpop.permute.xlu1 %807 }
 0x329   :  { %5508 = vmatmul.mubr.msk.bf16.vlgmr.msra.gmra.mxu1 %vm319_vm2, %v549_v34  ;;  %v765_v45 = vsel %vm319_vm2, %v760_v37, 0 }
 0x32a   :  { %v6668_v36 = vpop.eup %6013  ;;  %5518 = vmatpush3.bf16.msra.mxu1 %v656_v35  ;;  %5519 = vmatprep.mubr.msk.bf16.mxu1 %vm6424_vm1, %v6423_v8 }
 0x32b   :  { %v550_v38 = vpack.c.bf16 %v6668_v36, %v6668_v36  ;;  %5529 = vmatprep.subr.bf16.mxu1 %v6423_v8 }
 0x32c   :  { %v758_v43 = vpop.permute.xlu0 %757  ;;  %v910_v47 = vpop.permute.xlu1 %909 }
 0x32d   :  { %5514 = vmatmul.mubr.msk.bf16.vlgmr.msra.gmra.mxu0 %vm319_vm2, %v550_v38  ;;  %v915_v54 = vsel %vm319_vm2, %v910_v47, 0 }
 0x32e   :  { %v6677_v41 = vpop.eup %6015  ;;  %5524 = vmatpush3.bf16.msra.mxu0 %v704_v40  ;;  %5525 = vmatprep.mubr.msk.bf16.mxu0 %vm6424_vm1, %v6423_v8 }
 0x32f   :  { %v551_v42 = vpack.c.bf16 %v6677_v41, %v6677_v41  ;;  %5535 = vmatprep.subr.bf16.mxu0 %v6423_v8  ;;  %v543_v47 = vsel %vm319_vm2, %v6677_v41, 0.0 }
 0x330   :  { %v860_v51 = vpop.permute.xlu0 %859  ;;  %v908_v52 = vpop.permute.xlu1 %907 }
 0x331   :  { %5520 = vmatmul.mubr.msk.bf16.vlgmr.msra.gmra.mxu1 %vm319_vm2, %v551_v42  ;;  %v865_v53 = vsel %vm319_vm2, %v860_v51, 0 }
 0x332   :  { %v6686_v46 = vpop.eup %6017  ;;  %5530 = vmatpush3.bf16.xpose.msra.mxu1 %v765_v45  ;;  %5531 = vmatprep.mubr.msk.bf16.mxu1 %vm6424_vm1, %v6423_v8  ;;  %v540_v45 = vsel %vm319_vm2, %v6668_v36, 0.0 }
 0x333   :  { %v552_v49 = vpack.c.bf16 %v6686_v46, %v6686_v46  ;;  %5541 = vmatprep.subr.bf16.mxu1 %v6423_v8 }
 0x334   :  { %v998_v56 = vpop.permute.xlu1 %997  ;;  %v858_v57 = vpop.permute.xlu0 %857 }
 0x335   :  { %5526 = vmatmul.mubr.msk.bf16.vlgmr.msra.gmra.mxu0 %vm319_vm2, %v552_v49  ;;  %v1003_v58 = vsel %vm558_vm3, %v998_v56, 0  ;;  %v537_v49 = vsel %vm319_vm2, %v6661_v32, 0.0 }
 0x336   :  { %5536 = vmatpush3.bf16.xpose.msra.mxu0 %v815_v50  ;;  %5537 = vmatprep.mubr.msk.bf16.mxu0 %vm6424_vm1, %v6423_v8  ;;  %v546_v50 = vsel %vm319_vm2, %v6686_v46, 0.0 }
 0x337   :  { %5547 = vmatprep.subr.bf16.mxu0 %v6423_v8 }
 0x339   :  { %5532 = vmatmul.mubr.msk.bf16.vlgmr.msra.gmra.mxu1 %vm319_vm2, %v758_v43 }
 0x33a   :  { %5542 = vmatpush3.bf16.xpose.msra.mxu1 %v865_v53  ;;  %5543 = vmatprep.mubr.msk.bf16.mxu1 %vm6424_vm1, %v6423_v8 }
 0x33b   :  { %5553 = vmatprep.subr.bf16.mxu1 %v6423_v8 }
 0x33d   :  { %5538 = vmatmul.mubr.msk.bf16.vlgmr.msra.gmra.mxu0 %vm319_vm2, %v808_v39 }
 0x33e   :  { %5548 = vmatpush3.bf16.xpose.msra.mxu0 %v915_v54  ;;  %5549 = vmatprep.mubr.msk.bf16.mxu0 %vm6424_vm1, %v6423_v8 }
 0x33f   :  { %5559 = vmatprep.subr.bf16.mxu0 %v6423_v8 }
 0x341   :  { %5544 = vmatmul.mubr.msk.bf16.vlgmr.msra.gmra.mxu1 %vm319_vm2, %v858_v57 }
 0x342   :  { %5554 = vmatpush3.bf16.msra.mxu1 %v1003_v58  ;;  %5555 = vmatprep.mubr.msk.bf16.mxu1 %vm6424_vm1, %v6423_v8 }
 0x343   :  { %5565 = vmatprep.subr.bf16.mxu1 %v6423_v8 }
 0x345   :  { %5550 = vmatmul.mubr.msk.bf16.vlgmr.msra.gmra.mxu0 %vm319_vm2, %v908_v52 }
 0x346   :  { %5561 = vmatprep.mubr.msk.bf16.mxu0 %vm6424_vm1, %v6423_v8 }
 0x3e9   :  { %v6716_v59 = vpop.f32.mrf.mxu1 }
 0x3eb   :  { %v5509_v60 = vpop.f32.mrf.mxu1 }
 0x3ed   :  { %v599_v61 = vpop.f32.mrf.mxu1  ;;  %v6718_v62 = vpop.f32.mrf.mxu0 }
 0x3ef   :  { %v5510_v0 = vpop.f32.mrf.mxu1  ;;  %v5515_v1 = vpop.f32.mrf.mxu0 }
 0x3f1   :  { %v647_v2 = vpop.f32.mrf.mxu0  ;;  %v6720_v3 = vpop.f32.mrf.mxu1 }
 0x3f3   :  { %v5516_v4 = vpop.f32.mrf.mxu0  ;;  %v5521_v5 = vpop.f32.mrf.mxu1 }
 0x3f5   :  { %v695_v6 = vpop.f32.mrf.mxu1  ;;  %v6722_v7 = vpop.f32.mrf.mxu0 }
 0x3f7   :  { %v5522_v9 = vpop.f32.mrf.mxu1  ;;  %v5527_v10 = vpop.f32.mrf.mxu0 }
 0x3f9   :  { %v743_v11 = vpop.f32.mrf.mxu0  ;;  %v801_v12 = vpop.f32.mrf.mxu1 }
 0x3fa   :  { %v802_v14 = vadd.f32 %v801_v12, %v6620_v44 }
 0x3fb   :  { %v5528_v15 = vpop.f32.mrf.mxu0  ;;  %v5533_v17 = vpop.f32.mrf.mxu1 }
 0x3fc   :  { %v957_v18 = vsel %vm319_vm2, %v802_v14, -inf }
 0x3fd   :  { %v851_v20 = vpop.f32.mrf.mxu0  ;;  %958 = vmax.xlane.f32.xlu0 %v957_v18  ;;  %v804_v22 = vpop.f32.mrf.mxu1 }
 0x3fe   :  { %v852_v23 = vadd.f32 %v851_v20, %v6623_v48 }
 0x3ff   :  { %v5534_v24 = vpop.f32.mrf.mxu1  ;;  %v5539_v25 = vpop.f32.mrf.mxu0 }
 0x400   :  { %v960_v26 = vsel %vm319_vm2, %v852_v23, -inf }
 0x401   :  { %961 = vmax.xlane.f32.xlu1 %v960_v26  ;;  %v854_v27 = vpop.f32.mrf.mxu0  ;;  %v901_v28 = vpop.f32.mrf.mxu1 }
 0x402   :  { %v902_v29 = vadd.f32 %v901_v28, %v6627_v55 }
 0x403   :  { %v5540_v30 = vpop.f32.mrf.mxu0  ;;  %v5545_v31 = vpop.f32.mrf.mxu1 }
 0x404   :  { %v963_v33 = vsel %vm319_vm2, %v902_v29, -inf }
 0x405   :  { %v951_v34 = vpop.f32.mrf.mxu0  ;;  %964 = vmax.xlane.f32.xlu0 %v963_v33  ;;  %v904_v35 = vpop.f32.mrf.mxu1 }
 0x406   :  { %v952_v37 = vadd.f32 %v951_v34, %v6631_v63 }
 0x407   :  { %v5546_v38 = vpop.f32.mrf.mxu1  ;;  %v5551_v39 = vpop.f32.mrf.mxu0 }
 0x408   :  { %v966_v40 = vsel %vm319_vm2, %v952_v37, -inf }
 0x409   :  { %v954_v42 = vpop.f32.mrf.mxu0  ;;  %967 = vmax.xlane.f32.xlu0 %v966_v40 }
 0x40b   :  { %v5552_v43 = vpop.f32.mrf.mxu0 }
 0x40c   :  { %v1200_v43 = vld [vmem:[#allocation8 + $0x4] sm:$0xf] }
 0x412   :  { %1093 = vrot.lane.b32.xlu1 %v6575_v13, %s6429_s25 }
 0x416   :  { %1141 = vrot.lane.b32.xlu1 %v6581_v19, %s6429_s25 }
 0x41f   :  { %1045 = vrot.lane.b32.xlu0 %v6585_v21, %s6429_s25 }
 0x43a   :  { %541 = vadd.xlane.f32.xlu1 %v540_v45 }
 0x43e   :  { %544 = vadd.xlane.f32.xlu1 %v543_v47  ;;  %538 = vadd.xlane.f32.xlu0 %v537_v49 }
 0x442   :  { %547 = vadd.xlane.f32.xlu0 %v546_v50 }
 0x44f   :  { %1319 = vrot.lane.b32.xlu1 %v6577_v16, %s6430_s26 }
 0x486   :  { %v959_v51 = vpop.xlane.xlu0 %958 }
 0x487   :  { %v969_v52 = vsub.f32 %v802_v14, %v959_v51  ;;  %v756_v14 = vld [vmem:[#allocation8] sm:$0xf] }
 0x488   :  { %v1266_v25 = vsel %vm558_vm3, %v756_v14, 0 }
 0x489   :  { %v973_v36 = vmul.f32 1.442695, %v969_v52 }
 0x48a   :  { %v962_v53 = vpop.xlane.xlu1 %961 }
 0x48b   :  { %6019 = vpow2.f32 %v973_v36  ;;  %v970_v54 = vsub.f32 %v852_v23, %v962_v53 }
 0x48d   :  { %v975_v41 = vmul.f32 1.442695, %v970_v54 }
 0x48e   :  { %v965_v56 = vpop.xlane.xlu0 %964  ;;  %v1094_v61 = vpop.permute.xlu1 %1093 }
 0x48f   :  { %6021 = vpow2.f32 %v975_v41  ;;  %v971_v32 = vsub.f32 %v902_v29, %v965_v56  ;;  %v1099_v6 = vsel %vm558_vm3, %v1094_v61, 0 }
 0x491   :  { %v977_v57 = vmul.f32 1.442695, %v971_v32 }
 0x492   :  { %v968_v58 = vpop.xlane.xlu0 %967  ;;  %v1142_v10 = vpop.permute.xlu1 %1141 }
 0x493   :  { %6023 = vpow2.f32 %v977_v57  ;;  %v972_v60 = vsub.f32 %v952_v37, %v968_v58  ;;  %v1147_v15 = vsel %vm558_vm3, %v1142_v10, 0 }
 0x495   :  { %v979_v46 = vmul.f32 1.442695, %v972_v60 }
 0x496   :  { %v1046_v0 = vpop.permute.xlu0 %1045 }
 0x497   :  { %6025 = vpow2.f32 %v979_v46  ;;  %v1051_v1 = vsel %vm558_vm3, %v1046_v0, 0 }
 0x498   :  { %v6020_v2 = vpop.eup %6019  ;;  %5560 = vmatpush3.bf16.msra.mxu0 %v1051_v1 }
 0x499   :  { %v981_v4 = vsel %vm319_vm2, %v6020_v2, 0.0  ;;  %v993_v5 = vpack.c.bf16 %v6020_v2, %v6020_v2  ;;  %5571 = vmatprep.subr.bf16.mxu0 %v6423_v8 }
 0x49a   :  { %982 = vadd.xlane.f32.xlu0 %v981_v4 }
 0x49b   :  { %5556 = vmatmul.mubr.msk.bf16.vlgmr.msra.gmra.mxu1 %vm319_vm2, %v993_v5 }
 0x49c   :  { %v6022_v9 = vpop.eup %6021  ;;  %5566 = vmatpush3.bf16.msra.mxu1 %v1099_v6  ;;  %5567 = vmatprep.mubr.msk.bf16.mxu1 %vm6424_vm1, %v6423_v8 }
 0x49d   :  { %v984_v11 = vsel %vm319_vm2, %v6022_v9, 0.0  ;;  %v994_v12 = vpack.c.bf16 %v6022_v9, %v6022_v9  ;;  %5961 = vmatprep.subr.msk.bf16.mxu1 %vm558_vm3, %v1200_v43 }
 0x49e   :  { %985 = vadd.xlane.f32.xlu0 %v984_v11 }
 0x49f   :  { %5562 = vmatmul.mubr.msk.bf16.vlgmr.msra.gmra.mxu0 %vm319_vm2, %v994_v12 }
 0x4a0   :  { %v6024_v17 = vpop.eup %6023  ;;  %5572 = vmatpush3.bf16.msra.mxu0 %v1147_v15  ;;  %5573 = vmatprep.mubr.msk.bf16.mxu0 %vm6424_vm1, %v6423_v8 }
 0x4a1   :  { %v987_v18 = vsel %vm319_vm2, %v6024_v17, 0.0  ;;  %v995_v20 = vpack.c.bf16 %v6024_v17, %v6024_v17  ;;  %5962 = vmatprep.subr.msk.bf16.mxu0 %vm558_vm3, %v756_v14 }
 0x4a2   :  { %988 = vadd.xlane.f32.xlu1 %v987_v18 }
 0x4a3   :  { %5568 = vmatmul.mubr.msk.bf16.vlgmr.msra.gmra.mxu1 %vm319_vm2, %v995_v20 }
 0x4a4   :  { %v6026_v22 = vpop.eup %6025 }
 0x4a5   :  { %v990_v23 = vsel %vm319_vm2, %v6026_v22, 0.0  ;;  %v996_v24 = vpack.c.bf16 %v6026_v22, %v6026_v22 }
 0x4a6   :  { %991 = vadd.xlane.f32.xlu0 %v990_v23 }
 0x4a7   :  { %5574 = vmatmul.mubr.msk.bf16.vlgmr.msra.gmra.mxu0 %vm319_vm2, %v996_v24 }
 0x4a8   :  { %5584 = vmatpush3.bf16.msra.mxu0 %v1266_v25 }
 0x4a9   :  { %5595 = vmatprep.subr.bf16.mxu0 %v6423_v8 }
 0x4b3   :  { %1317 = vrot.lane.b32.xlu1 %v6577_v16, %s6431_s4 }
 0x4b7   :  { %1367 = vrot.lane.b32.xlu1 %v6585_v21, %s6431_s4 }
 0x4bb   :  { %1469 = vrot.lane.b32.xlu1 %v6581_v19, %s6430_s26 }
 0x4bc   :  { %1369 = vrot.lane.b32.xlu0 %v6585_v21, %s6430_s26 }
 0x4bf   :  { %1467 = vrot.lane.b32.xlu1 %v6581_v19, %s6431_s4 }
 0x4c0   :  { %1419 = vrot.lane.b32.xlu0 %v6575_v13, %s6430_s26 }
 0x4c3   :  { %v542_v26 = vpop.xlane.xlu1 %541  ;;  %1557 = vrot.lane.b32.xlu1 %v6577_v16, %s6432_s27 }
 0x4c4   :  { %1417 = vrot.lane.b32.xlu0 %v6575_v13, %s6431_s4  ;;  %6027 = vrcp.f32 %v542_v26 }
 0x4c7   :  { %v545_v27 = vpop.xlane.xlu1 %544  ;;  %v539_v28 = vpop.xlane.xlu0 %538 }
 0x4c8   :  { %6029 = vrcp.f32 %v539_v28 }
 0x4c9   :  { %6031 = vrcp.f32 %v545_v27 }
 0x4cb   :  { %v548_v29 = vpop.xlane.xlu0 %547 }
 0x4cc   :  { %6033 = vrcp.f32 %v548_v29 }
 0x4d1   :  { %v6028_v30 = vpop.eup %6027 }
 0x4d2   :  { %v749_v35 = vmul.f32 %v6028_v30, %v6718_v62 }
 0x4d5   :  { %v6030_v31 = vpop.eup %6029 }
 0x4d6   :  { %v6032_v33 = vpop.eup %6031  ;;  %v747_v34 = vmul.f32 %v6030_v31, %v6716_v59  ;;  %v1208_v59 = vsel %vm558_vm3, %v1200_v43, 0 }
 0x4d7   :  { %v751_v39 = vmul.f32 %v6032_v33, %v6720_v3  ;;  %5578 = vmatpush3.bf16.msra.mxu1 %v1208_v59  ;;  %v1320_v3 = vpop.permute.xlu1 %1319 }
 0x4d8   :  { %v754_v38 = vpack.c.bf16 %v749_v35, %v747_v34  ;;  %5589 = vmatprep.subr.bf16.mxu1 %v6423_v8  ;;  %v1325_v24 = vsel %vm319_vm2, %v1320_v3, 0 }
 0x4d9   :  { %v6034_v37 = vpop.eup %6033 }
 0x4da   :  { %v753_v40 = vmul.f32 %v6034_v37, %v6722_v7  ;;  %5585 = vmatprep.mubr.msk.bf16.mxu0 %vm319_vm2, %v754_v38 }
 0x4dc   :  { %v755_v42 = vpack.c.bf16 %v753_v40, %v751_v39 }
 0x4de   :  { %5586 = vmatmul.mubr.msk.bf16.vlgmr.msra.gmra.mxu0 %vm319_vm2, %v755_v42 }
 0x4df   :  { %5597 = vmatprep.mubr.msk.bf16.mxu0 %vm6424_vm1, %v6423_v8 }
 0x523   :  { %v983_v62 = vpop.xlane.xlu0 %982 }
 0x524   :  { %6035 = vrcp.f32 %v983_v62 }
 0x527   :  { %v986_v45 = vpop.xlane.xlu0 %985 }
 0x528   :  { %6037 = vrcp.f32 %v986_v45 }
 0x52b   :  { %v989_v7 = vpop.xlane.xlu1 %988 }
 0x52c   :  { %6039 = vrcp.f32 %v989_v7 }
 0x52f   :  { %v1318_v47 = vpop.permute.xlu1 %1317  ;;  %v992_v49 = vpop.xlane.xlu0 %991 }
 0x530   :  { %6041 = vrcp.f32 %v992_v49 }
 0x531   :  { %v6036_v32 = vpop.eup %6035 }
 0x533   :  { %v1368_v50 = vpop.permute.xlu1 %1367  ;;  %v1370_v51 = vpop.permute.xlu0 %1369 }
 0x534   :  { %v1375_v52 = vsel %vm319_vm2, %v1370_v51, 0 }
 0x535   :  { %5596 = vmatpush3.bf16.xpose.msra.mxu0 %v1375_v52  ;;  %v6038_v57 = vpop.eup %6037 }
 0x536   :  { %5607 = vmatprep.subr.bf16.mxu0 %v6423_v8 }
 0x537   :  { %v1470_v36 = vpop.permute.xlu1 %1469  ;;  %v1420_v26 = vpop.permute.xlu0 %1419 }
 0x538   :  { %v1475_v53 = vsel %vm319_vm2, %v1470_v36, 0  ;;  %v1425_v27 = vsel %vm319_vm2, %v1420_v26, 0 }
 0x539   :  { %v6040_v10 = vpop.eup %6039 }
 0x53b   :  { %v1468_v54 = vpop.permute.xlu1 %1467  ;;  %v1418_v29 = vpop.permute.xlu0 %1417 }
 0x53c   :  { %5598 = vmatmul.mubr.msk.bf16.vlgmr.msra.gmra.mxu0 %vm319_vm2, %v1368_v50 }
 0x53d   :  { %5608 = vmatpush3.bf16.xpose.msra.mxu0 %v1475_v53  ;;  %5609 = vmatprep.mubr.msk.bf16.mxu0 %vm6424_vm1, %v6423_v8  ;;  %v6042_v11 = vpop.eup %6041 }
 0x53e   :  { %5619 = vmatprep.subr.bf16.mxu0 %v6423_v8 }
 0x53f   :  { %v1558_v28 = vpop.permute.xlu1 %1557 }
 0x540   :  { %v1563_v30 = vsel %vm558_vm3, %v1558_v28, 0 }
 0x544   :  { %5610 = vmatmul.mubr.msk.bf16.vlgmr.msra.gmra.mxu0 %vm319_vm2, %v1468_v54 }
 0x545   :  { %5621 = vmatprep.mubr.msk.bf16.mxu0 %vm6424_vm1, %v6423_v8 }
 0x55b   :  { %v1039_v41 = vpop.f32.mrf.mxu1 }
 0x55c   :  { %v1190_v46 = vmul.f32 %v6036_v32, %v1039_v41 }
 0x55d   :  { %v5557_v56 = vpop.f32.mrf.mxu1 }
 0x55f   :  { %v1042_v58 = vpop.f32.mrf.mxu1  ;;  %v1087_v60 = vpop.f32.mrf.mxu0 }
 0x560   :  { %v1192_v61 = vmul.f32 %v6038_v57, %v1087_v60 }
 0x561   :  { %v5558_v0 = vpop.f32.mrf.mxu1  ;;  %v5563_v1 = vpop.f32.mrf.mxu0 }
 0x562   :  { %v1197_v2 = vpack.c.bf16 %v1192_v61, %v1190_v46 }
 0x563   :  { %v1090_v4 = vpop.f32.mrf.mxu0  ;;  %v1135_v5 = vpop.f32.mrf.mxu1 }
 0x564   :  { %5579 = vmatprep.mubr.msk.bf16.mxu1 %vm319_vm2, %v1197_v2  ;;  %v1194_v15 = vmul.f32 %v6040_v10, %v1135_v5 }
 0x565   :  { %v5564_v6 = vpop.f32.mrf.mxu0  ;;  %v5569_v9 = vpop.f32.mrf.mxu1 }
 0x567   :  { %v1138_v12 = vpop.f32.mrf.mxu1  ;;  %v1183_v14 = vpop.f32.mrf.mxu0 }
 0x568   :  { %v1196_v17 = vmul.f32 %v6042_v11, %v1183_v14 }
 0x569   :  { %v5570_v18 = vpop.f32.mrf.mxu1  ;;  %v5575_v20 = vpop.f32.mrf.mxu0 }
 0x56a   :  { %v1198_v22 = vpack.c.bf16 %v1196_v17, %v1194_v15 }
 0x56b   :  { %v1186_v23 = vpop.f32.mrf.mxu0 }
 0x56c   :  { %5580 = vmatmul.mubr.msk.bf16.vlgmr.msra.gmra.mxu1 %vm319_vm2, %v1198_v22 }
 0x56d   :  { %5590 = vmatpush3.bf16.xpose.msra.mxu1 %v1325_v24  ;;  %v5576_v25 = vpop.f32.mrf.mxu0  ;;  %5591 = vmatprep.mubr.msk.bf16.mxu1 %vm6424_vm1, %v6423_v8 }
 0x56e   :  { %5601 = vmatprep.subr.bf16.mxu1 %v6423_v8 }
 0x574   :  { %5592 = vmatmul.mubr.msk.bf16.vlgmr.msra.gmra.mxu1 %vm319_vm2, %v1318_v47 }
 0x575   :  { %5602 = vmatpush3.bf16.xpose.msra.mxu1 %v1425_v27  ;;  %5603 = vmatprep.mubr.msk.bf16.mxu1 %vm6424_vm1, %v6423_v8 }
 0x576   :  { %5613 = vmatprep.subr.bf16.mxu1 %v6423_v8 }
 0x57c   :  { %5604 = vmatmul.mubr.msk.bf16.vlgmr.msra.gmra.mxu1 %vm319_vm2, %v1418_v29 }
 0x57d   :  { %5614 = vmatpush3.bf16.msra.mxu1 %v1563_v30  ;;  %5615 = vmatprep.mubr.msk.bf16.mxu1 %vm6424_vm1, %v6423_v8 }
 0x57e   :  { %5625 = vmatprep.subr.bf16.mxu1 %v6423_v8 }
 0x59e   :  { %v6820_v31 = vpop.f32.mrf.mxu0 }
 0x5a0   :  { %v6822_v33 = vpop.f32.mrf.mxu0 }
 0x5a2   :  { %v6824_v34 = vpop.f32.mrf.mxu0 }
 0x5a4   :  { %v6826_v35 = vpop.f32.mrf.mxu0 }
 0x5fc   :  { %v1411_v37 = vpop.f32.mrf.mxu0 }
 0x5fd   :  { %v1412_v38 = vadd.f32 %v1411_v37, %v6623_v48 }
 0x5fe   :  { %v5599_v39 = vpop.f32.mrf.mxu0 }
 0x5ff   :  { %v1520_v40 = vsel %vm319_vm2, %v1412_v38, -inf }
 0x600   :  { %1521 = vmax.xlane.f32.xlu1 %v1520_v40  ;;  %v1414_v42 = vpop.f32.mrf.mxu0 }
 0x602   :  { %v5600_v43 = vpop.f32.mrf.mxu0 }
 0x604   :  { %v1511_v59 = vpop.f32.mrf.mxu0 }
 0x605   :  { %v1512_v62 = vadd.f32 %v1511_v59, %v6631_v63  ;;  %v1760_v59 = vld [vmem:[#allocation8 + $0x8] sm:$0xf] }
 0x606   :  { %v5611_v3 = vpop.f32.mrf.mxu0 }
 0x607   :  { %v1526_v45 = vsel %vm319_vm2, %v1512_v62, -inf }
 0x608   :  { %1527 = vmax.xlane.f32.xlu0 %v1526_v45  ;;  %v1514_v7 = vpop.f32.mrf.mxu0 }
 0x60a   :  { %v5612_v47 = vpop.f32.mrf.mxu0 }
 0x611   :  { %1653 = vrot.lane.b32.xlu1 %v6575_v13, %s6432_s27 }
 0x615   :  { %1701 = vrot.lane.b32.xlu1 %v6581_v19, %s6432_s27 }
 0x62c   :  { %v6836_v49 = vpop.f32.mrf.mxu1 }
 0x62e   :  { %v6838_v50 = vpop.f32.mrf.mxu1 }
 0x630   :  { %v6840_v51 = vpop.f32.mrf.mxu1 }
 0x632   :  { %v6842_v52 = vpop.f32.mrf.mxu1 }
 0x634   :  { %v1361_v36 = vpop.f32.mrf.mxu1 }
 0x635   :  { %v1362_v53 = vadd.f32 %v1361_v36, %v6620_v44 }
 0x636   :  { %v5593_v54 = vpop.f32.mrf.mxu1 }
 0x637   :  { %v1517_v41 = vsel %vm319_vm2, %v1362_v53, -inf }
 0x638   :  { %v1364_v56 = vpop.f32.mrf.mxu1  ;;  %1518 = vmax.xlane.f32.xlu0 %v1517_v41 }
 0x63a   :  { %v5594_v32 = vpop.f32.mrf.mxu1 }
 0x63c   :  { %v1461_v57 = vpop.f32.mrf.mxu1 }
 0x63d   :  { %v1462_v58 = vadd.f32 %v1461_v57, %v6627_v55 }
 0x63e   :  { %v5605_v60 = vpop.f32.mrf.mxu1 }
 0x63f   :  { %v1523_v46 = vsel %vm319_vm2, %v1462_v58, -inf }
 0x640   :  { %1524 = vmax.xlane.f32.xlu0 %v1523_v46  ;;  %v1464_v61 = vpop.f32.mrf.mxu1 }
 0x642   :  { %v5606_v0 = vpop.f32.mrf.mxu1 }
 0x656   :  { %1605 = vrot.lane.b32.xlu0 %v6585_v21, %s6432_s27 }
 0x689   :  { %v1522_v1 = vpop.xlane.xlu1 %1521 }
 0x68a   :  { %v1530_v2 = vsub.f32 %v1412_v38, %v1522_v1 }
 0x68c   :  { %v1535_v4 = vmul.f32 1.442695, %v1530_v2 }
 0x68d   :  { %v1654_v20 = vpop.permute.xlu1 %1653 }
 0x68e   :  { %6043 = vpow2.f32 %v1535_v4  ;;  %v1659_v38 = vsel %vm558_vm3, %v1654_v20, 0 }
 0x691   :  { %v1528_v5 = vpop.xlane.xlu0 %1527  ;;  %v1702_v27 = vpop.permute.xlu1 %1701 }
 0x692   :  { %v1532_v6 = vsub.f32 %v1512_v62, %v1528_v5  ;;  %v1707_v29 = vsel %vm558_vm3, %v1702_v27, 0  ;;  %v1768_v62 = vsel %vm558_vm3, %v1760_v59, 0 }
 0x694   :  { %v1539_v9 = vmul.f32 1.442695, %v1532_v6 }
 0x696   :  { %6045 = vpow2.f32 %v1539_v9 }
 0x69b   :  { %v6044_v10 = vpop.eup %6043 }
 0x69c   :  { %v1544_v11 = vsel %vm319_vm2, %v6044_v10, 0.0  ;;  %v1554_v28 = vpack.c.bf16 %v6044_v10, %v6044_v10 }
 0x69d   :  { %1545 = vadd.xlane.f32.xlu1 %v1544_v11 }
 0x6a3   :  { %v6046_v12 = vpop.eup %6045 }
 0x6a4   :  { %v1550_v14 = vsel %vm319_vm2, %v6046_v12, 0.0  ;;  %v1556_v39 = vpack.c.bf16 %v6046_v12, %v6046_v12 }
 0x6a5   :  { %1551 = vadd.xlane.f32.xlu0 %v1550_v14 }
 0x6ae   :  { %1825 = vrot.lane.b32.xlu1 %v6577_v16, %s6433_s28 }
 0x6b2   :  { %1823 = vrot.lane.b32.xlu1 %v6577_v16, %s6434_s9 }
 0x6b6   :  { %1873 = vrot.lane.b32.xlu1 %v6585_v21, %s6434_s9 }
 0x6ba   :  { %1975 = vrot.lane.b32.xlu1 %v6581_v19, %s6433_s28 }
 0x6be   :  { %1973 = vrot.lane.b32.xlu1 %v6581_v19, %s6434_s9 }
 0x6c1   :  { %v1519_v15 = vpop.xlane.xlu0 %1518 }
 0x6c2   :  { %v1529_v17 = vsub.f32 %v1362_v53, %v1519_v15  ;;  %2063 = vrot.lane.b32.xlu1 %v6577_v16, %s6435_s29 }
 0x6c4   :  { %v1533_v18 = vmul.f32 1.442695, %v1529_v17 }
 0x6c6   :  { %6047 = vpow2.f32 %v1533_v18 }
 0x6c9   :  { %v1525_v22 = vpop.xlane.xlu0 %1524 }
 0x6ca   :  { %v1531_v23 = vsub.f32 %v1462_v58, %v1525_v22 }
 0x6cc   :  { %v1537_v24 = vmul.f32 1.442695, %v1531_v23 }
 0x6cd   :  { %v1606_v25 = vpop.permute.xlu0 %1605 }
 0x6ce   :  { %6049 = vpow2.f32 %v1537_v24  ;;  %v1611_v26 = vsel %vm558_vm3, %v1606_v25, 0 }
 0x6cf   :  { %5620 = vmatpush3.bf16.msra.mxu0 %v1611_v26 }
 0x6d0   :  { %5631 = vmatprep.subr.bf16.mxu0 %v6423_v8 }
 0x6d2   :  { %5622 = vmatmul.mubr.msk.bf16.vlgmr.msra.gmra.mxu0 %vm319_vm2, %v1554_v28 }
 0x6d3   :  { %v6048_v16 = vpop.eup %6047  ;;  %5632 = vmatpush3.bf16.msra.mxu0 %v1707_v29  ;;  %5633 = vmatprep.mubr.msk.bf16.mxu0 %vm6424_vm1, %v6423_v8 }
 0x6d4   :  { %v1541_v30 = vsel %vm319_vm2, %v6048_v16, 0.0  ;;  %v1553_v37 = vpack.c.bf16 %v6048_v16, %v6048_v16  ;;  %5643 = vmatprep.subr.bf16.mxu0 %v6423_v8 }
 0x6d5   :  { %1542 = vadd.xlane.f32.xlu0 %v1541_v30 }
 0x6d6   :  { %5616 = vmatmul.mubr.msk.bf16.vlgmr.msra.gmra.mxu1 %vm319_vm2, %v1553_v37 }
 0x6d7   :  { %5626 = vmatpush3.bf16.msra.mxu1 %v1659_v38  ;;  %5627 = vmatprep.mubr.msk.bf16.mxu1 %vm6424_vm1, %v6423_v8 }
 0x6d8   :  { %5963 = vmatprep.subr.msk.bf16.mxu1 %vm558_vm3, %v1760_v59 }
 0x6da   :  { %5634 = vmatmul.mubr.msk.bf16.vlgmr.msra.gmra.mxu0 %vm319_vm2, %v1556_v39 }
 0x6db   :  { %v6050_v40 = vpop.eup %6049  ;;  %5645 = vmatprep.mubr.msk.bf16.mxu0 %vm6424_vm1, %v6423_v8 }
 0x6dc   :  { %v1547_v42 = vsel %vm319_vm2, %v6050_v40, 0.0  ;;  %v1555_v43 = vpack.c.bf16 %v6050_v40, %v6050_v40 }
 0x6dd   :  { %1548 = vadd.xlane.f32.xlu0 %v1547_v42 }
 0x6de   :  { %5628 = vmatmul.mubr.msk.bf16.vlgmr.msra.gmra.mxu1 %vm319_vm2, %v1555_v43 }
 0x6df   :  { %5638 = vmatpush3.bf16.msra.mxu1 %v1768_v62 }
 0x6e0   :  { %5649 = vmatprep.subr.bf16.mxu1 %v6423_v8 }
 0x6f3   :  { %1875 = vrot.lane.b32.xlu0 %v6585_v21, %s6433_s28 }
 0x6f7   :  { %1925 = vrot.lane.b32.xlu0 %v6575_v13, %s6433_s28 }
 0x6fb   :  { %1923 = vrot.lane.b32.xlu0 %v6575_v13, %s6434_s9 }
 0x726   :  { %v1546_v3 = vpop.xlane.xlu1 %1545 }
 0x727   :  { %6051 = vrcp.f32 %v1546_v3 }
 0x72a   :  { %v1826_v45 = vpop.permute.xlu1 %1825 }
 0x72b   :  { %v1831_v7 = vsel %vm319_vm2, %v1826_v45, 0 }
 0x72c   :  { %5644 = vmatpush3.bf16.xpose.msra.mxu0 %v1831_v7 }
 0x72d   :  { %5655 = vmatprep.subr.bf16.mxu0 %v6423_v8 }
 0x72e   :  { %v1824_v47 = vpop.permute.xlu1 %1823  ;;  %v1552_v36 = vpop.xlane.xlu0 %1551 }
 0x732   :  { %v1874_v53 = vpop.permute.xlu1 %1873 }
 0x733   :  { %5646 = vmatmul.mubr.msk.bf16.vlgmr.msra.gmra.mxu0 %vm319_vm2, %v1824_v47 }
 0x734   :  { %5657 = vmatprep.mubr.msk.bf16.mxu0 %vm6424_vm1, %v6423_v8  ;;  %v6052_v4 = vpop.eup %6051 }
 0x736   :  { %v1976_v56 = vpop.permute.xlu1 %1975 }
 0x737   :  { %v1981_v40 = vsel %vm319_vm2, %v1976_v56, 0  ;;  %v1311_v56 = vadd.f32 %v6820_v31, %v6836_v49 }
 0x73a   :  { %v1974_v57 = vpop.permute.xlu1 %1973 }
 0x73e   :  { %v2064_v46 = vpop.permute.xlu1 %2063 }
 0x73f   :  { %v2069_v0 = vsel %vm558_vm3, %v2064_v46, 0  ;;  %v1314_v46 = vadd.f32 %v6824_v34, %v6840_v51 }
 0x75e   :  { %v1543_v54 = vpop.xlane.xlu0 %1542 }
 0x75f   :  { %6053 = vrcp.f32 %v1543_v54 }
 0x760   :  { %6055 = vrcp.f32 %v1552_v36 }
 0x766   :  { %v1549_v41 = vpop.xlane.xlu0 %1548 }
 0x767   :  { %6057 = vrcp.f32 %v1549_v41 }
 0x76a   :  { %v1876_v32 = vpop.permute.xlu0 %1875 }
 0x76b   :  { %v1881_v38 = vsel %vm319_vm2, %v1876_v32, 0 }
 0x76c   :  { %v6054_v5 = vpop.eup %6053 }
 0x76d   :  { %v6056_v23 = vpop.eup %6055 }
 0x76e   :  { %v1926_v58 = vpop.permute.xlu0 %1925 }
 0x76f   :  { %v1931_v60 = vsel %vm319_vm2, %v1926_v58, 0 }
 0x770   :  { %5656 = vmatpush3.bf16.xpose.msra.mxu0 %v1931_v60 }
 0x771   :  { %5667 = vmatprep.subr.bf16.mxu0 %v6423_v8 }
 0x772   :  { %v1924_v61 = vpop.permute.xlu0 %1923 }
 0x774   :  { %v6058_v24 = vpop.eup %6057 }
 0x777   :  { %5658 = vmatmul.mubr.msk.bf16.vlgmr.msra.gmra.mxu0 %vm319_vm2, %v1924_v61 }
 0x778   :  { %5668 = vmatpush3.bf16.msra.mxu0 %v2069_v0  ;;  %5669 = vmatprep.mubr.msk.bf16.mxu0 %vm6424_vm1, %v6423_v8 }
 0x779   :  { %5679 = vmatprep.subr.bf16.mxu0 %v6423_v8 }
 0x792   :  { %v1647_v1 = vpop.f32.mrf.mxu0 }
 0x793   :  { %v1752_v10 = vmul.f32 %v6052_v4, %v1647_v1 }
 0x794   :  { %v5623_v2 = vpop.f32.mrf.mxu0 }
 0x796   :  { %v1599_v6 = vpop.f32.mrf.mxu1  ;;  %v1650_v9 = vpop.f32.mrf.mxu0 }
 0x797   :  { %v1750_v11 = vmul.f32 %v6054_v5, %v1599_v6 }
 0x798   :  { %v5617_v12 = vpop.f32.mrf.mxu1  ;;  %v5624_v14 = vpop.f32.mrf.mxu0 }
 0x799   :  { %v1757_v15 = vpack.c.bf16 %v1752_v10, %v1750_v11 }
 0x79a   :  { %v1602_v17 = vpop.f32.mrf.mxu1  ;;  %v1743_v18 = vpop.f32.mrf.mxu0 }
 0x79b   :  { %5639 = vmatprep.mubr.msk.bf16.mxu1 %vm319_vm2, %v1757_v15  ;;  %v1756_v27 = vmul.f32 %v6056_v23, %v1743_v18 }
 0x79c   :  { %v5618_v20 = vpop.f32.mrf.mxu1  ;;  %v5635_v22 = vpop.f32.mrf.mxu0 }
 0x79e   :  { %v1695_v25 = vpop.f32.mrf.mxu1  ;;  %v1746_v26 = vpop.f32.mrf.mxu0 }
 0x79f   :  { %v1754_v28 = vmul.f32 %v6058_v24, %v1695_v25 }
 0x7a0   :  { %v5629_v29 = vpop.f32.mrf.mxu1  ;;  %v5636_v16 = vpop.f32.mrf.mxu0 }
 0x7a1   :  { %v1758_v30 = vpack.c.bf16 %v1756_v27, %v1754_v28 }
 0x7a2   :  { %v1698_v37 = vpop.f32.mrf.mxu1 }
 0x7a3   :  { %5640 = vmatmul.mubr.msk.bf16.vlgmr.msra.gmra.mxu1 %vm319_vm2, %v1758_v30 }
 0x7a4   :  { %5650 = vmatpush3.bf16.xpose.msra.mxu1 %v1881_v38  ;;  %v5630_v39 = vpop.f32.mrf.mxu1  ;;  %5651 = vmatprep.mubr.msk.bf16.mxu1 %vm6424_vm1, %v6423_v8 }
 0x7a5   :  { %5661 = vmatprep.subr.bf16.mxu1 %v6423_v8 }
 0x7ab   :  { %5652 = vmatmul.mubr.msk.bf16.vlgmr.msra.gmra.mxu1 %vm319_vm2, %v1874_v53 }
 0x7ac   :  { %5662 = vmatpush3.bf16.xpose.msra.mxu1 %v1981_v40  ;;  %5663 = vmatprep.mubr.msk.bf16.mxu1 %vm6424_vm1, %v6423_v8 }
 0x7ad   :  { %5673 = vmatprep.subr.bf16.mxu1 %v6423_v8 }
 0x7b3   :  { %5664 = vmatmul.mubr.msk.bf16.vlgmr.msra.gmra.mxu1 %vm319_vm2, %v1974_v57  ;;  %v1303_v57 = vadd.f32 %v6822_v33, %v6838_v50 }
 0x7b4   :  { %5675 = vmatprep.mubr.msk.bf16.mxu1 %vm6424_vm1, %v6423_v8 }
 0x7f3   :  { %v1867_v42 = vpop.f32.mrf.mxu0 }
 0x7f4   :  { %v1868_v43 = vadd.f32 %v1867_v42, %v6620_v44 }
 0x7f5   :  { %v5647_v59 = vpop.f32.mrf.mxu0 }
 0x7f6   :  { %v2023_v62 = vsel %vm319_vm2, %v1868_v43, -inf }
 0x7f7   :  { %2024 = vmax.xlane.f32.xlu0 %v2023_v62  ;;  %v1870_v3 = vpop.f32.mrf.mxu0 }
 0x7f9   :  { %v5648_v45 = vpop.f32.mrf.mxu0 }
 0x837   :  { %v1967_v7 = vpop.f32.mrf.mxu0 }
 0x838   :  { %v1968_v47 = vadd.f32 %v1967_v7, %v6627_v55 }
 0x839   :  { %v5659_v36 = vpop.f32.mrf.mxu0 }
 0x83a   :  { %v2029_v53 = vsel %vm319_vm2, %v1968_v47, -inf }
 0x83b   :  { %2030 = vmax.xlane.f32.xlu0 %v2029_v53  ;;  %v1970_v54 = vpop.f32.mrf.mxu0 }
 0x83d   :  { %v5660_v41 = vpop.f32.mrf.mxu0 }
 0x863   :  { %v5641_v32 = vpop.f32.mrf.mxu1 }
 0x864   :  { %v6924_v58 = vadd.f32 %v5641_v32, %v1311_v56 }
 0x865   :  { %v1804_v60 = vpop.f32.mrf.mxu1 }
 0x866   :  { %v6928_v61 = vadd.f32 %v1804_v60, %v1303_v57 }
 0x867   :  { %v5642_v0 = vpop.f32.mrf.mxu1 }
 0x868   :  { %v6930_v1 = vadd.f32 %v5642_v0, %v1314_v46 }
 0x869   :  { %v6932_v2 = vpop.f32.mrf.mxu1 }
 0x86b   :  { %v1917_v4 = vpop.f32.mrf.mxu1 }
 0x86c   :  { %v1918_v31 = vadd.f32 %v1917_v4, %v6623_v48 }
 0x86d   :  { %v5653_v49 = vpop.f32.mrf.mxu1 }
 0x86e   :  { %v2026_v5 = vsel %vm319_vm2, %v1918_v31, -inf }
 0x86f   :  { %2027 = vmax.xlane.f32.xlu1 %v2026_v5  ;;  %v1920_v33 = vpop.f32.mrf.mxu1 }
 0x871   :  { %v5654_v50 = vpop.f32.mrf.mxu1 }
 0x873   :  { %v2017_v6 = vpop.f32.mrf.mxu1 }
 0x874   :  { %v2018_v9 = vadd.f32 %v2017_v6, %v6631_v63 }
 0x875   :  { %v5665_v34 = vpop.f32.mrf.mxu1 }
 0x876   :  { %v2032_v51 = vsel %vm319_vm2, %v2018_v9, -inf }
 0x877   :  { %v2020_v10 = vpop.f32.mrf.mxu1  ;;  %2033 = vmax.xlane.f32.xlu0 %v2032_v51 }
 0x879   :  { %v5666_v11 = vpop.f32.mrf.mxu1 }
 0x880   :  { %2159 = vrot.lane.b32.xlu1 %v6575_v13, %s6435_s29  ;;  %v2025_v12 = vpop.xlane.xlu0 %2024 }
 0x881   :  { %v2035_v14 = vsub.f32 %v1868_v43, %v2025_v12 }
 0x883   :  { %v2039_v15 = vmul.f32 1.442695, %v2035_v14 }
 0x884   :  { %2207 = vrot.lane.b32.xlu1 %v6581_v19, %s6435_s29 }
 0x885   :  { %6059 = vpow2.f32 %v2039_v15 }
 0x88d   :  { %2111 = vrot.lane.b32.xlu0 %v6585_v21, %s6435_s29 }
 0x892   :  { %v6060_v17 = vpop.eup %6059 }
 0x893   :  { %v2059_v18 = vpack.c.bf16 %v6060_v17, %v6060_v17  ;;  %v2047_v20 = vsel %vm319_vm2, %v6060_v17, 0.0 }
 0x895   :  { %5670 = vmatmul.mubr.msk.bf16.vlgmr.msra.gmra.mxu0 %vm319_vm2, %v2059_v18 }
 0x896   :  { %5681 = vmatprep.mubr.msk.bf16.mxu0 %vm6424_vm1, %v6423_v8 }
 0x8ac   :  { %2048 = vadd.xlane.f32.xlu0 %v2047_v20 }
 0x8c4   :  { %v2031_v13 = vpop.xlane.xlu0 %2030 }
 0x8c5   :  { %v2037_v22 = vsub.f32 %v1968_v47, %v2031_v13  ;;  %v2266_v47 = vld [vmem:[#allocation8 + $0xc] sm:$0xf] }
 0x8c6   :  { %v2274_v36 = vsel %vm558_vm3, %v2266_v47, 0 }
 0x8c7   :  { %v2043_v23 = vmul.f32 1.442695, %v2037_v22 }
 0x8c9   :  { %6061 = vpow2.f32 %v2043_v23 }
 0x8d6   :  { %v6062_v24 = vpop.eup %6061 }
 0x8d7   :  { %v2053_v19 = vsel %vm319_vm2, %v6062_v24, 0.0  ;;  %v2061_v29 = vpack.c.bf16 %v6062_v24, %v6062_v24 }
 0x8d8   :  { %2054 = vadd.xlane.f32.xlu0 %v2053_v19 }
 0x8f8   :  { %v2028_v25 = vpop.xlane.xlu1 %2027 }
 0x8f9   :  { %v2036_v21 = vsub.f32 %v1918_v31, %v2028_v25  ;;  %v5215_v25 = vld [vmem:[%s7460_s5] ss:$0 sm:$0xff] }
 0x8fb   :  { %v2041_v26 = vmul.f32 1.442695, %v2036_v21 }
 0x8fc   :  { %v2160_v27 = vpop.permute.xlu1 %2159 }
 0x8fd   :  { %6063 = vpow2.f32 %v2041_v26  ;;  %v2165_v28 = vsel %vm558_vm3, %v2160_v27, 0  ;;  %v1306_v26 = vadd.f32 %v6826_v35, %v6842_v52  ;;  %v6173_v35 = vld [vmem:[#allocation2 + $0x8] sm:$0xff] }
 0x8fe   :  { %5680 = vmatpush3.bf16.msra.mxu0 %v2165_v28 }
 0x8ff   :  { %5964 = vmatprep.subr.msk.bf16.mxu0 %vm558_vm3, %v2266_v47 }
 0x900   :  { %v2034_v16 = vpop.xlane.xlu0 %2033  ;;  %v2208_v42 = vpop.permute.xlu1 %2207 }
 0x901   :  { %v2038_v30 = vsub.f32 %v2018_v9, %v2034_v16  ;;  %5682 = vmatmul.mubr.msk.bf16.vlgmr.msra.gmra.mxu0 %vm319_vm2, %v2061_v29  ;;  %v2213_v62 = vsel %vm558_vm3, %v2208_v42, 0  ;;  %v1820_v29 = vadd.f32 %v6932_v2, %v1306_v26  ;;  %v5216_v26 = vld [vmem:[%s7461_s6] ss:$0 sm:$0xff] }
 0x902   :  { %5692 = vmatpush3.bf16.msra.mxu0 %v2274_v36 }
 0x903   :  { %v2045_v37 = vmul.f32 1.442695, %v2038_v30 }
 0x904   :  { %v2112_v38 = vpop.permute.xlu0 %2111 }
 0x905   :  { %6065 = vpow2.f32 %v2045_v37  ;;  %v2117_v39 = vsel %vm558_vm3, %v2112_v38, 0 }
 0x906   :  { %5674 = vmatpush3.bf16.msra.mxu1 %v2117_v39 }
 0x907   :  { %5685 = vmatprep.subr.bf16.mxu1 %v6423_v8 }
 0x90a   :  { %v6064_v40 = vpop.eup %6063 }
 0x90b   :  { %v2050_v43 = vsel %vm319_vm2, %v6064_v40, 0.0  ;;  %v2060_v59 = vpack.c.bf16 %v6064_v40, %v6064_v40 }
 0x90c   :  { %2051 = vadd.xlane.f32.xlu1 %v2050_v43 }
 0x90d   :  { %5676 = vmatmul.mubr.msk.bf16.vlgmr.msra.gmra.mxu1 %vm319_vm2, %v2060_v59 }
 0x90e   :  { %5686 = vmatpush3.bf16.msra.mxu1 %v2213_v62  ;;  %5687 = vmatprep.mubr.msk.bf16.mxu1 %vm6424_vm1, %v6423_v8  ;;  %v6172_v62 = vld [vmem:[#allocation2 + $0x10] sm:$0xff] }
 0x912   :  { %v6066_v3 = vpop.eup %6065 }
 0x913   :  { %v2056_v45 = vsel %vm319_vm2, %v6066_v3, 0.0  ;;  %v2062_v7 = vpack.c.bf16 %v6066_v3, %v6066_v3 }
 0x914   :  { %2057 = vadd.xlane.f32.xlu0 %v2056_v45  ;;  %v6174_v45 = vld [vmem:[#allocation2 + $0x18] sm:$0xff] }
 0x915   :  { %5688 = vmatmul.mubr.msk.bf16.vlgmr.msra.gmra.mxu1 %vm319_vm2, %v2062_v7 }
 0x935   :  { %v2049_v32 = vpop.xlane.xlu0 %2048 }
 0x936   :  { %6067 = vrcp.f32 %v2049_v32 }
 0x943   :  { %v6068_v5 = vpop.eup %6067 }
 0x955   :  { %v2105_v53 = vpop.f32.mrf.mxu0 }
 0x956   :  { %v2256_v6 = vmul.f32 %v6068_v5, %v2105_v53 }
 0x957   :  { %v5671_v54 = vpop.f32.mrf.mxu0 }
 0x959   :  { %v2108_v41 = vpop.f32.mrf.mxu0 }
 0x95b   :  { %v5672_v56 = vpop.f32.mrf.mxu0 }
 0x961   :  { %v2055_v60 = vpop.xlane.xlu0 %2054 }
 0x995   :  { %v2052_v57 = vpop.xlane.xlu1 %2051 }
 0x996   :  { %6069 = vrcp.f32 %v2052_v57 }
 0x997   :  { %6071 = vrcp.f32 %v2055_v60 }
 0x99d   :  { %v2058_v4 = vpop.xlane.xlu0 %2057 }
 0x99e   :  { %6073 = vrcp.f32 %v2058_v4 }
 0x9a3   :  { %v6070_v33 = vpop.eup %6069 }
 0x9a4   :  { %v6072_v12 = vpop.eup %6071 }
 0x9ab   :  { %v6074_v14 = vpop.eup %6073 }
 0x9c1   :  { %v2201_v46 = vpop.f32.mrf.mxu0 }
 0x9c2   :  { %v2260_v17 = vmul.f32 %v6072_v12, %v2201_v46 }
 0x9c3   :  { %v5683_v0 = vpop.f32.mrf.mxu0 }
 0x9c5   :  { %v2204_v31 = vpop.f32.mrf.mxu0 }
 0x9c7   :  { %v5684_v49 = vpop.f32.mrf.mxu0 }
 0x9cd   :  { %v2153_v50 = vpop.f32.mrf.mxu1 }
 0x9ce   :  { %v2258_v9 = vmul.f32 %v6070_v33, %v2153_v50 }
 0x9cf   :  { %v5677_v34 = vpop.f32.mrf.mxu1 }
 0x9d0   :  { %v2263_v51 = vpack.c.bf16 %v2258_v9, %v2256_v6 }
 0x9d1   :  { %v2156_v10 = vpop.f32.mrf.mxu1 }
 0x9d2   :  { %5693 = vmatprep.mubr.msk.bf16.mxu0 %vm319_vm2, %v2263_v51  ;;  %v5999_v51 = vld [vmem:[#allocation13 + $0x8] sm:$0xff]   ;;  %v6000_v10 = vld [vmem:[#allocation13] sm:$0xff]  }
 0x9d3   :  { %v5678_v11 = vpop.f32.mrf.mxu1  ;;  %5697 = vmatprep.subr.bf16.mxu1 %v5999_v51 }
 0x9d4   :  { %5698 = vmatpush3.bf16.msra.mxu1 %v5999_v51 }
 0x9d5   :  { %v2249_v15 = vpop.f32.mrf.mxu1  ;;  %5699 = vmatprep.subr.bf16.mxu1 %v6000_v10 }
 0x9d6   :  { %v2262_v18 = vmul.f32 %v6074_v14, %v2249_v15 }
 0x9d7   :  { %v5689_v20 = vpop.f32.mrf.mxu1 }
 0x9d8   :  { %v2264_v13 = vpack.c.bf16 %v2262_v18, %v2260_v17  ;;  %5700 = vmatpush3.bf16.msra.mxu1 %v6000_v10 }
 0x9d9   :  { %v2252_v22 = vpop.f32.mrf.mxu1 }
 0x9da   :  { %5694 = vmatmul.mubr.msk.bf16.vlgmr.msra.gmra.mxu0 %vm319_vm2, %v2264_v13 }
 0x9db   :  { %v5690_v23 = vpop.f32.mrf.mxu1 }
 0xa9a   :  { %v5695_v24 = vpop.f32.mrf.mxu0 }
 0xa9b   :  { %v2327_v19 = vadd.f32 %v5695_v24, %v6924_v58  ;;  %v6171_v58 = vld [vmem:[#allocation2] sm:$0xff] }
 0xa9c   :  { %v2310_v21 = vpop.f32.mrf.mxu0 }
 0xa9d   :  { %v2325_v27 = vadd.f32 %v2310_v21, %v6928_v61  ;;  %v2336_v16 = vadd.f32 %v5215_v25, %v2327_v19 }
 0xa9e   :  { %v5696_v28 = vpop.f32.mrf.mxu0 }
 0xa9f   :  { %v2334_v30 = vadd.f32 %v5215_v25, %v2325_v27  ;;  %v2328_v37 = vadd.f32 %v5696_v28, %v6930_v1  ;;  %v2340_v3 = vadd.f32 %v6172_v62, %v2336_v16 }
 0xaa0   :  { %v2313_v38 = vpop.f32.mrf.mxu0 }
 0xaa1   :  { %v2326_v39 = vadd.f32 %v2313_v38, %v1820_v29  ;;  %v2338_v40 = vadd.f32 %v6171_v58, %v2334_v30  ;;  %v2337_v42 = vadd.f32 %v5215_v25, %v2328_v37  ;;  %v2350_v61 = vsel %vm236_vm0, %v2340_v3, 0.0  ;;  %v5217_v37 = vld [vmem:[%s7462_s7] ss:$0 sm:$0xff] }
 0xaa3   :  { %v2335_v43 = vadd.f32 %v5215_v25, %v2326_v39  ;;  %v2344_v59 = vsel %vm236_vm0, %v2338_v40, 0.0  ;;  %v2341_v7 = vadd.f32 %v6174_v45, %v2337_v42 }
 0xaa4   :  { %2345 = vadd.xlane.f32.xlu1 %v2344_v59 }
 0xaa5   :  { %v2339_v52 = vadd.f32 %v6173_v35, %v2335_v43  ;;  %v2353_v1 = vsel %vm236_vm0, %v2341_v7, 0.0 }
 0xaa7   :  { %v2347_v2 = vsel %vm236_vm0, %v2339_v52, 0.0 }
 0xaa8   :  { %2351 = vadd.xlane.f32.xlu1 %v2350_v61  ;;  %2348 = vadd.xlane.f32.xlu0 %v2347_v2  ;;  %v6001_v61 = vld [vmem:[#allocation16 + $0x8] sm:$0xff]   ;;  %v6002_v2 = vld [vmem:[#allocation16] sm:$0xff]  }
 0xaa9   :  { %5705 = vmatprep.subr.bf16.mxu0 %v6001_v61 }
 0xaaa   :  { %5706 = vmatpush3.bf16.msra.mxu0 %v6001_v61 }
 0xaab   :  { %5707 = vmatprep.subr.bf16.mxu0 %v6002_v2 }
 0xaac   :  { %2354 = vadd.xlane.f32.xlu0 %v2353_v1  ;;  %v5218_v1 = vld [vmem:[#allocation14] ss:$0 sm:$0xff] }
 0xaae   :  { %5708 = vmatpush3.bf16.msra.mxu0 %v6002_v2 }
 0xaaf   :  { %5721 = vmatprep.subr.bf16.mxu0 %v6423_v8 }
 0xb2d   :  { %v2346_v47 = vpop.xlane.xlu1 %2345 }
 0xb2e   :  { %v2357_v36 = vmul.f32 0.03125, %v2346_v47 }
 0xb30   :  { %v2361_v53 = vsub.f32 %v2338_v40, %v2357_v36 }
 0xb31   :  { %v2352_v54 = vpop.xlane.xlu1 %2351  ;;  %v2349_v41 = vpop.xlane.xlu0 %2348 }
 0xb32   :  { %v2359_v56 = vmul.f32 0.03125, %v2352_v54  ;;  %v2358_v32 = vmul.f32 0.03125, %v2349_v41  ;;  %v2365_v57 = vmul.f32 %v2361_v53, %v2361_v53 }
 0xb34   :  { %v2363_v60 = vsub.f32 %v2340_v3, %v2359_v56  ;;  %v2362_v46 = vsub.f32 %v2339_v52, %v2358_v32  ;;  %v2369_v0 = vsel %vm236_vm0, %v2365_v57, 0.0 }
 0xb35   :  { %2370 = vadd.xlane.f32.xlu1 %v2369_v0  ;;  %v2355_v4 = vpop.xlane.xlu0 %2354 }
 0xb36   :  { %v2360_v31 = vmul.f32 0.03125, %v2355_v4  ;;  %v2367_v49 = vmul.f32 %v2363_v60, %v2363_v60  ;;  %v2366_v5 = vmul.f32 %v2362_v46, %v2362_v46 }
 0xb38   :  { %v2364_v33 = vsub.f32 %v2341_v7, %v2360_v31  ;;  %v2375_v50 = vsel %vm236_vm0, %v2367_v49, 0.0  ;;  %v2372_v6 = vsel %vm236_vm0, %v2366_v5, 0.0  ;;  %v5223_v49 = vld [vmem:[#allocation17] ss:$0 sm:$0xff] }
 0xb39   :  { %2376 = vadd.xlane.f32.xlu1 %v2375_v50  ;;  %2373 = vadd.xlane.f32.xlu0 %v2372_v6 }
 0xb3a   :  { %v2368_v9 = vmul.f32 %v2364_v33, %v2364_v33 }
 0xb3c   :  { %v2378_v34 = vsel %vm236_vm0, %v2368_v9, 0.0 }
 0xb3d   :  { %2379 = vadd.xlane.f32.xlu0 %v2378_v34 }
 0xbbe   :  { %v2371_v11 = vpop.xlane.xlu1 %2370 }
 0xbbf   :  { %v2381_v12 = vmul.f32 0.03125, %v2371_v11 }
 0xbc1   :  { %v2385_v14 = vadd.f32 1e-05, %v2381_v12 }
 0xbc2   :  { %v2377_v15 = vpop.xlane.xlu1 %2376  ;;  %v2374_v17 = vpop.xlane.xlu0 %2373 }
 0xbc3   :  { %6075 = vrsqrt.f32 %v2385_v14  ;;  %v2383_v18 = vmul.f32 0.03125, %v2377_v15  ;;  %v2382_v20 = vmul.f32 0.03125, %v2374_v17 }
 0xbc5   :  { %v2387_v13 = vadd.f32 1e-05, %v2383_v18  ;;  %v2386_v22 = vadd.f32 1e-05, %v2382_v20 }
 0xbc6   :  { %v2380_v23 = vpop.xlane.xlu0 %2379 }
 0xbc7   :  { %6077 = vrsqrt.f32 %v2387_v13  ;;  %v2384_v24 = vmul.f32 0.03125, %v2380_v23 }
 0xbc8   :  { %6079 = vrsqrt.f32 %v2386_v22 }
 0xbc9   :  { %v2388_v19 = vadd.f32 1e-05, %v2384_v24 }
 0xbcb   :  { %6081 = vrsqrt.f32 %v2388_v19 }
 0xbd0   :  { %v6076_v25 = vpop.eup %6075 }
 0xbd1   :  { %v2393_v21 = vmul.f32 %v6076_v25, %v2361_v53 }
 0xbd3   :  { %v2401_v30 = vmul.f32 %v5216_v26, %v2393_v21 }
 0xbd4   :  { %v6078_v27 = vpop.eup %6077 }
 0xbd5   :  { %v6080_v28 = vpop.eup %6079  ;;  %v2395_v29 = vmul.f32 %v6078_v27, %v2363_v60  ;;  %v2409_v42 = vadd.f32 %v5217_v37, %v2401_v30 }
 0xbd6   :  { %v2394_v16 = vmul.f32 %v6080_v28, %v2362_v46 }
 0xbd7   :  { %v2403_v40 = vmul.f32 %v5216_v26, %v2395_v29 }
 0xbd8   :  { %v6082_v38 = vpop.eup %6081  ;;  %v2402_v39 = vmul.f32 %v5216_v26, %v2394_v16 }
 0xbd9   :  { %v2396_v58 = vmul.f32 %v6082_v38, %v2364_v33  ;;  %v2411_v3 = vadd.f32 %v5217_v37, %v2403_v40 }
 0xbda   :  { %v2410_v43 = vadd.f32 %v5217_v37, %v2402_v39 }
 0xbdb   :  { %v2404_v59 = vmul.f32 %v5216_v26, %v2396_v58 }
 0xbdc   :  { %v2413_v62 = vpack.c.bf16 %v2410_v43, %v2409_v42 }
 0xbdd   :  { %v2412_v35 = vadd.f32 %v5217_v37, %v2404_v59  ;;  %v6003_v59 = vld [vmem:[#allocation7 + $0x18] sm:$0xff]  }
 0xbde   :  { %5701 = vmatprep.mubr.msk.bf16.mxu1 %vm236_vm0, %v2413_v62  ;;  %v6004_v62 = vld [vmem:[#allocation7 + $0x10] sm:$0xff]   ;;  %5713 = vmatprep.subr.bf16.mxu1 %v6003_v59 }
 0xbdf   :  { %v2414_v52 = vpack.c.bf16 %v2412_v35, %v2411_v3 }
 0xbe1   :  { %5702 = vmatmul.mubr.msk.bf16.vlgmr.msra.gmra.mxu1 %vm236_vm0, %v2414_v52 }
 0xbe2   :  { %5714 = vmatpush3.bf16.msra.mxu1 %v6003_v59 }
 0xbe3   :  { %5715 = vmatprep.subr.bf16.mxu1 %v6004_v62 }
 0xbe6   :  { %5716 = vmatpush3.bf16.msra.mxu1 %v6004_v62 }
 0xbe7   :  { %5727 = vmatprep.subr.bf16.mxu1 %v6423_v8 }
 0xca1   :  { %v5703_v45 = vpop.f32.mrf.mxu1 }
 0xca2   :  { %v2485_v54 = vadd.f32 %v5703_v45, %v5218_v1 }
 0xca3   :  { %v2476_v7 = vpop.f32.mrf.mxu1 }
 0xca4   :  { %v2477_v36 = vadd.f32 %v5218_v1, %v2476_v7  ;;  %v2493_v46 = vmax.f32 %v2485_v54, 0.0 }
 0xca5   :  { %v5704_v47 = vpop.f32.mrf.mxu1 }
 0xca6   :  { %v2488_v53 = vadd.f32 %v5704_v47, %v5218_v1  ;;  %v2491_v57 = vmax.f32 %v2477_v36, 0.0 }
 0xca7   :  { %v2479_v41 = vpop.f32.mrf.mxu1 }
 0xca8   :  { %v2480_v56 = vadd.f32 %v5218_v1, %v2479_v41  ;;  %v2494_v32 = vmax.f32 %v2488_v53, 0.0 }
 0xcaa   :  { %v2492_v60 = vmax.f32 %v2480_v56, 0.0  ;;  %v2496_v4 = vpack.c.bf16 %v2494_v32, %v2493_v46  ;;  %v5228_v32 = vld [vmem:[#allocation10] ss:$0 sm:$0xff] }
 0xcac   :  { %v2495_v0 = vpack.c.bf16 %v2492_v60, %v2491_v57 }
 0xcae   :  { %5709 = vmatprep.mubr.msk.bf16.mxu0 %vm236_vm0, %v2495_v0 }
 0xcaf   :  { %5710 = vmatmul.mubr.msk.bf16.vlgmr.msra.gmra.mxu0 %vm236_vm0, %v2496_v4 }
 0xcb0   :  { %5723 = vmatprep.mubr.msk.bf16.mxu0 %vm6424_vm1, %v6423_v8 }
 0xd6f   :  { %v5711_v31 = vpop.f32.mrf.mxu0 }
 0xd70   :  { %v2567_v33 = vadd.f32 %v5711_v31, %v5223_v49  ;;  %v5229_v31 = vld [vmem:[#allocation11] ss:$0 sm:$0xff] }
 0xd71   :  { %v2558_v5 = vpop.f32.mrf.mxu0 }
 0xd72   :  { %v2559_v50 = vadd.f32 %v5223_v49, %v2558_v5  ;;  %v2575_v12 = vadd.f32 %v2567_v33, %v2411_v3 }
 0xd73   :  { %v5712_v6 = vpop.f32.mrf.mxu0 }
 0xd74   :  { %v2573_v9 = vadd.f32 %v2559_v50, %v2409_v42  ;;  %v2570_v51 = vadd.f32 %v5712_v6, %v5223_v49  ;;  %v2585_v17 = vsel %vm236_vm0, %v2575_v12, 0.0 }
 0xd75   :  { %v2561_v34 = vpop.f32.mrf.mxu0 }
 0xd76   :  { %v2562_v10 = vadd.f32 %v5223_v49, %v2561_v34  ;;  %v2579_v11 = vsel %vm236_vm0, %v2573_v9, 0.0  ;;  %v2576_v18 = vadd.f32 %v2570_v51, %v2412_v35 }
 0xd77   :  { %2580 = vadd.xlane.f32.xlu1 %v2579_v11 }
 0xd78   :  { %v2574_v14 = vadd.f32 %v2562_v10, %v2410_v43  ;;  %v2588_v20 = vsel %vm236_vm0, %v2576_v18, 0.0 }
 0xd7a   :  { %v2582_v15 = vsel %vm236_vm0, %v2574_v14, 0.0 }
 0xd7b   :  { %2583 = vadd.xlane.f32.xlu0 %v2582_v15  ;;  %2586 = vadd.xlane.f32.xlu1 %v2585_v17  ;;  %v5230_v15 = vld [vmem:[%s7458_s3 + $0x1] ss:$0 sm:$0xff] }
 0xd7f   :  { %2589 = vadd.xlane.f32.xlu0 %v2588_v20 }
 0xe00   :  { %v2581_v13 = vpop.xlane.xlu1 %2580 }
 0xe01   :  { %v2591_v22 = vmul.f32 0.03125, %v2581_v13 }
 0xe03   :  { %v2595_v23 = vsub.f32 %v2573_v9, %v2591_v22 }
 0xe04   :  { %v2584_v24 = vpop.xlane.xlu0 %2583  ;;  %v2587_v19 = vpop.xlane.xlu1 %2586 }
 0xe05   :  { %v2592_v25 = vmul.f32 0.03125, %v2584_v24  ;;  %v2593_v21 = vmul.f32 0.03125, %v2587_v19  ;;  %v2599_v26 = vmul.f32 %v2595_v23, %v2595_v23 }
 0xe07   :  { %v2596_v27 = vsub.f32 %v2574_v14, %v2592_v25  ;;  %v2597_v28 = vsub.f32 %v2575_v12, %v2593_v21  ;;  %v2603_v29 = vsel %vm236_vm0, %v2599_v26, 0.0 }
 0xe08   :  { %v2590_v16 = vpop.xlane.xlu0 %2589  ;;  %2604 = vadd.xlane.f32.xlu1 %v2603_v29 }
 0xe09   :  { %v2594_v30 = vmul.f32 0.03125, %v2590_v16  ;;  %v2600_v37 = vmul.f32 %v2596_v27, %v2596_v27  ;;  %v2601_v38 = vmul.f32 %v2597_v28, %v2597_v28 }
 0xe0b   :  { %v2598_v39 = vsub.f32 %v2576_v18, %v2594_v30  ;;  %v2606_v58 = vsel %vm236_vm0, %v2600_v37, 0.0  ;;  %v2609_v40 = vsel %vm236_vm0, %v2601_v38, 0.0 }
 0xe0c   :  { %2607 = vadd.xlane.f32.xlu0 %v2606_v58  ;;  %2610 = vadd.xlane.f32.xlu1 %v2609_v40 }
 0xe0d   :  { %v2602_v42 = vmul.f32 %v2598_v39, %v2598_v39 }
 0xe0f   :  { %v2612_v43 = vsel %vm236_vm0, %v2602_v42, 0.0 }
 0xe10   :  { %2613 = vadd.xlane.f32.xlu0 %v2612_v43 }
 0xe91   :  { %v2605_v3 = vpop.xlane.xlu1 %2604 }
 0xe92   :  { %v2615_v35 = vmul.f32 0.03125, %v2605_v3 }
 0xe94   :  { %v2619_v52 = vadd.f32 1e-05, %v2615_v35 }
 0xe95   :  { %v2608_v61 = vpop.xlane.xlu0 %2607  ;;  %v2611_v2 = vpop.xlane.xlu1 %2610 }
 0xe96   :  { %6083 = vrsqrt.f32 %v2619_v52  ;;  %v2616_v45 = vmul.f32 0.03125, %v2608_v61  ;;  %v2617_v7 = vmul.f32 0.03125, %v2611_v2 }
 0xe98   :  { %v2620_v1 = vadd.f32 1e-05, %v2616_v45  ;;  %v2621_v47 = vadd.f32 1e-05, %v2617_v7 }
 0xe99   :  { %v2614_v36 = vpop.xlane.xlu0 %2613 }
 0xe9a   :  { %6085 = vrsqrt.f32 %v2620_v1  ;;  %v2618_v53 = vmul.f32 0.03125, %v2614_v36 }
 0xe9b   :  { %6087 = vrsqrt.f32 %v2621_v47 }
 0xe9c   :  { %v2622_v54 = vadd.f32 1e-05, %v2618_v53 }
 0xe9e   :  { %6089 = vrsqrt.f32 %v2622_v54 }
 0xea3   :  { %v6084_v41 = vpop.eup %6083 }
 0xea4   :  { %v2627_v56 = vmul.f32 %v6084_v41, %v2595_v23 }
 0xea6   :  { %v2635_v0 = vmul.f32 %v5228_v32, %v2627_v56 }
 0xea7   :  { %v6086_v57 = vpop.eup %6085 }
 0xea8   :  { %v6088_v60 = vpop.eup %6087  ;;  %v2628_v46 = vmul.f32 %v6086_v57, %v2596_v27  ;;  %v7003_v50 = vadd.f32 %v5229_v31, %v2635_v0 }
 0xea9   :  { %v2629_v4 = vmul.f32 %v6088_v60, %v2597_v28 }
 0xeaa   :  { %v2636_v49 = vmul.f32 %v5228_v32, %v2628_v46 }
 0xeab   :  { %v6090_v5 = vpop.eup %6089  ;;  %v2637_v9 = vmul.f32 %v5228_v32, %v2629_v4 }
 0xeac   :  { %v2630_v33 = vmul.f32 %v6090_v5, %v2598_v39  ;;  %v7005_v6 = vadd.f32 %v5229_v31, %v2636_v49 }
 0xead   :  { %v7010_v10 = vadd.f32 %v5229_v31, %v2637_v9 }
 0xeae   :  { %v2647_v34 = vpack.c.bf16 %v7005_v6, %v7003_v50  ;;  %v2638_v51 = vmul.f32 %v5228_v32, %v2630_v33 }
 0xeb0   :  { %5717 = vmatprep.mubr.msk.bf16.mxu1 %vm236_vm0, %v2647_v34  ;;  %v7012_v11 = vadd.f32 %v5229_v31, %v2638_v51 }
 0xeb2   :  { %v2648_v12 = vpack.c.bf16 %v7012_v11, %v7010_v10 }
 0xeb4   :  { %5718 = vmatmul.mubr.msk.bf16.vlgmr.msra.gmra.mxu1 %vm236_vm0, %v2648_v12 }
 0xeb5   :  { %5729 = vmatprep.mubr.msk.bf16.mxu1 %vm6424_vm1, %v6423_v8 }
 0xf74   :  { %v5719_v14 = vpop.f32.mrf.mxu1 }
 0xf75   :  { %v2720_v13 = vadd.f32 %v5719_v14, %v5230_v15 }
 0xf76   :  { %v2711_v17 = vpop.f32.mrf.mxu1 }
 0xf77   :  { %v2712_v18 = vadd.f32 %v5230_v15, %v2711_v17  ;;  %v7026_v19 = vpack.c.bf16 %v2720_v13, %v2720_v13 }
 0xf78   :  { %v5720_v20 = vpop.f32.mrf.mxu1 }
 0xf79   :  { %v7022_v22 = vpack.c.bf16 %v2712_v18, %v2712_v18  ;;  %v2723_v25 = vadd.f32 %v5720_v20, %v5230_v15 }
 0xf7a   :  { %v2714_v23 = vpop.f32.mrf.mxu1 }
 0xf7b   :  { %v2715_v24 = vadd.f32 %v5230_v15, %v2714_v23  ;;  %2731 = vrot.lane.b32.xlu1 %v7022_v22, %s6425_s17  ;;  %v7034_v26 = vpack.c.bf16 %v2723_v25, %v2723_v25 }
 0xf7d   :  { %v7028_v21 = vpack.c.bf16 %v2715_v24, %v2715_v24 }
 0xf7f   :  { %2780 = vrot.lane.b32.xlu0 %v7028_v21, %s6425_s17  ;;  %2829 = vrot.lane.b32.xlu1 %v7026_v19, %s6425_s17 }
 0xf83   :  { %2878 = vrot.lane.b32.xlu1 %v7034_v26, %s6425_s17 }
 0xf87   :  { %2966 = vrot.lane.b32.xlu1 %v7022_v22, %s6412_s0 }
 0xfed   :  { %v2732_v27 = vpop.permute.xlu1 %2731 }
 0xfee   :  { %v2737_v28 = vsel %vm319_vm2, %v2732_v27, 0 }
 0xfef   :  { %5722 = vmatpush3.bf16.xpose.msra.mxu0 %v2737_v28 }
 0xff0   :  { %5733 = vmatprep.subr.bf16.mxu0 %v6423_v8 }
 0xff1   :  { %v2781_v29 = vpop.permute.xlu0 %2780  ;;  %v2830_v16 = vpop.permute.xlu1 %2829 }
 0xff2   :  { %v2786_v30 = vsel %vm319_vm2, %v2781_v29, 0  ;;  %v2835_v38 = vsel %vm319_vm2, %v2830_v16, 0 }
 0xff3   :  { %5728 = vmatpush3.bf16.xpose.msra.mxu1 %v2786_v30 }
 0xff4   :  { %5739 = vmatprep.subr.bf16.mxu1 %v6423_v8 }
 0xff5   :  { %v2879_v37 = vpop.permute.xlu1 %2878 }
 0xff6   :  { %5724 = vmatmul.mubr.msk.bf16.vlgmr.msra.gmra.mxu0 %vm319_vm2, %v7022_v22  ;;  %v2884_v39 = vsel %vm319_vm2, %v2879_v37, 0 }
 0xff7   :  { %5734 = vmatpush3.bf16.xpose.msra.mxu0 %v2835_v38  ;;  %5735 = vmatprep.mubr.msk.bf16.mxu0 %vm6424_vm1, %v6423_v8 }
 0xff8   :  { %5745 = vmatprep.subr.bf16.mxu0 %v6423_v8 }
 0xff9   :  { %v2967_v58 = vpop.permute.xlu1 %2966 }
 0xffa   :  { %5730 = vmatmul.mubr.msk.bf16.vlgmr.msra.gmra.mxu1 %vm319_vm2, %v7028_v21  ;;  %v2972_v40 = vsel %vm558_vm3, %v2967_v58, 0 }
 0xffb   :  { %5740 = vmatpush3.bf16.xpose.msra.mxu1 %v2884_v39  ;;  %5741 = vmatprep.mubr.msk.bf16.mxu1 %vm6424_vm1, %v6423_v8 }
 0xffc   :  { %5751 = vmatprep.subr.bf16.mxu1 %v6423_v8 }
 0xffe   :  { %5736 = vmatmul.mubr.msk.bf16.vlgmr.msra.gmra.mxu0 %vm319_vm2, %v7026_v19 }
 0xfff   :  { %5746 = vmatpush3.bf16.msra.mxu0 %v2972_v40  ;;  %5747 = vmatprep.mubr.msk.bf16.mxu0 %vm6424_vm1, %v6423_v8 }
0x1000   :  { %5757 = vmatprep.subr.bf16.mxu0 %v6423_v8 }
0x1002   :  { %5742 = vmatmul.mubr.msk.bf16.vlgmr.msra.gmra.mxu1 %vm319_vm2, %v7034_v26 }
0x1003   :  { %5753 = vmatprep.mubr.msk.bf16.mxu1 %vm6424_vm1, %v6423_v8 }
0x10b6   :  { %v2773_v42 = vpop.f32.mrf.mxu0 }
0x10b7   :  { %v2774_v43 = vadd.f32 %v2773_v42, %v6620_v44 }
0x10b8   :  { %v5725_v59 = vpop.f32.mrf.mxu0 }
0x10b9   :  { %v2926_v62 = vsel %vm319_vm2, %v2774_v43, -inf }
0x10ba   :  { %v2822_v3 = vpop.f32.mrf.mxu1  ;;  %2927 = vmax.xlane.f32.xlu0 %v2926_v62  ;;  %v2776_v35 = vpop.f32.mrf.mxu0 }
0x10bb   :  { %v2823_v52 = vadd.f32 %v2822_v3, %v6623_v48 }
0x10bc   :  { %v5726_v61 = vpop.f32.mrf.mxu0  ;;  %v5731_v2 = vpop.f32.mrf.mxu1 }
0x10bd   :  { %v2929_v45 = vsel %vm319_vm2, %v2823_v52, -inf }
0x10be   :  { %v2825_v7 = vpop.f32.mrf.mxu1  ;;  %2930 = vmax.xlane.f32.xlu1 %v2929_v45  ;;  %v2871_v1 = vpop.f32.mrf.mxu0 }
0x10bf   :  { %v2872_v47 = vadd.f32 %v2871_v1, %v6627_v55 }
0x10c0   :  { %v5732_v36 = vpop.f32.mrf.mxu1  ;;  %v5737_v53 = vpop.f32.mrf.mxu0 }
0x10c1   :  { %v2932_v54 = vsel %vm319_vm2, %v2872_v47, -inf }
0x10c2   :  { %2933 = vmax.xlane.f32.xlu0 %v2932_v54  ;;  %v2874_v41 = vpop.f32.mrf.mxu0  ;;  %v2920_v56 = vpop.f32.mrf.mxu1 }
0x10c3   :  { %v2921_v32 = vadd.f32 %v2920_v56, %v6631_v63 }
0x10c4   :  { %v5738_v57 = vpop.f32.mrf.mxu0  ;;  %v5743_v60 = vpop.f32.mrf.mxu1 }
0x10c5   :  { %v2935_v46 = vsel %vm319_vm2, %v2921_v32, -inf }
0x10c6   :  { %2936 = vmax.xlane.f32.xlu0 %v2935_v46  ;;  %v2923_v0 = vpop.f32.mrf.mxu1 }
0x10c8   :  { %v5744_v4 = vpop.f32.mrf.mxu1 }
0x10cf   :  { %3062 = vrot.lane.b32.xlu1 %v7026_v19, %s6412_s0 }
0x10d3   :  { %3110 = vrot.lane.b32.xlu1 %v7034_v26, %s6412_s0 }
0x10d7   :  { %3222 = vrot.lane.b32.xlu1 %v7028_v21, %s6427_s23 }
0x10db   :  { %3220 = vrot.lane.b32.xlu1 %v7028_v21, %s6428_s24 }
0x10dc   :  { %3014 = vrot.lane.b32.xlu0 %v7028_v21, %s6412_s0 }
0x10df   :  { %3322 = vrot.lane.b32.xlu1 %v7034_v26, %s6427_s23 }
0x10e0   :  { %3172 = vrot.lane.b32.xlu0 %v7022_v22, %s6427_s23 }
0x10e3   :  { %3320 = vrot.lane.b32.xlu1 %v7034_v26, %s6428_s24 }
0x10e4   :  { %3170 = vrot.lane.b32.xlu0 %v7022_v22, %s6428_s24 }
0x10e7   :  { %3410 = vrot.lane.b32.xlu1 %v7022_v22, %s6429_s25 }
0x10e8   :  { %3272 = vrot.lane.b32.xlu0 %v7026_v19, %s6427_s23  ;;  %s6436_s23 = smov [#allocation19]  }
0x10ec   :  { %3270 = vrot.lane.b32.xlu0 %v7026_v19, %s6428_s24  ;;  %s5156_s24 = sshll.u32 %s6436_s23, 4  ;;  %s5157_s24 = int_to_ptr.vmem [resolvable:$true] %s5156_s24 }
0x10ed   :  { %p6380_p9 = scmp.lt.s32.totalorder %s5157_s24, %s5157_s24 }
0x1143   :  { %v2928_v31 = vpop.xlane.xlu0 %2927 }
0x1144   :  { %v2938_v49 = vsub.f32 %v2774_v43, %v2928_v31 }
0x1146   :  { %v2942_v5 = vmul.f32 1.442695, %v2938_v49 }
0x1147   :  { %v2931_v33 = vpop.xlane.xlu1 %2930 }
0x1148   :  { %6091 = vpow2.f32 %v2942_v5  ;;  %v2939_v9 = vsub.f32 %v2823_v52, %v2931_v33 }
0x114a   :  { %v2944_v34 = vmul.f32 1.442695, %v2939_v9 }
0x114b   :  { %v2934_v51 = vpop.xlane.xlu0 %2933  ;;  %v3063_v12 = vpop.permute.xlu1 %3062 }
0x114c   :  { %6093 = vpow2.f32 %v2944_v34  ;;  %v2940_v14 = vsub.f32 %v2872_v47, %v2934_v51  ;;  %v3068_v29 = vsel %vm558_vm3, %v3063_v12, 0 }
0x114e   :  { %v2946_v15 = vmul.f32 1.442695, %v2940_v14 }
0x114f   :  { %v2937_v17 = vpop.xlane.xlu0 %2936  ;;  %v3111_v18 = vpop.permute.xlu1 %3110 }
0x1150   :  { %6095 = vpow2.f32 %v2946_v15  ;;  %v2941_v20 = vsub.f32 %v2921_v32, %v2937_v17  ;;  %v3116_v39 = vsel %vm558_vm3, %v3111_v18, 0 }
0x1152   :  { %v2948_v13 = vmul.f32 1.442695, %v2941_v20 }
0x1153   :  { %v3015_v23 = vpop.permute.xlu0 %3014  ;;  %v3223_v27 = vpop.permute.xlu1 %3222 }
0x1154   :  { %6097 = vpow2.f32 %v2948_v13  ;;  %v3020_v24 = vsel %vm558_vm3, %v3015_v23, 0  ;;  %v3228_v35 = vsel %vm319_vm2, %v3223_v27, 0 }
0x1155   :  { %v7099_v25 = vpop.eup %6091  ;;  %5752 = vmatpush3.bf16.msra.mxu1 %v3020_v24 }
0x1156   :  { %v2962_v28 = vpack.c.bf16 %v7099_v25, %v7099_v25  ;;  %5763 = vmatprep.subr.bf16.mxu1 %v6423_v8 }
0x1157   :  { %v3173_v30 = vpop.permute.xlu0 %3172  ;;  %v3221_v38 = vpop.permute.xlu1 %3220 }
0x1158   :  { %5748 = vmatmul.mubr.msk.bf16.vlgmr.msra.gmra.mxu0 %vm319_vm2, %v2962_v28  ;;  %v3178_v43 = vsel %vm319_vm2, %v3173_v30, 0 }
0x1159   :  { %v7106_v16 = vpop.eup %6093  ;;  %5758 = vmatpush3.bf16.msra.mxu0 %v3068_v29  ;;  %5759 = vmatprep.mubr.msk.bf16.mxu0 %vm6424_vm1, %v6423_v8 }
0x115a   :  { %v2963_v37 = vpack.c.bf16 %v7106_v16, %v7106_v16  ;;  %5769 = vmatprep.subr.bf16.mxu0 %v6423_v8 }
0x115b   :  { %v3171_v42 = vpop.permute.xlu0 %3170  ;;  %v3323_v62 = vpop.permute.xlu1 %3322 }
0x115c   :  { %5754 = vmatmul.mubr.msk.bf16.vlgmr.msra.gmra.mxu1 %vm319_vm2, %v2963_v37  ;;  %v3328_v45 = vsel %vm319_vm2, %v3323_v62, 0 }
0x115d   :  { %v7115_v58 = vpop.eup %6095  ;;  %5764 = vmatpush3.bf16.msra.mxu1 %v3116_v39  ;;  %5765 = vmatprep.mubr.msk.bf16.mxu1 %vm6424_vm1, %v6423_v8 }
0x115e   :  { %v2964_v40 = vpack.c.bf16 %v7115_v58, %v7115_v58  ;;  %5775 = vmatprep.subr.bf16.mxu1 %v6423_v8 }
0x115f   :  { %v3273_v52 = vpop.permute.xlu0 %3272  ;;  %v3321_v61 = vpop.permute.xlu1 %3320 }
0x1160   :  { %5760 = vmatmul.mubr.msk.bf16.vlgmr.msra.gmra.mxu0 %vm319_vm2, %v2964_v40  ;;  %v3278_v2 = vsel %vm319_vm2, %v3273_v52, 0  ;;  %v2953_v52 = vsel %vm319_vm2, %v7106_v16, 0.0 }
0x1161   :  { %v7124_v59 = vpop.eup %6097  ;;  %5770 = vmatpush3.bf16.xpose.msra.mxu0 %v3178_v43  ;;  %5771 = vmatprep.mubr.msk.bf16.mxu0 %vm6424_vm1, %v6423_v8 }
0x1162   :  { %v2965_v3 = vpack.c.bf16 %v7124_v59, %v7124_v59  ;;  %5781 = vmatprep.subr.bf16.mxu0 %v6423_v8 }
0x1163   :  { %v3411_v7 = vpop.permute.xlu1 %3410  ;;  %v3271_v1 = vpop.permute.xlu0 %3270 }
0x1164   :  { %5766 = vmatmul.mubr.msk.bf16.vlgmr.msra.gmra.mxu1 %vm319_vm2, %v2965_v3  ;;  %v3416_v47 = vsel %vm558_vm3, %v3411_v7, 0 }
0x1165   :  { %5776 = vmatpush3.bf16.xpose.msra.mxu1 %v3228_v35  ;;  %5777 = vmatprep.mubr.msk.bf16.mxu1 %vm6424_vm1, %v6423_v8 }
0x1166   :  { %5787 = vmatprep.subr.bf16.mxu1 %v6423_v8 }
0x1168   :  { %5772 = vmatmul.mubr.msk.bf16.vlgmr.msra.gmra.mxu0 %vm319_vm2, %v3171_v42 }
0x1169   :  { %5782 = vmatpush3.bf16.xpose.msra.mxu0 %v3278_v2  ;;  %5783 = vmatprep.mubr.msk.bf16.mxu0 %vm6424_vm1, %v6423_v8  ;;  %v2950_v2 = vsel %vm319_vm2, %v7099_v25, 0.0 }
0x116a   :  { %5793 = vmatprep.subr.bf16.mxu0 %v6423_v8 }
0x116c   :  { %5778 = vmatmul.mubr.msk.bf16.vlgmr.msra.gmra.mxu1 %vm319_vm2, %v3221_v38 }
0x116d   :  { %5788 = vmatpush3.bf16.xpose.msra.mxu1 %v3328_v45  ;;  %5789 = vmatprep.mubr.msk.bf16.mxu1 %vm6424_vm1, %v6423_v8  ;;  %v2959_v45 = vsel %vm319_vm2, %v7124_v59, 0.0 }
0x116e   :  { %5799 = vmatprep.subr.bf16.mxu1 %v6423_v8 }
0x1170   :  { %5784 = vmatmul.mubr.msk.bf16.vlgmr.msra.gmra.mxu0 %vm319_vm2, %v3271_v1 }
0x1171   :  { %5794 = vmatpush3.bf16.msra.mxu0 %v3416_v47  ;;  %5795 = vmatprep.mubr.msk.bf16.mxu0 %vm6424_vm1, %v6423_v8 }
0x1172   :  { %5805 = vmatprep.subr.bf16.mxu0 %v6423_v8 }
0x1174   :  { %5790 = vmatmul.mubr.msk.bf16.vlgmr.msra.gmra.mxu1 %vm319_vm2, %v3321_v61  ;;  %v2956_v61 = vsel %vm319_vm2, %v7115_v58, 0.0 }
0x1175   :  { %5801 = vmatprep.mubr.msk.bf16.mxu1 %vm6424_vm1, %v6423_v8 }
0x1218   :  { %v7154_v36 = vpop.f32.mrf.mxu0 }
0x121a   :  { %v5749_v53 = vpop.f32.mrf.mxu0 }
0x121c   :  { %v3011_v54 = vpop.f32.mrf.mxu0  ;;  %v7156_v41 = vpop.f32.mrf.mxu1 }
0x121e   :  { %v5750_v56 = vpop.f32.mrf.mxu0  ;;  %v5755_v32 = vpop.f32.mrf.mxu1 }
0x1220   :  { %v3059_v57 = vpop.f32.mrf.mxu1  ;;  %v7158_v60 = vpop.f32.mrf.mxu0 }
0x1222   :  { %v5756_v46 = vpop.f32.mrf.mxu1  ;;  %v5761_v0 = vpop.f32.mrf.mxu0 }
0x1224   :  { %v3107_v4 = vpop.f32.mrf.mxu0  ;;  %v7160_v31 = vpop.f32.mrf.mxu1 }
0x1226   :  { %v5762_v49 = vpop.f32.mrf.mxu0  ;;  %v5767_v5 = vpop.f32.mrf.mxu1 }
0x1228   :  { %v3155_v33 = vpop.f32.mrf.mxu1  ;;  %v3214_v9 = vpop.f32.mrf.mxu0 }
0x1229   :  { %v3215_v34 = vadd.f32 %v3214_v9, %v6620_v44 }
0x122a   :  { %v5768_v51 = vpop.f32.mrf.mxu1  ;;  %v5773_v12 = vpop.f32.mrf.mxu0 }
0x122b   :  { %v3370_v14 = vsel %vm319_vm2, %v3215_v34, -inf }
0x122c   :  { %3371 = vmax.xlane.f32.xlu0 %v3370_v14  ;;  %v3217_v15 = vpop.f32.mrf.mxu0  ;;  %v3264_v17 = vpop.f32.mrf.mxu1 }
0x122d   :  { %v3265_v18 = vadd.f32 %v3264_v17, %v6623_v48  ;;  %v3169_v15 = vld [vmem:[#allocation8 + $0x10] sm:$0xf] }
0x122e   :  { %v5774_v20 = vpop.f32.mrf.mxu0  ;;  %v5779_v13 = vpop.f32.mrf.mxu1 }
0x122f   :  { %v3373_v23 = vsel %vm319_vm2, %v3265_v18, -inf }
0x1230   :  { %v3314_v24 = vpop.f32.mrf.mxu0  ;;  %3374 = vmax.xlane.f32.xlu1 %v3373_v23  ;;  %v3267_v27 = vpop.f32.mrf.mxu1 }
0x1231   :  { %v3315_v28 = vadd.f32 %v3314_v24, %v6627_v55 }
0x1232   :  { %v5780_v29 = vpop.f32.mrf.mxu1  ;;  %v5785_v30 = vpop.f32.mrf.mxu0 }
0x1233   :  { %v3376_v37 = vsel %vm319_vm2, %v3315_v28, -inf }
0x1234   :  { %3377 = vmax.xlane.f32.xlu0 %v3376_v37  ;;  %v3317_v38 = vpop.f32.mrf.mxu0  ;;  %v3364_v39 = vpop.f32.mrf.mxu1 }
0x1235   :  { %v3365_v40 = vadd.f32 %v3364_v39, %v6631_v63 }
0x1236   :  { %v5786_v42 = vpop.f32.mrf.mxu0  ;;  %v5791_v43 = vpop.f32.mrf.mxu1 }
0x1237   :  { %v3379_v62 = vsel %vm319_vm2, %v3365_v40, -inf }
0x1238   :  { %3380 = vmax.xlane.f32.xlu0 %v3379_v62  ;;  %v3367_v3 = vpop.f32.mrf.mxu1 }
0x123a   :  { %v5792_v35 = vpop.f32.mrf.mxu1 }
0x1241   :  { %3506 = vrot.lane.b32.xlu1 %v7026_v19, %s6429_s25 }
0x1245   :  { %3554 = vrot.lane.b32.xlu1 %v7034_v26, %s6429_s25 }
0x124e   :  { %3458 = vrot.lane.b32.xlu0 %v7028_v21, %s6429_s25  ;;  %s6375_s25 = scalar_lea.vmem %s5157_s24, 64 }
0x124f   :  { %p6376_p8 = scmp.ne.s32.totalorder %s5157_s24, %s6375_s25  ;;  %p6381_p10 = scmp.lt.s32.totalorder %s6375_s25, %s6375_s25 }
0x1251   :  { %p6382_p11 = por %p6381_p10, %p6380_p9 }
0x1253   :  { %p6383_p12 = pnand %p6382_p11, %p6376_p8 }
0x1269   :  { %2954 = vadd.xlane.f32.xlu1 %v2953_v52 }
0x126d   :  { %2957 = vadd.xlane.f32.xlu1 %v2956_v61  ;;  %2951 = vadd.xlane.f32.xlu0 %v2950_v2 }
0x1271   :  { %2960 = vadd.xlane.f32.xlu0 %v2959_v45  ;;  %v3613_v45 = vld [vmem:[#allocation8 + $0x14] sm:$0xf] }
0x127e   :  { %3732 = vrot.lane.b32.xlu1 %v7022_v22, %s6430_s26 }
0x12b5   :  { %v3372_v7 = vpop.xlane.xlu0 %3371 }
0x12b6   :  { %v3382_v1 = vsub.f32 %v3215_v34, %v3372_v7 }
0x12b8   :  { %v3386_v47 = vmul.f32 1.442695, %v3382_v1 }
0x12b9   :  { %v3375_v16 = vpop.xlane.xlu1 %3374 }
0x12ba   :  { %6099 = vpow2.f32 %v3386_v47  ;;  %v3383_v53 = vsub.f32 %v3265_v18, %v3375_v16 }
0x12bc   :  { %v3388_v54 = vmul.f32 1.442695, %v3383_v53 }
0x12bd   :  { %v3378_v58 = vpop.xlane.xlu0 %3377  ;;  %v3507_v59 = vpop.permute.xlu1 %3506 }
0x12be   :  { %6101 = vpow2.f32 %v3388_v54  ;;  %v3384_v56 = vsub.f32 %v3315_v28, %v3378_v58  ;;  %v3512_v9 = vsel %vm558_vm3, %v3507_v59, 0  ;;  %v3679_v28 = vsel %vm558_vm3, %v3169_v15, 0 }
0x12c0   :  { %v3390_v25 = vmul.f32 1.442695, %v3384_v56 }
0x12c1   :  { %v3381_v32 = vpop.xlane.xlu0 %3380  ;;  %v3555_v51 = vpop.permute.xlu1 %3554 }
0x12c2   :  { %6103 = vpow2.f32 %v3390_v25  ;;  %v3385_v57 = vsub.f32 %v3365_v40, %v3381_v32  ;;  %v3560_v17 = vsel %vm558_vm3, %v3555_v51, 0 }
0x12c4   :  { %v3392_v46 = vmul.f32 1.442695, %v3385_v57 }
0x12c5   :  { %v3459_v0 = vpop.permute.xlu0 %3458 }
0x12c6   :  { %6105 = vpow2.f32 %v3392_v46  ;;  %v3464_v4 = vsel %vm558_vm3, %v3459_v0, 0 }
0x12c7   :  { %v6100_v49 = vpop.eup %6099  ;;  %5800 = vmatpush3.bf16.msra.mxu1 %v3464_v4 }
0x12c8   :  { %v3394_v5 = vsel %vm319_vm2, %v6100_v49, 0.0  ;;  %v3406_v33 = vpack.c.bf16 %v6100_v49, %v6100_v49  ;;  %5811 = vmatprep.subr.bf16.mxu1 %v6423_v8 }
0x12c9   :  { %3395 = vadd.xlane.f32.xlu0 %v3394_v5 }
0x12ca   :  { %5796 = vmatmul.mubr.msk.bf16.vlgmr.msra.gmra.mxu0 %vm319_vm2, %v3406_v33 }
0x12cb   :  { %v6102_v34 = vpop.eup %6101  ;;  %5806 = vmatpush3.bf16.msra.mxu0 %v3512_v9  ;;  %5807 = vmatprep.mubr.msk.bf16.mxu0 %vm6424_vm1, %v6423_v8 }
0x12cc   :  { %v3397_v12 = vsel %vm319_vm2, %v6102_v34, 0.0  ;;  %v3407_v14 = vpack.c.bf16 %v6102_v34, %v6102_v34  ;;  %5965 = vmatprep.subr.msk.bf16.mxu0 %vm558_vm3, %v3613_v45 }
0x12cd   :  { %3398 = vadd.xlane.f32.xlu0 %v3397_v12 }
0x12ce   :  { %5802 = vmatmul.mubr.msk.bf16.vlgmr.msra.gmra.mxu1 %vm319_vm2, %v3407_v14 }
0x12cf   :  { %v6104_v18 = vpop.eup %6103  ;;  %5812 = vmatpush3.bf16.msra.mxu1 %v3560_v17  ;;  %5813 = vmatprep.mubr.msk.bf16.mxu1 %vm6424_vm1, %v6423_v8 }
0x12d0   :  { %v3400_v20 = vsel %vm319_vm2, %v6104_v18, 0.0  ;;  %v3408_v13 = vpack.c.bf16 %v6104_v18, %v6104_v18  ;;  %5966 = vmatprep.subr.msk.bf16.mxu1 %vm558_vm3, %v3169_v15 }
0x12d1   :  { %3401 = vadd.xlane.f32.xlu1 %v3400_v20 }
0x12d2   :  { %5808 = vmatmul.mubr.msk.bf16.vlgmr.msra.gmra.mxu0 %vm319_vm2, %v3408_v13 }
0x12d3   :  { %v6106_v23 = vpop.eup %6105 }
0x12d4   :  { %v3403_v24 = vsel %vm319_vm2, %v6106_v23, 0.0  ;;  %v3409_v27 = vpack.c.bf16 %v6106_v23, %v6106_v23 }
0x12d5   :  { %3404 = vadd.xlane.f32.xlu0 %v3403_v24 }
0x12d6   :  { %5814 = vmatmul.mubr.msk.bf16.vlgmr.msra.gmra.mxu1 %vm319_vm2, %v3409_v27 }
0x12d7   :  { %5824 = vmatpush3.bf16.msra.mxu1 %v3679_v28 }
0x12d8   :  { %5835 = vmatprep.subr.bf16.mxu1 %v6423_v8 }
0x12e2   :  { %3730 = vrot.lane.b32.xlu1 %v7022_v22, %s6431_s4 }
0x12e6   :  { %3780 = vrot.lane.b32.xlu1 %v7028_v21, %s6431_s4 }
0x12ea   :  { %3882 = vrot.lane.b32.xlu1 %v7034_v26, %s6430_s26 }
0x12eb   :  { %3782 = vrot.lane.b32.xlu0 %v7028_v21, %s6430_s26 }
0x12ee   :  { %3880 = vrot.lane.b32.xlu1 %v7034_v26, %s6431_s4 }
0x12ef   :  { %3832 = vrot.lane.b32.xlu0 %v7026_v19, %s6430_s26 }
0x12f2   :  { %3970 = vrot.lane.b32.xlu1 %v7022_v22, %s6432_s27  ;;  %v2955_v29 = vpop.xlane.xlu1 %2954 }
0x12f3   :  { %3830 = vrot.lane.b32.xlu0 %v7026_v19, %s6431_s4  ;;  %6107 = vrcp.f32 %v2955_v29 }
0x12f6   :  { %v2952_v30 = vpop.xlane.xlu0 %2951  ;;  %v2958_v37 = vpop.xlane.xlu1 %2957 }
0x12f7   :  { %6109 = vrcp.f32 %v2952_v30 }
0x12f8   :  { %6111 = vrcp.f32 %v2958_v37 }
0x12fa   :  { %v2961_v38 = vpop.xlane.xlu0 %2960 }
0x12fb   :  { %6113 = vrcp.f32 %v2961_v38 }
0x1300   :  { %v6108_v39 = vpop.eup %6107 }
0x1301   :  { %v3161_v43 = vmul.f32 %v6108_v39, %v7156_v41 }
0x1304   :  { %v6110_v40 = vpop.eup %6109 }
0x1305   :  { %v3159_v42 = vmul.f32 %v6110_v40, %v7154_v36  ;;  %v6112_v62 = vpop.eup %6111  ;;  %v3621_v36 = vsel %vm558_vm3, %v3613_v45, 0 }
0x1306   :  { %v3163_v52 = vmul.f32 %v6112_v62, %v7158_v60  ;;  %5818 = vmatpush3.bf16.msra.mxu0 %v3621_v36  ;;  %v3733_v60 = vpop.permute.xlu1 %3732 }
0x1307   :  { %v3166_v3 = vpack.c.bf16 %v3161_v43, %v3159_v42  ;;  %5829 = vmatprep.subr.bf16.mxu0 %v6423_v8  ;;  %v3738_v37 = vsel %vm319_vm2, %v3733_v60, 0 }
0x1308   :  { %v6114_v35 = vpop.eup %6113 }
0x1309   :  { %v3165_v61 = vmul.f32 %v6114_v35, %v7160_v31  ;;  %5825 = vmatprep.mubr.msk.bf16.mxu1 %vm319_vm2, %v3166_v3 }
0x130b   :  { %v3167_v2 = vpack.c.bf16 %v3165_v61, %v3163_v52 }
0x130d   :  { %5826 = vmatmul.mubr.msk.bf16.vlgmr.msra.gmra.mxu1 %vm319_vm2, %v3167_v2 }
0x130e   :  { %5837 = vmatprep.mubr.msk.bf16.mxu1 %vm6424_vm1, %v6423_v8 }
0x1352   :  { %v3396_v41 = vpop.xlane.xlu0 %3395 }
0x1353   :  { %6115 = vrcp.f32 %v3396_v41 }
0x1356   :  { %v3399_v7 = vpop.xlane.xlu0 %3398 }
0x1357   :  { %6117 = vrcp.f32 %v3399_v7 }
0x135a   :  { %v3402_v31 = vpop.xlane.xlu1 %3401 }
0x135b   :  { %6119 = vrcp.f32 %v3402_v31 }
0x135e   :  { %v3405_v1 = vpop.xlane.xlu0 %3404  ;;  %v3731_v47 = vpop.permute.xlu1 %3730 }
0x135f   :  { %6121 = vrcp.f32 %v3405_v1 }
0x1360   :  { %v6116_v46 = vpop.eup %6115 }
0x1362   :  { %v3783_v16 = vpop.permute.xlu0 %3782  ;;  %v3781_v53 = vpop.permute.xlu1 %3780 }
0x1363   :  { %v3788_v54 = vsel %vm319_vm2, %v3783_v16, 0 }
0x1364   :  { %5836 = vmatpush3.bf16.xpose.msra.mxu1 %v3788_v54  ;;  %v6118_v59 = vpop.eup %6117 }
0x1365   :  { %5847 = vmatprep.subr.bf16.mxu1 %v6423_v8 }
0x1366   :  { %v3883_v58 = vpop.permute.xlu1 %3882  ;;  %v3833_v39 = vpop.permute.xlu0 %3832 }
0x1367   :  { %v3888_v56 = vsel %vm319_vm2, %v3883_v58, 0  ;;  %v3838_v40 = vsel %vm319_vm2, %v3833_v39, 0 }
0x1368   :  { %v6120_v17 = vpop.eup %6119 }
0x136a   :  { %v3881_v25 = vpop.permute.xlu1 %3880  ;;  %v3831_v43 = vpop.permute.xlu0 %3830 }
0x136b   :  { %5838 = vmatmul.mubr.msk.bf16.vlgmr.msra.gmra.mxu1 %vm319_vm2, %v3781_v53 }
0x136c   :  { %5848 = vmatpush3.bf16.xpose.msra.mxu1 %v3888_v56  ;;  %5849 = vmatprep.mubr.msk.bf16.mxu1 %vm6424_vm1, %v6423_v8  ;;  %v6122_v18 = vpop.eup %6121 }
0x136d   :  { %5859 = vmatprep.subr.bf16.mxu1 %v6423_v8 }
0x136e   :  { %v3971_v42 = vpop.permute.xlu1 %3970 }
0x136f   :  { %v3976_v62 = vsel %vm558_vm3, %v3971_v42, 0 }
0x1373   :  { %5850 = vmatmul.mubr.msk.bf16.vlgmr.msra.gmra.mxu1 %vm319_vm2, %v3881_v25 }
0x1374   :  { %5861 = vmatprep.mubr.msk.bf16.mxu1 %vm6424_vm1, %v6423_v8 }
0x138a   :  { %v3452_v32 = vpop.f32.mrf.mxu0 }
0x138b   :  { %v3603_v49 = vmul.f32 %v6116_v46, %v3452_v32 }
0x138c   :  { %v5797_v57 = vpop.f32.mrf.mxu0 }
0x138e   :  { %v3455_v0 = vpop.f32.mrf.mxu0  ;;  %v3500_v4 = vpop.f32.mrf.mxu1 }
0x138f   :  { %v3605_v5 = vmul.f32 %v6118_v59, %v3500_v4 }
0x1390   :  { %v5798_v33 = vpop.f32.mrf.mxu0  ;;  %v5803_v9 = vpop.f32.mrf.mxu1 }
0x1391   :  { %v3610_v34 = vpack.c.bf16 %v3605_v5, %v3603_v49 }
0x1392   :  { %v3503_v51 = vpop.f32.mrf.mxu1  ;;  %v3548_v12 = vpop.f32.mrf.mxu0 }
0x1393   :  { %5819 = vmatprep.mubr.msk.bf16.mxu0 %vm319_vm2, %v3610_v34  ;;  %v3607_v23 = vmul.f32 %v6120_v17, %v3548_v12 }
0x1394   :  { %v5804_v14 = vpop.f32.mrf.mxu1  ;;  %v5809_v15 = vpop.f32.mrf.mxu0 }
0x1396   :  { %v3551_v20 = vpop.f32.mrf.mxu0  ;;  %v3596_v13 = vpop.f32.mrf.mxu1 }
0x1397   :  { %v3609_v24 = vmul.f32 %v6122_v18, %v3596_v13 }
0x1398   :  { %v5810_v27 = vpop.f32.mrf.mxu0  ;;  %v5815_v28 = vpop.f32.mrf.mxu1 }
0x1399   :  { %v3611_v29 = vpack.c.bf16 %v3609_v24, %v3607_v23 }
0x139a   :  { %v3599_v30 = vpop.f32.mrf.mxu1 }
0x139b   :  { %5820 = vmatmul.mubr.msk.bf16.vlgmr.msra.gmra.mxu0 %vm319_vm2, %v3611_v29 }
0x139c   :  { %5830 = vmatpush3.bf16.xpose.msra.mxu0 %v3738_v37  ;;  %v5816_v38 = vpop.f32.mrf.mxu1  ;;  %5831 = vmatprep.mubr.msk.bf16.mxu0 %vm6424_vm1, %v6423_v8 }
0x139d   :  { %5841 = vmatprep.subr.bf16.mxu0 %v6423_v8 }
0x13a3   :  { %5832 = vmatmul.mubr.msk.bf16.vlgmr.msra.gmra.mxu0 %vm319_vm2, %v3731_v47 }
0x13a4   :  { %5842 = vmatpush3.bf16.xpose.msra.mxu0 %v3838_v40  ;;  %5843 = vmatprep.mubr.msk.bf16.mxu0 %vm6424_vm1, %v6423_v8 }
0x13a5   :  { %5853 = vmatprep.subr.bf16.mxu0 %v6423_v8 }
0x13ab   :  { %5844 = vmatmul.mubr.msk.bf16.vlgmr.msra.gmra.mxu0 %vm319_vm2, %v3831_v43 }
0x13ac   :  { %5854 = vmatpush3.bf16.msra.mxu0 %v3976_v62  ;;  %5855 = vmatprep.mubr.msk.bf16.mxu0 %vm6424_vm1, %v6423_v8 }
0x13ad   :  { %5865 = vmatprep.subr.bf16.mxu0 %v6423_v8 }
0x13cd   :  { %v7258_v3 = vpop.f32.mrf.mxu1 }
0x13cf   :  { %v7260_v35 = vpop.f32.mrf.mxu1 }
0x13d1   :  { %v7262_v52 = vpop.f32.mrf.mxu1 }
0x13d3   :  { %v3718_v61 = vpop.f32.mrf.mxu1 }
0x142b   :  { %v3824_v2 = vpop.f32.mrf.mxu1 }
0x142c   :  { %v3825_v45 = vadd.f32 %v3824_v2, %v6623_v48 }
0x142d   :  { %v5839_v36 = vpop.f32.mrf.mxu1 }
0x142e   :  { %v3933_v41 = vsel %vm319_vm2, %v3825_v45, -inf }
0x142f   :  { %3934 = vmax.xlane.f32.xlu1 %v3933_v41  ;;  %v3827_v60 = vpop.f32.mrf.mxu1 }
0x1431   :  { %v5840_v7 = vpop.f32.mrf.mxu1 }
0x1433   :  { %v3924_v31 = vpop.f32.mrf.mxu1 }
0x1434   :  { %v3925_v1 = vadd.f32 %v3924_v31, %v6631_v63 }
0x1435   :  { %v5851_v47 = vpop.f32.mrf.mxu1 }
0x1436   :  { %v3939_v16 = vsel %vm319_vm2, %v3925_v1, -inf }
0x1437   :  { %3940 = vmax.xlane.f32.xlu0 %v3939_v16  ;;  %v3927_v53 = vpop.f32.mrf.mxu1 }
0x1438   :  { %v4173_v53 = vld [vmem:[#allocation8 + $0x18] sm:$0xf] }
0x1439   :  { %v5852_v54 = vpop.f32.mrf.mxu1 }
0x143a   :  { %v4181_v54 = vsel %vm558_vm3, %v4173_v53, 0 }
0x1440   :  { %4066 = vrot.lane.b32.xlu1 %v7026_v19, %s6432_s27 }
0x1444   :  { %4114 = vrot.lane.b32.xlu1 %v7034_v26, %s6432_s27 }
0x145b   :  { %v7272_v58 = vpop.f32.mrf.mxu0 }
0x145d   :  { %v7274_v56 = vpop.f32.mrf.mxu0 }
0x145f   :  { %v7276_v25 = vpop.f32.mrf.mxu0 }
0x1461   :  { %v3660_v32 = vpop.f32.mrf.mxu0 }
0x1462   :  { %v7278_v57 = vadd.f32 %v3718_v61, %v3660_v32 }
0x1463   :  { %v3774_v46 = vpop.f32.mrf.mxu0 }
0x1464   :  { %v3775_v59 = vadd.f32 %v3774_v46, %v6620_v44 }
0x1465   :  { %v5833_v0 = vpop.f32.mrf.mxu0 }
0x1466   :  { %v3930_v4 = vsel %vm319_vm2, %v3775_v59, -inf }
0x1467   :  { %v3777_v49 = vpop.f32.mrf.mxu0  ;;  %3931 = vmax.xlane.f32.xlu0 %v3930_v4 }
0x1469   :  { %v5834_v5 = vpop.f32.mrf.mxu0 }
0x146b   :  { %v3874_v33 = vpop.f32.mrf.mxu0 }
0x146c   :  { %v3875_v9 = vadd.f32 %v3874_v33, %v6627_v55 }
0x146d   :  { %v5845_v34 = vpop.f32.mrf.mxu0 }
0x146e   :  { %v3936_v51 = vsel %vm319_vm2, %v3875_v9, -inf }
0x146f   :  { %v3877_v12 = vpop.f32.mrf.mxu0  ;;  %3937 = vmax.xlane.f32.xlu0 %v3936_v51 }
0x1471   :  { %v5846_v14 = vpop.f32.mrf.mxu0 }
0x1485   :  { %4018 = vrot.lane.b32.xlu0 %v7028_v21, %s6432_s27 }
0x14b8   :  { %v3935_v15 = vpop.xlane.xlu1 %3934 }
0x14b9   :  { %v3943_v17 = vsub.f32 %v3825_v45, %v3935_v15 }
0x14bb   :  { %v3948_v18 = vmul.f32 1.442695, %v3943_v17 }
0x14bc   :  { %v4067_v39 = vpop.permute.xlu1 %4066 }
0x14bd   :  { %6123 = vpow2.f32 %v3948_v18  ;;  %v4072_v7 = vsel %vm558_vm3, %v4067_v39, 0 }
0x14c0   :  { %v3941_v20 = vpop.xlane.xlu0 %3940  ;;  %v4115_v2 = vpop.permute.xlu1 %4114 }
0x14c1   :  { %v3945_v13 = vsub.f32 %v3925_v1, %v3941_v20  ;;  %v4120_v36 = vsel %vm558_vm3, %v4115_v2, 0 }
0x14c3   :  { %v3952_v23 = vmul.f32 1.442695, %v3945_v13 }
0x14c5   :  { %6125 = vpow2.f32 %v3952_v23 }
0x14ca   :  { %v6124_v24 = vpop.eup %6123 }
0x14cb   :  { %v3957_v27 = vsel %vm319_vm2, %v6124_v24, 0.0  ;;  %v3967_v45 = vpack.c.bf16 %v6124_v24, %v6124_v24 }
0x14cc   :  { %3958 = vadd.xlane.f32.xlu1 %v3957_v27 }
0x14d2   :  { %v6126_v28 = vpop.eup %6125 }
0x14d3   :  { %v3963_v29 = vsel %vm319_vm2, %v6126_v28, 0.0  ;;  %v3969_v31 = vpack.c.bf16 %v6126_v28, %v6126_v28 }
0x14d4   :  { %3964 = vadd.xlane.f32.xlu0 %v3963_v29 }
0x14dd   :  { %4238 = vrot.lane.b32.xlu1 %v7022_v22, %s6433_s28 }
0x14e1   :  { %4236 = vrot.lane.b32.xlu1 %v7022_v22, %s6434_s9 }
0x14e5   :  { %4286 = vrot.lane.b32.xlu1 %v7028_v21, %s6434_s9 }
0x14e9   :  { %4388 = vrot.lane.b32.xlu1 %v7034_v26, %s6433_s28 }
0x14ed   :  { %4386 = vrot.lane.b32.xlu1 %v7034_v26, %s6434_s9 }
0x14f0   :  { %v3932_v30 = vpop.xlane.xlu0 %3931 }
0x14f1   :  { %v3942_v37 = vsub.f32 %v3775_v59, %v3932_v30  ;;  %4476 = vrot.lane.b32.xlu1 %v7022_v22, %s6435_s29 }
0x14f3   :  { %v3946_v38 = vmul.f32 1.442695, %v3942_v37 }
0x14f5   :  { %6127 = vpow2.f32 %v3946_v38 }
0x14f8   :  { %v3938_v40 = vpop.xlane.xlu0 %3937 }
0x14f9   :  { %v3944_v42 = vsub.f32 %v3875_v9, %v3938_v40 }
0x14fb   :  { %v3950_v43 = vmul.f32 1.442695, %v3944_v42 }
0x14fc   :  { %v4019_v62 = vpop.permute.xlu0 %4018 }
0x14fd   :  { %6129 = vpow2.f32 %v3950_v43  ;;  %v4024_v61 = vsel %vm558_vm3, %v4019_v62, 0 }
0x14fe   :  { %5860 = vmatpush3.bf16.msra.mxu1 %v4024_v61 }
0x14ff   :  { %5871 = vmatprep.subr.bf16.mxu1 %v6423_v8 }
0x1501   :  { %5862 = vmatmul.mubr.msk.bf16.vlgmr.msra.gmra.mxu1 %vm319_vm2, %v3967_v45 }
0x1502   :  { %v6128_v22 = vpop.eup %6127  ;;  %5872 = vmatpush3.bf16.msra.mxu1 %v4120_v36  ;;  %5873 = vmatprep.mubr.msk.bf16.mxu1 %vm6424_vm1, %v6423_v8 }
0x1503   :  { %v3966_v41 = vpack.c.bf16 %v6128_v22, %v6128_v22  ;;  %v3954_v60 = vsel %vm319_vm2, %v6128_v22, 0.0  ;;  %5883 = vmatprep.subr.bf16.mxu1 %v6423_v8 }
0x1504   :  { %3955 = vadd.xlane.f32.xlu0 %v3954_v60 }
0x1505   :  { %5856 = vmatmul.mubr.msk.bf16.vlgmr.msra.gmra.mxu0 %vm319_vm2, %v3966_v41 }
0x1506   :  { %5866 = vmatpush3.bf16.msra.mxu0 %v4072_v7  ;;  %5867 = vmatprep.mubr.msk.bf16.mxu0 %vm6424_vm1, %v6423_v8 }
0x1507   :  { %5967 = vmatprep.subr.msk.bf16.mxu0 %vm558_vm3, %v4173_v53 }
0x1509   :  { %5874 = vmatmul.mubr.msk.bf16.vlgmr.msra.gmra.mxu1 %vm319_vm2, %v3969_v31 }
0x150a   :  { %v6130_v1 = vpop.eup %6129  ;;  %5885 = vmatprep.mubr.msk.bf16.mxu1 %vm6424_vm1, %v6423_v8 }
0x150b   :  { %v3968_v47 = vpack.c.bf16 %v6130_v1, %v6130_v1  ;;  %v3960_v16 = vsel %vm319_vm2, %v6130_v1, 0.0 }
0x150c   :  { %3961 = vadd.xlane.f32.xlu0 %v3960_v16 }
0x150d   :  { %5868 = vmatmul.mubr.msk.bf16.vlgmr.msra.gmra.mxu0 %vm319_vm2, %v3968_v47 }
0x150e   :  { %5878 = vmatpush3.bf16.msra.mxu0 %v4181_v54 }
0x150f   :  { %5889 = vmatprep.subr.bf16.mxu0 %v6423_v8 }
0x1522   :  { %4288 = vrot.lane.b32.xlu0 %v7028_v21, %s6433_s28 }
0x1526   :  { %4338 = vrot.lane.b32.xlu0 %v7026_v19, %s6433_s28 }
0x152a   :  { %4336 = vrot.lane.b32.xlu0 %v7026_v19, %s6434_s9 }
0x1555   :  { %v3959_v32 = vpop.xlane.xlu1 %3958 }
0x1556   :  { %6131 = vrcp.f32 %v3959_v32 }
0x1559   :  { %v4239_v46 = vpop.permute.xlu1 %4238 }
0x155a   :  { %v4244_v59 = vsel %vm319_vm2, %v4239_v46, 0 }
0x155b   :  { %5884 = vmatpush3.bf16.xpose.msra.mxu1 %v4244_v59 }
0x155c   :  { %5895 = vmatprep.subr.bf16.mxu1 %v6423_v8 }
0x155d   :  { %v4237_v0 = vpop.permute.xlu1 %4236  ;;  %v3965_v4 = vpop.xlane.xlu0 %3964 }
0x1561   :  { %v4287_v49 = vpop.permute.xlu1 %4286 }
0x1562   :  { %5886 = vmatmul.mubr.msk.bf16.vlgmr.msra.gmra.mxu1 %vm319_vm2, %v4237_v0 }
0x1563   :  { %5897 = vmatprep.mubr.msk.bf16.mxu1 %vm6424_vm1, %v6423_v8  ;;  %v6132_v23 = vpop.eup %6131 }
0x1565   :  { %v4389_v9 = vpop.permute.xlu1 %4388 }
0x1566   :  { %v4394_v53 = vsel %vm319_vm2, %v4389_v9, 0 }
0x1569   :  { %v4387_v51 = vpop.permute.xlu1 %4386 }
0x156d   :  { %v4477_v15 = vpop.permute.xlu1 %4476 }
0x156e   :  { %v4482_v18 = vsel %vm558_vm3, %v4477_v15, 0 }
0x158d   :  { %v3956_v5 = vpop.xlane.xlu0 %3955 }
0x158e   :  { %6133 = vrcp.f32 %v3956_v5 }
0x158f   :  { %6135 = vrcp.f32 %v3965_v4 }
0x1595   :  { %v3962_v33 = vpop.xlane.xlu0 %3961 }
0x1596   :  { %6137 = vrcp.f32 %v3962_v33 }
0x1599   :  { %v4289_v34 = vpop.permute.xlu0 %4288 }
0x159a   :  { %v4294_v47 = vsel %vm319_vm2, %v4289_v34, 0 }
0x159b   :  { %v6134_v24 = vpop.eup %6133 }
0x159c   :  { %v6136_v61 = vpop.eup %6135 }
0x159d   :  { %v4339_v12 = vpop.permute.xlu0 %4338 }
0x159e   :  { %v4344_v14 = vsel %vm319_vm2, %v4339_v12, 0  ;;  %v3724_v12 = vadd.f32 %v7258_v3, %v7272_v58 }
0x159f   :  { %5896 = vmatpush3.bf16.xpose.msra.mxu1 %v4344_v14 }
0x15a0   :  { %5907 = vmatprep.subr.bf16.mxu1 %v6423_v8 }
0x15a1   :  { %v4337_v17 = vpop.permute.xlu0 %4336 }
0x15a3   :  { %v6138_v2 = vpop.eup %6137 }
0x15a6   :  { %5898 = vmatmul.mubr.msk.bf16.vlgmr.msra.gmra.mxu1 %vm319_vm2, %v4337_v17 }
0x15a7   :  { %5908 = vmatpush3.bf16.msra.mxu1 %v4482_v18  ;;  %5909 = vmatprep.mubr.msk.bf16.mxu1 %vm6424_vm1, %v6423_v8  ;;  %v3727_v18 = vadd.f32 %v7262_v52, %v7276_v25 }
0x15a8   :  { %5919 = vmatprep.subr.bf16.mxu1 %v6423_v8 }
0x15c1   :  { %v4060_v20 = vpop.f32.mrf.mxu1 }
0x15c2   :  { %v4165_v29 = vmul.f32 %v6132_v23, %v4060_v20 }
0x15c3   :  { %v5863_v13 = vpop.f32.mrf.mxu1 }
0x15c5   :  { %v4012_v27 = vpop.f32.mrf.mxu0  ;;  %v4063_v28 = vpop.f32.mrf.mxu1 }
0x15c6   :  { %v4163_v30 = vmul.f32 %v6134_v24, %v4012_v27 }
0x15c7   :  { %v5857_v37 = vpop.f32.mrf.mxu0  ;;  %v5864_v38 = vpop.f32.mrf.mxu1 }
0x15c8   :  { %v4170_v39 = vpack.c.bf16 %v4165_v29, %v4163_v30 }
0x15c9   :  { %v4015_v40 = vpop.f32.mrf.mxu0  ;;  %v4156_v42 = vpop.f32.mrf.mxu1 }
0x15ca   :  { %5879 = vmatprep.mubr.msk.bf16.mxu0 %vm319_vm2, %v4170_v39  ;;  %v4169_v22 = vmul.f32 %v6136_v61, %v4156_v42 }
0x15cb   :  { %v5858_v43 = vpop.f32.mrf.mxu0  ;;  %v5875_v62 = vpop.f32.mrf.mxu1 }
0x15cd   :  { %v4108_v45 = vpop.f32.mrf.mxu0  ;;  %v4159_v36 = vpop.f32.mrf.mxu1 }
0x15ce   :  { %v4167_v41 = vmul.f32 %v6138_v2, %v4108_v45 }
0x15cf   :  { %v5869_v60 = vpop.f32.mrf.mxu0  ;;  %v5876_v7 = vpop.f32.mrf.mxu1 }
0x15d0   :  { %v4171_v31 = vpack.c.bf16 %v4169_v22, %v4167_v41 }
0x15d1   :  { %v4111_v1 = vpop.f32.mrf.mxu0 }
0x15d2   :  { %5880 = vmatmul.mubr.msk.bf16.vlgmr.msra.gmra.mxu0 %vm319_vm2, %v4171_v31 }
0x15d3   :  { %5890 = vmatpush3.bf16.xpose.msra.mxu0 %v4294_v47  ;;  %v5870_v16 = vpop.f32.mrf.mxu0  ;;  %5891 = vmatprep.mubr.msk.bf16.mxu0 %vm6424_vm1, %v6423_v8 }
0x15d4   :  { %5901 = vmatprep.subr.bf16.mxu0 %v6423_v8 }
0x15da   :  { %5892 = vmatmul.mubr.msk.bf16.vlgmr.msra.gmra.mxu0 %vm319_vm2, %v4287_v49 }
0x15db   :  { %5902 = vmatpush3.bf16.xpose.msra.mxu0 %v4394_v53  ;;  %5903 = vmatprep.mubr.msk.bf16.mxu0 %vm6424_vm1, %v6423_v8 }
0x15dc   :  { %5913 = vmatprep.subr.bf16.mxu0 %v6423_v8 }
0x15e2   :  { %5904 = vmatmul.mubr.msk.bf16.vlgmr.msra.gmra.mxu0 %vm319_vm2, %v4387_v51 }
0x15e3   :  { %5915 = vmatprep.mubr.msk.bf16.mxu0 %vm6424_vm1, %v6423_v8 }
0x1622   :  { %v4280_v54 = vpop.f32.mrf.mxu1 }
0x1623   :  { %v4281_v32 = vadd.f32 %v4280_v54, %v6620_v44  ;;  %v3716_v44 = vadd.f32 %v7260_v35, %v7274_v56 }
0x1624   :  { %v5887_v46 = vpop.f32.mrf.mxu1 }
0x1625   :  { %v4436_v59 = vsel %vm319_vm2, %v4281_v32, -inf }
0x1626   :  { %4437 = vmax.xlane.f32.xlu0 %v4436_v59  ;;  %v4283_v0 = vpop.f32.mrf.mxu1 }
0x1628   :  { %v5888_v4 = vpop.f32.mrf.mxu1 }
0x1666   :  { %v4380_v49 = vpop.f32.mrf.mxu1 }
0x1667   :  { %v4381_v5 = vadd.f32 %v4380_v49, %v6627_v55  ;;  %v4679_v49 = vld [vmem:[#allocation8 + $0x1c] sm:$0xf] }
0x1668   :  { %v5899_v33 = vpop.f32.mrf.mxu1 }
0x1669   :  { %v4442_v9 = vsel %vm319_vm2, %v4381_v5, -inf }
0x166a   :  { %4443 = vmax.xlane.f32.xlu0 %v4442_v9  ;;  %v4383_v34 = vpop.f32.mrf.mxu1 }
0x166c   :  { %v5900_v51 = vpop.f32.mrf.mxu1 }
0x1692   :  { %v5881_v14 = vpop.f32.mrf.mxu0 }
0x1693   :  { %v7360_v15 = vadd.f32 %v5881_v14, %v3724_v12 }
0x1694   :  { %v4217_v17 = vpop.f32.mrf.mxu0 }
0x1695   :  { %v7364_v55 = vadd.f32 %v4217_v17, %v3716_v44 }
0x1696   :  { %v5882_v20 = vpop.f32.mrf.mxu0 }
0x1697   :  { %v7366_v13 = vadd.f32 %v5882_v20, %v3727_v18 }
0x1698   :  { %v4220_v23 = vpop.f32.mrf.mxu0 }
0x1699   :  { %v7369_v24 = vadd.f32 %v4220_v23, %v7278_v57 }
0x169a   :  { %v4330_v3 = vpop.f32.mrf.mxu0 }
0x169b   :  { %v4331_v58 = vadd.f32 %v4330_v3, %v6623_v48 }
0x169c   :  { %v5893_v27 = vpop.f32.mrf.mxu0 }
0x169d   :  { %v4439_v35 = vsel %vm319_vm2, %v4331_v58, -inf }
0x169e   :  { %4440 = vmax.xlane.f32.xlu1 %v4439_v35  ;;  %v4333_v56 = vpop.f32.mrf.mxu0 }
0x16a0   :  { %v5894_v28 = vpop.f32.mrf.mxu0 }
0x16a2   :  { %v4430_v29 = vpop.f32.mrf.mxu0 }
0x16a3   :  { %v4431_v52 = vadd.f32 %v4430_v29, %v6631_v63 }
0x16a4   :  { %v5905_v25 = vpop.f32.mrf.mxu0 }
0x16a5   :  { %v4445_v30 = vsel %vm319_vm2, %v4431_v52, -inf }
0x16a6   :  { %4446 = vmax.xlane.f32.xlu0 %v4445_v30  ;;  %v4433_v37 = vpop.f32.mrf.mxu0 }
0x16a8   :  { %v5906_v38 = vpop.f32.mrf.mxu0 }
0x16af   :  { %v4438_v57 = vpop.xlane.xlu0 %4437  ;;  %4572 = vrot.lane.b32.xlu1 %v7026_v19, %s6435_s29 }
0x16b0   :  { %v4448_v48 = vsub.f32 %v4281_v32, %v4438_v57 }
0x16b2   :  { %v4452_v39 = vmul.f32 1.442695, %v4448_v48 }
0x16b3   :  { %4620 = vrot.lane.b32.xlu1 %v7034_v26, %s6435_s29 }
0x16b4   :  { %6139 = vpow2.f32 %v4452_v39 }
0x16bc   :  { %4524 = vrot.lane.b32.xlu0 %v7028_v21, %s6435_s29 }
0x16c1   :  { %v6140_v63 = vpop.eup %6139 }
0x16c2   :  { %v4472_v40 = vpack.c.bf16 %v6140_v63, %v6140_v63  ;;  %v4460_v42 = vsel %vm319_vm2, %v6140_v63, 0.0 }
0x16c4   :  { %5910 = vmatmul.mubr.msk.bf16.vlgmr.msra.gmra.mxu1 %vm319_vm2, %v4472_v40 }
0x16c5   :  { %5921 = vmatprep.mubr.msk.bf16.mxu1 %vm6424_vm1, %v6423_v8 }
0x16db   :  { %4461 = vadd.xlane.f32.xlu0 %v4460_v42 }
0x16f3   :  { %v4444_v19 = vpop.xlane.xlu0 %4443 }
0x16f4   :  { %v4450_v43 = vsub.f32 %v4381_v5, %v4444_v19  ;;  %v4687_v5 = vsel %vm558_vm3, %v4679_v49, 0 }
0x16f6   :  { %v4456_v62 = vmul.f32 1.442695, %v4450_v43 }
0x16f8   :  { %6141 = vpow2.f32 %v4456_v62 }
0x1705   :  { %v6142_v61 = vpop.eup %6141 }
0x1706   :  { %v4466_v26 = vsel %vm319_vm2, %v6142_v61, 0.0  ;;  %v4474_v41 = vpack.c.bf16 %v6142_v61, %v6142_v61  ;;  %v5275_v61 = vld [vmem:[%s7460_s5 + $0x1] ss:$0 sm:$0xff] }
0x1707   :  { %4467 = vadd.xlane.f32.xlu0 %v4466_v26 }
0x1727   :  { %v4441_v2 = vpop.xlane.xlu1 %4440 }
0x1728   :  { %v4449_v21 = vsub.f32 %v4331_v58, %v4441_v2 }
0x172a   :  { %v4454_v45 = vmul.f32 1.442695, %v4449_v21 }
0x172b   :  { %v4573_v36 = vpop.permute.xlu1 %4572 }
0x172c   :  { %6143 = vpow2.f32 %v4454_v45  ;;  %v4578_v22 = vsel %vm558_vm3, %v4573_v36, 0 }
0x172d   :  { %5920 = vmatpush3.bf16.msra.mxu1 %v4578_v22 }
0x172e   :  { %5968 = vmatprep.subr.msk.bf16.mxu1 %vm558_vm3, %v4679_v49 }
0x172f   :  { %v4447_v60 = vpop.xlane.xlu0 %4446  ;;  %v4621_v53 = vpop.permute.xlu1 %4620 }
0x1730   :  { %v4451_v7 = vsub.f32 %v4431_v52, %v4447_v60  ;;  %5922 = vmatmul.mubr.msk.bf16.vlgmr.msra.gmra.mxu1 %vm319_vm2, %v4474_v41  ;;  %v4626_v46 = vsel %vm558_vm3, %v4621_v53, 0 }
0x1731   :  { %5932 = vmatpush3.bf16.msra.mxu1 %v4687_v5 }
0x1732   :  { %v4458_v31 = vmul.f32 1.442695, %v4451_v7 }
0x1733   :  { %v4525_v1 = vpop.permute.xlu0 %4524 }
0x1734   :  { %6145 = vpow2.f32 %v4458_v31  ;;  %v4530_v47 = vsel %vm558_vm3, %v4525_v1, 0 }
0x1735   :  { %5914 = vmatpush3.bf16.msra.mxu0 %v4530_v47 }
0x1736   :  { %5925 = vmatprep.subr.bf16.mxu0 %v6423_v8 }
0x1739   :  { %v6144_v16 = vpop.eup %6143 }
0x173a   :  { %v4473_v54 = vpack.c.bf16 %v6144_v16, %v6144_v16  ;;  %v4463_v32 = vsel %vm319_vm2, %v6144_v16, 0.0 }
0x173b   :  { %4464 = vadd.xlane.f32.xlu1 %v4463_v32 }
0x173c   :  { %5916 = vmatmul.mubr.msk.bf16.vlgmr.msra.gmra.mxu0 %vm319_vm2, %v4473_v54 }
0x173d   :  { %5926 = vmatpush3.bf16.msra.mxu0 %v4626_v46  ;;  %5927 = vmatprep.mubr.msk.bf16.mxu0 %vm6424_vm1, %v6423_v8 }
0x1741   :  { %v6146_v59 = vpop.eup %6145 }
0x1742   :  { %v4475_v0 = vpack.c.bf16 %v6146_v59, %v6146_v59  ;;  %v4469_v4 = vsel %vm319_vm2, %v6146_v59, 0.0 }
0x1743   :  { %4470 = vadd.xlane.f32.xlu0 %v4469_v4 }
0x1744   :  { %5928 = vmatmul.mubr.msk.bf16.vlgmr.msra.gmra.mxu0 %vm319_vm2, %v4475_v0 }
0x1764   :  { %v4462_v12 = vpop.xlane.xlu0 %4461 }
0x1765   :  { %6147 = vrcp.f32 %v4462_v12 }
0x1772   :  { %v6148_v58 = vpop.eup %6147 }
0x1784   :  { %v4518_v33 = vpop.f32.mrf.mxu1 }
0x1785   :  { %v4669_v56 = vmul.f32 %v6148_v58, %v4518_v33 }
0x1786   :  { %v5911_v9 = vpop.f32.mrf.mxu1 }
0x1788   :  { %v4521_v34 = vpop.f32.mrf.mxu1 }
0x178a   :  { %v5912_v51 = vpop.f32.mrf.mxu1 }
0x1790   :  { %v4468_v44 = vpop.xlane.xlu0 %4467 }
0x17c4   :  { %v4465_v14 = vpop.xlane.xlu1 %4464 }
0x17c5   :  { %6149 = vrcp.f32 %v4465_v14 }
0x17c6   :  { %6151 = vrcp.f32 %v4468_v44 }
0x17cc   :  { %v4471_v20 = vpop.xlane.xlu0 %4470 }
0x17cd   :  { %6153 = vrcp.f32 %v4471_v20  ;;  %v6006_v20 = vld [vmem:[#allocation13 + $0x10] sm:$0xff]  }
0x17d2   :  { %v6150_v27 = vpop.eup %6149 }
0x17d3   :  { %v6152_v37 = vpop.eup %6151 }
0x17da   :  { %v6154_v38 = vpop.eup %6153 }
0x17f0   :  { %v4614_v17 = vpop.f32.mrf.mxu1 }
0x17f1   :  { %v4673_v48 = vmul.f32 %v6152_v37, %v4614_v17 }
0x17f2   :  { %v5923_v18 = vpop.f32.mrf.mxu1 }
0x17f3   :  { %v6005_v18 = vld [vmem:[#allocation13 + $0x18] sm:$0xff]  }
0x17f4   :  { %v4617_v23 = vpop.f32.mrf.mxu1  ;;  %5937 = vmatprep.subr.bf16.mxu0 %v6005_v18 }
0x17f5   :  { %5938 = vmatpush3.bf16.msra.mxu0 %v6005_v18 }
0x17f6   :  { %v5924_v3 = vpop.f32.mrf.mxu1  ;;  %5939 = vmatprep.subr.bf16.mxu0 %v6006_v20 }
0x17f9   :  { %5940 = vmatpush3.bf16.msra.mxu0 %v6006_v20 }
0x17fa   :  { %5953 = vmatprep.subr.bf16.mxu0 %v6423_v8 }
0x17fc   :  { %v4566_v35 = vpop.f32.mrf.mxu0 }
0x17fd   :  { %v4671_v28 = vmul.f32 %v6150_v27, %v4566_v35 }
0x17fe   :  { %v5917_v29 = vpop.f32.mrf.mxu0 }
0x17ff   :  { %v4676_v52 = vpack.c.bf16 %v4671_v28, %v4669_v56 }
0x1800   :  { %v4569_v25 = vpop.f32.mrf.mxu0 }
0x1801   :  { %5933 = vmatprep.mubr.msk.bf16.mxu1 %vm319_vm2, %v4676_v52 }
0x1802   :  { %v5918_v30 = vpop.f32.mrf.mxu0 }
0x1804   :  { %v4662_v57 = vpop.f32.mrf.mxu0 }
0x1805   :  { %v4675_v39 = vmul.f32 %v6154_v38, %v4662_v57 }
0x1806   :  { %v5929_v63 = vpop.f32.mrf.mxu0 }
0x1807   :  { %v4677_v40 = vpack.c.bf16 %v4675_v39, %v4673_v48  ;;  %v5276_v48 = vld [vmem:[%s7461_s6 + $0x1] ss:$0 sm:$0xff] }
0x1808   :  { %v4665_v42 = vpop.f32.mrf.mxu0 }
0x1809   :  { %5934 = vmatmul.mubr.msk.bf16.vlgmr.msra.gmra.mxu1 %vm319_vm2, %v4677_v40 }
0x180a   :  { %v5930_v19 = vpop.f32.mrf.mxu0 }
0x18c9   :  { %v5935_v43 = vpop.f32.mrf.mxu1 }
0x18ca   :  { %v4740_v62 = vadd.f32 %v5935_v43, %v7360_v15  ;;  %v5277_v43 = vld [vmem:[%s7462_s7 + $0x1] ss:$0 sm:$0xff] }
0x18cb   :  { %v4723_v26 = vpop.f32.mrf.mxu1 }
0x18cc   :  { %v4738_v2 = vadd.f32 %v4723_v26, %v7364_v55  ;;  %v4749_v45 = vadd.f32 %v5275_v61, %v4740_v62 }
0x18cd   :  { %v5936_v21 = vpop.f32.mrf.mxu1 }
0x18ce   :  { %v4747_v36 = vadd.f32 %v5275_v61, %v4738_v2  ;;  %v4741_v22 = vadd.f32 %v5936_v21, %v7366_v13  ;;  %v4753_v47 = vadd.f32 %v4749_v45, %v7010_v10 }
0x18cf   :  { %v4726_v41 = vpop.f32.mrf.mxu1 }
0x18d0   :  { %v4739_v60 = vadd.f32 %v4726_v41, %v7369_v24  ;;  %v4751_v7 = vadd.f32 %v4747_v36, %v7003_v50  ;;  %v4750_v31 = vadd.f32 %v5275_v61, %v4741_v22  ;;  %v4763_v55 = vsel %vm236_vm0, %v4753_v47, 0.0 }
0x18d2   :  { %v4748_v1 = vadd.f32 %v5275_v61, %v4739_v60  ;;  %v4757_v15 = vsel %vm236_vm0, %v4751_v7, 0.0  ;;  %v4754_v13 = vadd.f32 %v4750_v31, %v7012_v11  ;;  %v6007_v31 = vld [vmem:[#allocation16 + $0x18] sm:$0xff]  }
0x18d3   :  { %4758 = vadd.xlane.f32.xlu1 %v4757_v15  ;;  %5945 = vmatprep.subr.bf16.mxu1 %v6007_v31 }
0x18d4   :  { %v4752_v16 = vadd.f32 %v4748_v1, %v7005_v6  ;;  %v4766_v24 = vsel %vm236_vm0, %v4754_v13, 0.0  ;;  %5946 = vmatpush3.bf16.msra.mxu1 %v6007_v31  ;;  %v6008_v1 = vld [vmem:[#allocation16 + $0x10] sm:$0xff]  }
0x18d5   :  { %5947 = vmatprep.subr.bf16.mxu1 %v6008_v1 }
0x18d6   :  { %v4760_v53 = vsel %vm236_vm0, %v4752_v16, 0.0 }
0x18d7   :  { %4764 = vadd.xlane.f32.xlu1 %v4763_v55  ;;  %4761 = vadd.xlane.f32.xlu0 %v4760_v53 }
0x18d8   :  { %5948 = vmatpush3.bf16.msra.mxu1 %v6008_v1 }
0x18db   :  { %4767 = vadd.xlane.f32.xlu0 %v4766_v24 }
0x195c   :  { %v4759_v50 = vpop.xlane.xlu1 %4758 }
0x195d   :  { %v4769_v54 = vmul.f32 0.03125, %v4759_v50 }
0x195f   :  { %v4773_v32 = vsub.f32 %v4751_v7, %v4769_v54 }
0x1960   :  { %v4765_v46 = vpop.xlane.xlu1 %4764  ;;  %v4762_v59 = vpop.xlane.xlu0 %4761 }
0x1961   :  { %v4771_v10 = vmul.f32 0.03125, %v4765_v46  ;;  %v4770_v0 = vmul.f32 0.03125, %v4762_v59  ;;  %v4777_v4 = vmul.f32 %v4773_v32, %v4773_v32 }
0x1963   :  { %v4775_v6 = vsub.f32 %v4753_v47, %v4771_v10  ;;  %v4774_v49 = vsub.f32 %v4752_v16, %v4770_v0  ;;  %v4781_v5 = vsel %vm236_vm0, %v4777_v4, 0.0  ;;  %v5278_v16 = vld [vmem:[#allocation14 + $0x1] ss:$0 sm:$0xff] }
0x1964   :  { %4782 = vadd.xlane.f32.xlu1 %v4781_v5  ;;  %v4768_v33 = vpop.xlane.xlu0 %4767 }
0x1965   :  { %v4772_v11 = vmul.f32 0.03125, %v4768_v33  ;;  %v4779_v9 = vmul.f32 %v4775_v6, %v4775_v6  ;;  %v4778_v34 = vmul.f32 %v4774_v49, %v4774_v49 }
0x1967   :  { %v4776_v51 = vsub.f32 %v4754_v13, %v4772_v11  ;;  %v4787_v12 = vsel %vm236_vm0, %v4779_v9, 0.0  ;;  %v4784_v14 = vsel %vm236_vm0, %v4778_v34, 0.0 }
0x1968   :  { %4788 = vadd.xlane.f32.xlu1 %v4787_v12  ;;  %4785 = vadd.xlane.f32.xlu0 %v4784_v14 }
0x1969   :  { %v4780_v44 = vmul.f32 %v4776_v51, %v4776_v51 }
0x196b   :  { %v4790_v17 = vsel %vm236_vm0, %v4780_v44, 0.0 }
0x196c   :  { %4791 = vadd.xlane.f32.xlu0 %v4790_v17 }
0x19ed   :  { %v4783_v23 = vpop.xlane.xlu1 %4782 }
0x19ee   :  { %v4793_v3 = vmul.f32 0.03125, %v4783_v23 }
0x19f0   :  { %v4797_v58 = vadd.f32 1e-05, %v4793_v3 }
0x19f1   :  { %v4789_v27 = vpop.xlane.xlu1 %4788  ;;  %v4786_v35 = vpop.xlane.xlu0 %4785 }
0x19f2   :  { %6155 = vrsqrt.f32 %v4797_v58  ;;  %v4795_v56 = vmul.f32 0.03125, %v4789_v27  ;;  %v4794_v28 = vmul.f32 0.03125, %v4786_v35 }
0x19f4   :  { %v4799_v29 = vadd.f32 1e-05, %v4795_v56  ;;  %v4798_v52 = vadd.f32 1e-05, %v4794_v28 }
0x19f5   :  { %v4792_v25 = vpop.xlane.xlu0 %4791 }
0x19f6   :  { %6157 = vrsqrt.f32 %v4799_v29  ;;  %v4796_v30 = vmul.f32 0.03125, %v4792_v25 }
0x19f7   :  { %6159 = vrsqrt.f32 %v4798_v52 }
0x19f8   :  { %v4800_v37 = vadd.f32 1e-05, %v4796_v30 }
0x19fa   :  { %6161 = vrsqrt.f32 %v4800_v37 }
0x19ff   :  { %v6156_v38 = vpop.eup %6155 }
0x1a00   :  { %v4805_v57 = vmul.f32 %v6156_v38, %v4773_v32 }
0x1a02   :  { %v4813_v19 = vmul.f32 %v5276_v48, %v4805_v57 }
0x1a03   :  { %v6158_v39 = vpop.eup %6157 }
0x1a04   :  { %v6160_v63 = vpop.eup %6159  ;;  %v4807_v40 = vmul.f32 %v6158_v39, %v4775_v6  ;;  %v4821_v21 = vadd.f32 %v5277_v43, %v4813_v19  ;;  %v5283_v6 = vld [vmem:[#allocation17 + $0x1] ss:$0 sm:$0xff] }
0x1a05   :  { %v4806_v42 = vmul.f32 %v6160_v63, %v4774_v49 }
0x1a06   :  { %v4815_v2 = vmul.f32 %v5276_v48, %v4807_v40 }
0x1a07   :  { %v6162_v62 = vpop.eup %6161  ;;  %v4814_v61 = vmul.f32 %v5276_v48, %v4806_v42 }
0x1a08   :  { %v4808_v26 = vmul.f32 %v6162_v62, %v4776_v51  ;;  %v4823_v41 = vadd.f32 %v5277_v43, %v4815_v2  ;;  %v6010_v2 = vld [vmem:[%s7469_s14] sm:$0xff]  }
0x1a09   :  { %v4822_v45 = vadd.f32 %v5277_v43, %v4814_v61 }
0x1a0a   :  { %v4816_v36 = vmul.f32 %v5276_v48, %v4808_v26  ;;  %v6009_v26 = vld [vmem:[%s7469_s14 + $0x8] sm:$0xff]  }
0x1a0b   :  { %v4825_v22 = vpack.c.bf16 %v4822_v45, %v4821_v21 }
0x1a0c   :  { %v4824_v60 = vadd.f32 %v5277_v43, %v4816_v36 }
0x1a0d   :  { %5941 = vmatprep.mubr.msk.bf16.mxu0 %vm236_vm0, %v4825_v22 }
0x1a0e   :  { %v4826_v7 = vpack.c.bf16 %v4824_v60, %v4823_v41 }
0x1a10   :  { %5942 = vmatmul.mubr.msk.bf16.vlgmr.msra.gmra.mxu0 %vm236_vm0, %v4826_v7 }
0x1a11   :  { %5957 = vmatprep.mubr.msk.bf16.mxu0 %vm6424_vm1, %v6423_v8  ;;  %5954 = vmatpush3.bf16.msra.mxu0 %v6009_v26 }
0x1a12   :  { %5955 = vmatprep.subr.bf16.mxu0 %v6423_v8 }
0x1a15   :  { %5956 = vmatpush3.bf16.msra.mxu0 %v6010_v2 }
0x1ad0   :  { %v5943_v15 = vpop.f32.mrf.mxu0 }
0x1ad1   :  { %v4898_v24 = vadd.f32 %v5943_v15, %v5278_v16 }
0x1ad2   :  { %v4889_v47 = vpop.f32.mrf.mxu0 }
0x1ad3   :  { %v4890_v53 = vadd.f32 %v5278_v16, %v4889_v47  ;;  %v4906_v10 = vmax.f32 %v4898_v24, 0.0 }
0x1ad4   :  { %v5944_v55 = vpop.f32.mrf.mxu0 }
0x1ad5   :  { %v4901_v13 = vadd.f32 %v5944_v55, %v5278_v16  ;;  %v4904_v46 = vmax.f32 %v4890_v53, 0.0  ;;  %v5288_v53 = vld [vmem:[#allocation10 + $0x1] ss:$0 sm:$0xff] }
0x1ad6   :  { %v4892_v50 = vpop.f32.mrf.mxu0 }
0x1ad7   :  { %v4893_v54 = vadd.f32 %v5278_v16, %v4892_v50  ;;  %v4907_v32 = vmax.f32 %v4901_v13, 0.0  ;;  %v5289_v50 = vld [vmem:[#allocation11 + $0x1] ss:$0 sm:$0xff] }
0x1ad9   :  { %v4905_v59 = vmax.f32 %v4893_v54, 0.0  ;;  %v4909_v4 = vpack.c.bf16 %v4907_v32, %v4906_v10 }
0x1adb   :  { %v4908_v0 = vpack.c.bf16 %v4905_v59, %v4904_v46 }
0x1add   :  { %5949 = vmatprep.mubr.msk.bf16.mxu1 %vm236_vm0, %v4908_v0 }
0x1ade   :  { %5950 = vmatmul.mubr.msk.bf16.vlgmr.msra.gmra.mxu1 %vm236_vm0, %v4909_v4 }
0x1b9e   :  { %v5951_v49 = vpop.f32.mrf.mxu1 }
0x1b9f   :  { %v4981_v5 = vadd.f32 %v5951_v49, %v5283_v6 }
0x1ba0   :  { %v4972_v33 = vpop.f32.mrf.mxu1 }
0x1ba1   :  { %v4989_v11 = vadd.f32 %v4981_v5, %v4823_v41  ;;  %v4973_v14 = vadd.f32 %v5283_v6, %v4972_v33 }
0x1ba2   :  { %v5952_v9 = vpop.f32.mrf.mxu1 }
0x1ba3   :  { %v4984_v34 = vadd.f32 %v5952_v9, %v5283_v6  ;;  %v4999_v51 = vsel %vm236_vm0, %v4989_v11, 0.0  ;;  %v4987_v23 = vadd.f32 %v4973_v14, %v4821_v21 }
0x1ba4   :  { %5000 = vadd.xlane.f32.xlu0 %v4999_v51  ;;  %v4975_v12 = vpop.f32.mrf.mxu1 }
0x1ba5   :  { %v4990_v44 = vadd.f32 %v4984_v34, %v4824_v60  ;;  %v4976_v17 = vadd.f32 %v5283_v6, %v4975_v12  ;;  %v4993_v58 = vsel %vm236_vm0, %v4987_v23, 0.0 }
0x1ba7   :  { %v4988_v18 = vadd.f32 %v4976_v17, %v4822_v45  ;;  %v5002_v20 = vsel %vm236_vm0, %v4990_v44, 0.0 }
0x1ba8   :  { %5003 = vadd.xlane.f32.xlu0 %v5002_v20 }
0x1ba9   :  { %v4996_v3 = vsel %vm236_vm0, %v4988_v18, 0.0 }
0x1baa   :  { %4997 = vadd.xlane.f32.xlu1 %v4996_v3 }
0x1bae   :  { %4994 = vadd.xlane.f32.xlu1 %v4993_v58 }
0x1c2d   :  { %v5001_v27 = vpop.xlane.xlu0 %5000 }
0x1c2e   :  { %v5007_v35 = vmul.f32 0.03125, %v5001_v27 }
0x1c30   :  { %v5011_v56 = vsub.f32 %v4989_v11, %v5007_v35 }
0x1c31   :  { %v5004_v28 = vpop.xlane.xlu0 %5003 }
0x1c32   :  { %v5008_v29 = vmul.f32 0.03125, %v5004_v28  ;;  %v5015_v52 = vmul.f32 %v5011_v56, %v5011_v56  ;;  %v5290_v28 = vld [vmem:[%s7470_s15] ss:$0 sm:$0xff] }
0x1c33   :  { %v4998_v25 = vpop.xlane.xlu1 %4997 }
0x1c34   :  { %v5012_v30 = vsub.f32 %v4990_v44, %v5008_v29  ;;  %v5006_v37 = vmul.f32 0.03125, %v4998_v25  ;;  %v5023_v38 = vsel %vm236_vm0, %v5015_v52, 0.0 }
0x1c35   :  { %5024 = vadd.xlane.f32.xlu0 %v5023_v38 }
0x1c36   :  { %v5010_v57 = vsub.f32 %v4988_v18, %v5006_v37  ;;  %v5016_v48 = vmul.f32 %v5012_v30, %v5012_v30 }
0x1c37   :  { %v4995_v39 = vpop.xlane.xlu1 %4994 }
0x1c38   :  { %v5005_v63 = vmul.f32 0.03125, %v4995_v39  ;;  %v5026_v40 = vsel %vm236_vm0, %v5016_v48, 0.0  ;;  %v5014_v42 = vmul.f32 %v5010_v57, %v5010_v57 }
0x1c39   :  { %5027 = vadd.xlane.f32.xlu0 %v5026_v40 }
0x1c3a   :  { %v5009_v19 = vsub.f32 %v4987_v23, %v5005_v63  ;;  %v5020_v43 = vsel %vm236_vm0, %v5014_v42, 0.0 }
0x1c3b   :  { %5021 = vadd.xlane.f32.xlu1 %v5020_v43 }
0x1c3c   :  { %v5013_v62 = vmul.f32 %v5009_v19, %v5009_v19 }
0x1c3e   :  { %v5017_v61 = vsel %vm236_vm0, %v5013_v62, 0.0 }
0x1c3f   :  { %5018 = vadd.xlane.f32.xlu1 %v5017_v61 }
0x1cbe   :  { %v5025_v21 = vpop.xlane.xlu0 %5024 }
0x1cbf   :  { %v5031_v45 = vmul.f32 0.03125, %v5025_v21 }
0x1cc1   :  { %v5035_v36 = vadd.f32 1e-05, %v5031_v45 }
0x1cc2   :  { %v5028_v22 = vpop.xlane.xlu0 %5027 }
0x1cc3   :  { %6163 = vrsqrt.f32 %v5035_v36  ;;  %v5032_v41 = vmul.f32 0.03125, %v5028_v22 }
0x1cc4   :  { %v5022_v60 = vpop.xlane.xlu1 %5021 }
0x1cc5   :  { %v5036_v7 = vadd.f32 1e-05, %v5032_v41  ;;  %v5030_v31 = vmul.f32 0.03125, %v5022_v60 }
0x1cc7   :  { %6165 = vrsqrt.f32 %v5036_v7  ;;  %v5034_v1 = vadd.f32 1e-05, %v5030_v31 }
0x1cc8   :  { %v5019_v15 = vpop.xlane.xlu1 %5018 }
0x1cc9   :  { %6167 = vrsqrt.f32 %v5034_v1  ;;  %v5029_v47 = vmul.f32 0.03125, %v5019_v15 }
0x1ccb   :  { %v5033_v16 = vadd.f32 1e-05, %v5029_v47 }
0x1ccd   :  { %6169 = vrsqrt.f32 %v5033_v16 }
0x1cd0   :  { %v6164_v55 = vpop.eup %6163 }
0x1cd1   :  { %v5043_v8 = vmul.f32 %v6164_v55, %v5011_v56 }
0x1cd3   :  { %v5051_v24 = vmul.f32 %v5288_v53, %v5043_v8 }
0x1cd4   :  { %v6166_v13 = vpop.eup %6165 }
0x1cd5   :  { %v5044_v54 = vmul.f32 %v6166_v13, %v5012_v30  ;;  %v5059_v10 = vadd.f32 %v5289_v50, %v5051_v24 }
0x1cd6   :  { %v6168_v32 = vpop.eup %6167 }
0x1cd7   :  { %v5052_v46 = vmul.f32 %v5288_v53, %v5044_v54  ;;  %v5042_v59 = vmul.f32 %v6168_v32, %v5010_v57  ;;  %v5063_v33 = vpack.c.bf16 %v5059_v10, %v5059_v10 }
0x1cd9   :  { %v5060_v0 = vadd.f32 %v5289_v50, %v5052_v46  ;;  %v5050_v4 = vmul.f32 %v5288_v53, %v5042_v59  ;;  %v5082_v14 = vunpack.c.l.b16 %v5063_v33 }
0x1cda   :  { %v6170_v6 = vpop.eup %6169 }
0x1cdb   :  { %v5058_v49 = vadd.f32 %v5289_v50, %v5050_v4  ;;  %v5041_v5 = vmul.f32 %v6170_v6, %v5009_v19  ;;  %v5064_v11 = vpack.c.bf16 %v5060_v0, %v5060_v0  ;;  %v5087_v23 = vrot.slane %v5082_v14, 6 }
0x1cdd   :  { %v5062_v9 = vpack.c.bf16 %v5058_v49, %v5058_v49  ;;  %v5049_v34 = vmul.f32 %v5288_v53, %v5041_v5  ;;  %v5083_v44 = vunpack.c.l.b16 %v5064_v11 }
0x1cdf   :  { %v5081_v51 = vunpack.c.l.b16 %v5062_v9  ;;  %v5057_v12 = vadd.f32 %v5289_v50, %v5049_v34  ;;  %v5090_v3 = vrot.slane %v5083_v44, 5 }
0x1ce1   :  { %v5061_v17 = vpack.c.bf16 %v5057_v12, %v5057_v12  ;;  %v5084_v18 = vrot.slane %v5081_v51, 7 }
0x1ce3   :  { %v5080_v20 = vunpack.c.l.b16 %v5061_v17 }
0x1ce5   :  { %v5086_v58 = vsel %vm5085_vm5, %v5084_v18, %v5080_v20 }
0x1ce6   :  { %v5089_v27 = vsel %vm5088_vm6, %v5087_v23, %v5086_v58 }
0x1ce7   :  { %v5092_v35 = vsel %vm5091_vm7, %v5090_v3, %v5089_v27 }
0x1ce8   :  { %v5093_v56 = vpack.c.b16 %v5092_v35, %v5092_v35 }
0x1cea   :  { %5958 = vmatmul.mubr.msk.bf16.vlgmr.msra.gmra.mxu0 %vm236_vm0, %v5093_v56 }
0x1daa   :  { %v5143_v29 = vpop.f32.mrf.mxu0 }
0x1dab   :  { %v5144_v52 = vadd.f32 %v5290_v28, %v5143_v29 }
0x1dac   :  { %v5959_v25 = vpop.f32.mrf.mxu0 }
0x1dad   :  { %5149 = vst [vmem:[#allocation19] sm:$0xf] %v5144_v52 }
0x1dae   :  { %v5146_v30 = vpop.f32.mrf.mxu0 }
0x1daf   :  { %6386 = shalt.err (!%p6383_p12)
}
0x1db0   :  { %5159 = dma.vmem_to_hbm [thread:$0]  %s5157_s24, 64, %s7471_s16, [#allocation4]   ;;  %v5960_v37 = vpop.f32.mrf.mxu0 }
0x1db1   :  { %6407 = dma.done.wait [#allocation4], 64  }
0x1db2   :  { %6408 = vsyncadd [#allocation4], 4294967232 }
0x1db3   :  { %5163 = vsyncpa [#allocation3], 1 }
0x1db4   :  { %5164 = vsyncpa [#allocation6], 1 }
0x1db5   :  { %5165 = vsyncpa [#allocation9], 1 }
0x1db6   :  { %5166 = vsyncpa [#allocation12], 1 }
0x1db7   :  { %5167 = vsyncpa [#allocation15], 1 }
0x1db8   :  { %5168 = vsyncpa [#allocation18], 1 }
0x1db9   :  { %5169 = vsyncpa [#allocation4], 1 }

</bundles_post_ra>
